<compile_context>
chip_gen: v6e
topology: v6e:2x2x1
jax: 0.10.0
libtpu: 0.0.40
codegen_flags: <defaults>
</compile_context>

<pallas_src>
import numpy as np
import jax
import jax.numpy as jnp
from jax.experimental import pallas as pl
from jax.experimental.pallas import tpu as pltpu

# ----------------------- small synthetic config -----------------------
B = 2
T_RAW = 320
CONV_LAYERS = [(32, 10, 5), (32, 3, 2), (32, 2, 2)]   # (out_channels, kernel, stride)
HIDDEN = 32
N_HEADS = 4
HEAD_DIM = HIDDEN // N_HEADS
FFN = 128
N_LAYERS = 2
POS_KERNEL = 4
POS_GROUPS = 4
LN_EPS = 1e-5
GN_EPS = 1e-5


# --------------------------- in-kernel helpers -------------------------
def _layer_norm(x, g, b):
    mean = jnp.mean(x, axis=-1, keepdims=True)
    var = jnp.mean((x - mean) ** 2, axis=-1, keepdims=True)
    return (x - mean) * jax.lax.rsqrt(var + LN_EPS) * g + b


def _gelu(x):
    # TODO(synk): HF wav2vec2 uses exact erf GELU; tanh approximation used here.
    return jax.nn.gelu(x, approximate=True)


# ----------------------------- kernels --------------------------------
def normalize_kernel(x_ref, o_ref):
    # per-row (per-sample) zero-mean / unit-std, torch .std() is unbiased (N-1)
    x = x_ref[...]
    n = x.shape[1]
    mean = jnp.mean(x, axis=1, keepdims=True)
    diff = x - mean
    var = jnp.sum(diff * diff, axis=1, keepdims=True) / (n - 1)
    std = jnp.maximum(jnp.sqrt(var), 1e-9)
    o_ref[...] = diff / std


def conv_gn_gelu_kernel(p_ref, w_ref, g_ref, b_ref, o_ref):
    # fused: conv-as-matmul + GroupNorm(num_groups == C, i.e. per-channel over time) + GELU
    y = jnp.dot(p_ref[0], w_ref[...], preferred_element_type=jnp.float32)  # [T_out, C]
    mean = jnp.mean(y, axis=0, keepdims=True)
    var = jnp.mean((y - mean) ** 2, axis=0, keepdims=True)
    y = (y - mean) * jax.lax.rsqrt(var + GN_EPS) * g_ref[...] + b_ref[...]
    o_ref[0] = _gelu(y)


def conv_gelu_kernel(p_ref, w_ref, o_ref):
    # fused: conv-as-matmul + GELU
    y = jnp.dot(p_ref[0], w_ref[...], preferred_element_type=jnp.float32)
    o_ref[0] = _gelu(y)


def encoder_kernel(x_ref, fp_ln_g, fp_ln_b, fp_w, fp_b,
                   pos_w, pos_b, enc_ln_g, enc_ln_b,
                   qkv_w, qkv_b, o_w, o_b, ln1_g, ln1_b,
                   ff1_w, ff1_b, ff2_w, ff2_b, ln2_g, ln2_b,
                   out_ref):
    # Whole post-conv network for ONE batch element, fully resident in VMEM.
    h = x_ref[0]                                           # [T, C]
    t = h.shape[0]

    # 1) feature projection: LayerNorm -> Linear (dropout = identity in eval)
    h = _layer_norm(h, fp_ln_g[...], fp_ln_b[...])
    h = jnp.dot(h, fp_w[...], preferred_element_type=jnp.float32) + fp_b[...]

    # 2) positional grouped conv embedding (block-diagonal dense taps) + SamePad trim
    pad = POS_KERNEL // 2
    zeros = jnp.zeros((pad, HIDDEN), jnp.float32)
    hp = jnp.concatenate([zeros, h, zeros], axis=0)        # [T + 2*pad, H]
    acc = jnp.zeros((t, HIDDEN), jnp.float32)
    for k in range(POS_KERNEL):                            # only first T outputs kept
        acc = acc + jnp.dot(hp[k:k + t, :], pos_w[k],
                            preferred_element_type=jnp.float32)
    pos = _gelu(acc + pos_b[...])
    h = _layer_norm(h + pos, enc_ln_g[...], enc_ln_b[...])

    # 3) transformer encoder layers (post-norm, wav2vec2-base style)
    scale = HEAD_DIM ** -0.5
    for l in range(N_LAYERS):
        # packed QKV projection (one matmul, N = 3H)
        qkv = jnp.dot(h, qkv_w[l], preferred_element_type=jnp.float32) + qkv_b[l]
        q = qkv[:, 0:HIDDEN] * scale                       # HF scales the query
        k_ = qkv[:, HIDDEN:2 * HIDDEN]
        v = qkv[:, 2 * HIDDEN:3 * HIDDEN]

        ctx_heads = []
        for hd in range(N_HEADS):
            lo, hi = hd * HEAD_DIM, (hd + 1) * HEAD_DIM
            qh, kh, vh = q[:, lo:hi], k_[:, lo:hi], v[:, lo:hi]
            s = jnp.dot(qh, kh.T, preferred_element_type=jnp.float32)  # [T, T]
            s = s - jnp.max(s, axis=-1, keepdims=True)
            p = jnp.exp(s)
            p = p * pl.reciprocal(jnp.sum(p, axis=-1, keepdims=True), approx=True)
            ctx_heads.append(jnp.dot(p, vh, preferred_element_type=jnp.float32))
        ctx = jnp.concatenate(ctx_heads, axis=-1)          # [T, H]

        attn_out = jnp.dot(ctx, o_w[l], preferred_element_type=jnp.float32) + o_b[l]
        h = _layer_norm(h + attn_out, ln1_g[l], ln1_b[l])  # residual + LN fused

        f = jnp.dot(h, ff1_w[l], preferred_element_type=jnp.float32) + ff1_b[l]
        f = _gelu(f)
        f = jnp.dot(f, ff2_w[l], preferred_element_type=jnp.float32) + ff2_b[l]
        h = _layer_norm(h + f, ln2_g[l], ln2_b[l])

    # 4) hidden.mean(dim=1)
    out_ref[0] = jnp.mean(h, axis=0, keepdims=True)        # [1, H]


# ----------------------------- wrappers --------------------------------
def pallas_normalize(x):
    return pl.pallas_call(
        normalize_kernel,
        out_shape=jax.ShapeDtypeStruct(x.shape, jnp.float32),
    )(x)


def im2col_1d(x, kernel, stride):
    # x: [B, T, C] -> patches [B, T_out, kernel*C], flattened in (k, c) order.
    # Strided slicing (no gather) — cheap XLA glue at this size.
    B_, T_, C_ = x.shape
    t_out = (T_ - kernel) // stride + 1
    cols = [x[:, k:k + stride * (t_out - 1) + 1:stride, :] for k in range(kernel)]
    patches = jnp.stack(cols, axis=2)                      # [B, T_out, K, C]
    return patches.reshape(B_, t_out, kernel * C_), t_out


def pallas_conv_block(patches, w, gn=None):
    # fused conv (matmul) + optional GroupNorm + GELU, grid over batch
    B_, T_out, KC = patches.shape
    Cout = w.shape[1]
    p_spec = pl.BlockSpec((1, T_out, KC), lambda b: (b, 0, 0))
    w_spec = pl.BlockSpec((KC, Cout), lambda b: (0, 0))
    o_spec = pl.BlockSpec((1, T_out, Cout), lambda b: (b, 0, 0))
    if gn is None:
        kernel, in_specs, args = conv_gelu_kernel, [p_spec, w_spec], (patches, w)
    else:
        g, bias = gn
        kernel = conv_gn_gelu_kernel
        in_specs = [p_spec, w_spec,
                    pl.BlockSpec((1, Cout), lambda b: (0, 0)),
                    pl.BlockSpec((1, Cout), lambda b: (0, 0))]
        args = (patches, w, g.reshape(1, Cout), bias.reshape(1, Cout))
    return pl.pallas_call(
        kernel,
        out_shape=jax.ShapeDtypeStruct((B_, T_out, Cout), jnp.float32),
        grid=(B_,),
        in_specs=in_specs,
        out_specs=o_spec,
        compiler_params=pltpu.CompilerParams(dimension_semantics=("parallel",)),
    )(*args)


_ENC_WEIGHT_NAMES = [
    "fp_ln_g", "fp_ln_b", "fp_w", "fp_b",
    "pos_w", "pos_b", "enc_ln_g", "enc_ln_b",
    "qkv_w", "qkv_b", "o_w", "o_b", "ln1_g", "ln1_b",
    "ff1_w", "ff1_b", "ff2_w", "ff2_b", "ln2_g", "ln2_b",
]


def pallas_encoder(feat, params):
    # single fused pallas_call: feature projection + pos conv + all encoder layers + mean-pool
    B_, T_, C_ = feat.shape
    weights = [params[n] for n in _ENC_WEIGHT_NAMES]

    def rep(arr):
        z = (0,) * arr.ndim
        return pl.BlockSpec(arr.shape, lambda b, z=z: z)

    out = pl.pallas_call(
        encoder_kernel,
        out_shape=jax.ShapeDtypeStruct((B_, 1, HIDDEN), jnp.float32),
        grid=(B_,),
        in_specs=[pl.BlockSpec((1, T_, C_), lambda b: (b, 0, 0))]
                 + [rep(wt) for wt in weights],
        out_specs=pl.BlockSpec((1, 1, HIDDEN), lambda b: (b, 0, 0)),
        compiler_params=pltpu.CompilerParams(dimension_semantics=("parallel",)),
    )(feat, *weights)
    return out[:, 0, :]


# ----------------------------- forward --------------------------------
def wav2vec2_forward(raw_audio, params):
    # 1) preprocessing: (x - mean) / clamp(std, 1e-9)
    x = pallas_normalize(raw_audio)

    # 2) conv feature extractor (no conv bias; layer0 has GroupNorm; GELU everywhere)
    h = x[:, :, None]                                      # [B, T, 1]
    for i, (cout, k, s) in enumerate(CONV_LAYERS):
        patches, _ = im2col_1d(h, k, s)
        gn = (params["gn_g"], params["gn_b"]) if i == 0 else None
        h = pallas_conv_block(patches, params[f"conv{i}_w"], gn)

    # 3-6) feature projection, positional conv, encoder layers, mean-pool — one fused kernel
    return pallas_encoder(h, params)


# ----------------------------- params --------------------------------
def init_params(key):
    keys = iter(jax.random.split(key, 64))

    def w(shape, scale=0.05):
        return jax.random.normal(next(keys), shape, jnp.float32) * scale

    params = {}
    cin = 1
    for i, (cout, k, s) in enumerate(CONV_LAYERS):
        # equivalent to torch Conv1d weight [cout, cin, k] -> [k*cin, cout]
        # TODO(synk): real checkpoints need the explicit [cout,cin,k]->[k,cin,cout] permute.
        params[f"conv{i}_w"] = w((k * cin, cout))
        cin = cout
    params["gn_g"] = jnp.ones((CONV_LAYERS[0][0],), jnp.float32)
    params["gn_b"] = jnp.zeros((CONV_LAYERS[0][0],), jnp.float32)

    c_last = CONV_LAYERS[-1][0]
    params["fp_ln_g"] = jnp.ones((1, c_last), jnp.float32)
    params["fp_ln_b"] = jnp.zeros((1, c_last), jnp.float32)
    params["fp_w"] = w((c_last, HIDDEN))
    params["fp_b"] = w((1, HIDDEN))

    # grouped positional conv -> per-tap block-diagonal dense weights [K, H, H]
    # (weight-norm reparam of the HF pos conv is folded into the weight at init)
    hg = HIDDEN // POS_GROUPS
    wg = np.asarray(w((HIDDEN, hg, POS_KERNEL)))           # torch layout [cout, cin/grp, k]
    dense = np.zeros((POS_KERNEL, HIDDEN, HIDDEN), np.float32)
    for g in range(POS_GROUPS):
        sl = slice(g * hg, (g + 1) * hg)
        dense[:, sl, sl] = np.transpose(wg[sl], (2, 1, 0))
    params["pos_w"] = jnp.asarray(dense)                   # [K, H(cin), H(cout)]
    params["pos_b"] = w((1, HIDDEN))
    params["enc_ln_g"] = jnp.ones((1, HIDDEN), jnp.float32)
    params["enc_ln_b"] = jnp.zeros((1, HIDDEN), jnp.float32)

    L = N_LAYERS
    params["qkv_w"] = w((L, HIDDEN, 3 * HIDDEN))           # packed Q|K|V projection
    params["qkv_b"] = w((L, 1, 3 * HIDDEN))
    params["o_w"] = w((L, HIDDEN, HIDDEN))
    params["o_b"] = w((L, 1, HIDDEN))
    params["ln1_g"] = jnp.ones((L, 1, HIDDEN), jnp.float32)
    params["ln1_b"] = jnp.zeros((L, 1, HIDDEN), jnp.float32)
    params["ff1_w"] = w((L, HIDDEN, FFN))
    params["ff1_b"] = w((L, 1, FFN))
    params["ff2_w"] = w((L, FFN, HIDDEN))
    params["ff2_b"] = w((L, 1, HIDDEN))
    params["ln2_g"] = jnp.ones((L, 1, HIDDEN), jnp.float32)
    params["ln2_b"] = jnp.zeros((L, 1, HIDDEN), jnp.float32)
    return params


# ------------------------------- main ---------------------------------
if __name__ == "__main__":
    key = jax.random.PRNGKey(0)
    k_in, k_par = jax.random.split(key)
    raw_audio = jax.random.normal(k_in, (B, T_RAW), jnp.float32)
    params = init_params(k_par)

    out = jax.jit(wav2vec2_forward)(raw_audio, params)
    out = jax.block_until_ready(out)
    assert out.shape == (B, HIDDEN), out.shape
    assert bool(jnp.all(jnp.isfinite(out)))
    print("KERNEL_OK")
</pallas_src>

<mosaic_0001>
module attributes {stable_mosaic.version = 11 : i64} {
  func.func @normalize_kernel(%arg0: memref<2x320xf32, #tpu.memory_space<vmem>>, %arg1: memref<2x320xf32, #tpu.memory_space<vmem>>) attributes {dimension_semantics = [], scalar_prefetch = 0 : i64, scratch_operands = 0 : i64, tpu.core_type = #tpu.core_type<tc>} {
    %c0 = arith.constant 0 : index
    %c0_0 = arith.constant 0 : index
    %0 = vector.load %arg0[%c0, %c0_0] : memref<2x320xf32, #tpu.memory_space<vmem>>, vector<2x320xf32>
    %cst = arith.constant dense<0.000000e+00> : vector<2xf32>
    %1 = vector.multi_reduction <add>, %0, %cst [1] : vector<2x320xf32> to vector<2xf32>
    %2 = vector.shape_cast %1 : vector<2xf32> to vector<2x1xf32>
    %cst_1 = arith.constant 3.200000e+02 : f32
    %3 = vector.broadcast %cst_1 : f32 to vector<2x1xf32>
    %4 = arith.divf %2, %3 : vector<2x1xf32>
    %5 = vector.broadcast %4 : vector<2x1xf32> to vector<2x320xf32>
    %6 = arith.subf %0, %5 : vector<2x320xf32>
    %7 = arith.mulf %6, %6 : vector<2x320xf32>
    %cst_2 = arith.constant dense<0.000000e+00> : vector<2xf32>
    %8 = vector.multi_reduction <add>, %7, %cst_2 [1] : vector<2x320xf32> to vector<2xf32>
    %9 = vector.shape_cast %8 : vector<2xf32> to vector<2x1xf32>
    %cst_3 = arith.constant 3.190000e+02 : f32
    %10 = vector.broadcast %cst_3 : f32 to vector<2x1xf32>
    %11 = arith.divf %9, %10 : vector<2x1xf32>
    %12 = math.sqrt %11 : vector<2x1xf32>
    %cst_4 = arith.constant 9.99999971E-10 : f32
    %13 = vector.broadcast %cst_4 : f32 to vector<2x1xf32>
    %14 = arith.maximumf %12, %13 : vector<2x1xf32>
    %15 = vector.broadcast %14 : vector<2x1xf32> to vector<2x320xf32>
    %16 = arith.divf %6, %15 : vector<2x320xf32>
    %c0_5 = arith.constant 0 : index
    %c0_6 = arith.constant 0 : index
    %17 = vector.load %arg1[%c0_5, %c0_6] : memref<2x320xf32, #tpu.memory_space<vmem>>, vector<2x320xf32>
    tpu.vector_store %arg1[%c0_5, %c0_6], %16 {strides = array<i32>} : memref<2x320xf32, #tpu.memory_space<vmem>>, vector<2x320xf32>,
    return
  }
}

module attributes {stable_mosaic.version = 11 : i64} {
  func.func @conv_gn_gelu_kernel(%arg0: i32, %arg1: memref<1x63x10xf32, #tpu.memory_space<vmem>>, %arg2: memref<10x32xf32, #tpu.memory_space<vmem>>, %arg3: memref<1x32xf32, #tpu.memory_space<vmem>>, %arg4: memref<1x32xf32, #tpu.memory_space<vmem>>, %arg5: memref<1x63x32xf32, #tpu.memory_space<vmem>>) attributes {dimension_semantics = [#tpu.dimension_semantics<parallel>], iteration_bounds = array<i64: 2>, scalar_prefetch = 0 : i64, scratch_operands = 0 : i64, tpu.core_type = #tpu.core_type<tc>, window_params = [{transform_indices = @transform_0, window_bounds = array<i64: 1, 63, 10>}, {pipeline_mode = #tpu.pipeline_mode<synchronous>, transform_indices = @transform_1, window_bounds = array<i64: 10, 32>}, {pipeline_mode = #tpu.pipeline_mode<synchronous>, transform_indices = @transform_2, window_bounds = array<i64: 1, 32>}, {pipeline_mode = #tpu.pipeline_mode<synchronous>, transform_indices = @transform_3, window_bounds = array<i64: 1, 32>}, {transform_indices = @transform_4, window_bounds = array<i64: 1, 63, 32>}]} {
    %c0 = arith.constant 0 : index
    %c0_0 = arith.constant 0 : index
    %c0_1 = arith.constant 0 : index
    %0 = vector.load %arg1[%c0, %c0_0, %c0_1] : memref<1x63x10xf32, #tpu.memory_space<vmem>>, vector<1x63x10xf32>
    %1 = vector.shape_cast %0 : vector<1x63x10xf32> to vector<63x10xf32>
    %c0_2 = arith.constant 0 : index
    %c0_3 = arith.constant 0 : index
    %2 = vector.load %arg2[%c0_2, %c0_3] : memref<10x32xf32, #tpu.memory_space<vmem>>, vector<10x32xf32>
    %cst = arith.constant dense<0.000000e+00> : vector<63x32xf32>
    %3 = tpu.matmul %1, %2, %cst {dimension_numbers = #tpu.dot_dimension_numbers<[1], [0], [0], [1], [0, 0, 1, 1], [], []>} : vector<63x10xf32>, vector<10x32xf32>, vector<63x32xf32> -> vector<63x32xf32>
    %cst_4 = arith.constant dense<0.000000e+00> : vector<32xf32>
    %4 = vector.multi_reduction <add>, %3, %cst_4 [0] : vector<63x32xf32> to vector<32xf32>
    %5 = vector.shape_cast %4 : vector<32xf32> to vector<1x32xf32>
    %cst_5 = arith.constant 6.300000e+01 : f32
    %6 = vector.broadcast %cst_5 : f32 to vector<1x32xf32>
    %7 = arith.divf %5, %6 : vector<1x32xf32>
    %8 = vector.broadcast %7 : vector<1x32xf32> to vector<63x32xf32>
    %9 = arith.subf %3, %8 : vector<63x32xf32>
    %10 = arith.mulf %9, %9 : vector<63x32xf32>
    %cst_6 = arith.constant dense<0.000000e+00> : vector<32xf32>
    %11 = vector.multi_reduction <add>, %10, %cst_6 [0] : vector<63x32xf32> to vector<32xf32>
    %12 = vector.shape_cast %11 : vector<32xf32> to vector<1x32xf32>
    %cst_7 = arith.constant 6.300000e+01 : f32
    %13 = vector.broadcast %cst_7 : f32 to vector<1x32xf32>
    %14 = arith.divf %12, %13 : vector<1x32xf32>
    %15 = vector.broadcast %7 : vector<1x32xf32> to vector<63x32xf32>
    %16 = arith.subf %3, %15 : vector<63x32xf32>
    %cst_8 = arith.constant 9.99999974E-6 : f32
    %17 = vector.broadcast %cst_8 : f32 to vector<1x32xf32>
    %18 = arith.addf %14, %17 : vector<1x32xf32>
    %19 = math.rsqrt %18 : vector<1x32xf32>
    %20 = vector.broadcast %19 : vector<1x32xf32> to vector<63x32xf32>
    %21 = arith.mulf %16, %20 : vector<63x32xf32>
    %c0_9 = arith.constant 0 : index
    %c0_10 = arith.constant 0 : index
    %22 = vector.load %arg3[%c0_9, %c0_10] : memref<1x32xf32, #tpu.memory_space<vmem>>, vector<1x32xf32>
    %23 = vector.broadcast %22 : vector<1x32xf32> to vector<63x32xf32>
    %24 = arith.mulf %21, %23 : vector<63x32xf32>
    %c0_11 = arith.constant 0 : index
    %c0_12 = arith.constant 0 : index
    %25 = vector.load %arg4[%c0_11, %c0_12] : memref<1x32xf32, #tpu.memory_space<vmem>>, vector<1x32xf32>
    %26 = vector.broadcast %25 : vector<1x32xf32> to vector<63x32xf32>
    %27 = arith.addf %24, %26 : vector<63x32xf32>
    %28 = arith.mulf %27, %27 : vector<63x32xf32>
    %29 = arith.mulf %27, %28 : vector<63x32xf32>
    %cst_13 = arith.constant 4.471500e-02 : f32
    %30 = vector.broadcast %cst_13 : f32 to vector<63x32xf32>
    %31 = arith.mulf %30, %29 : vector<63x32xf32>
    %32 = arith.addf %27, %31 : vector<63x32xf32>
    %cst_14 = arith.constant 0.797884583 : f32
    %33 = vector.broadcast %cst_14 : f32 to vector<63x32xf32>
    %34 = arith.mulf %33, %32 : vector<63x32xf32>
    %35 = math.tanh %34 : vector<63x32xf32>
    %cst_15 = arith.constant 1.000000e+00 : f32
    %36 = vector.broadcast %cst_15 : f32 to vector<63x32xf32>
    %37 = arith.addf %36, %35 : vector<63x32xf32>
    %cst_16 = arith.constant 5.000000e-01 : f32
    %38 = vector.broadcast %cst_16 : f32 to vector<63x32xf32>
    %39 = arith.mulf %38, %37 : vector<63x32xf32>
    %40 = arith.mulf %27, %39 : vector<63x32xf32>
    %c0_17 = arith.constant 0 : index
    %c0_18 = arith.constant 0 : index
    %c0_19 = arith.constant 0 : index
    %41 = vector.load %arg5[%c0_17, %c0_18, %c0_19] : memref<1x63x32xf32, #tpu.memory_space<vmem>>, vector<1x63x32xf32>
    %42 = vector.shape_cast %41 : vector<1x63x32xf32> to vector<63x32xf32>
    %43 = vector.shape_cast %40 : vector<63x32xf32> to vector<1x63x32xf32>
    tpu.vector_store %arg5[%c0_17, %c0_18, %c0_19], %43 {strides = array<i32>} : memref<1x63x32xf32, #tpu.memory_space<vmem>>, vector<1x63x32xf32>,
    return
  }
  func.func @transform_0(%arg0: i32) -> (i32, i32, i32) {
    %c0_i32 = arith.constant 0 : i32
    %c0_i32_0 = arith.constant 0 : i32
    %c0_i32_1 = arith.constant 0 : i32
    return %arg0, %c0_i32, %c0_i32_0 : i32, i32, i32
  }
  func.func @transform_1(%arg0: i32) -> (i32, i32) {
    %c0_i32 = arith.constant 0 : i32
    %c0_i32_0 = arith.constant 0 : i32
    %c0_i32_1 = arith.constant 0 : i32
    return %c0_i32, %c0_i32_0 : i32, i32
  }
  func.func @transform_2(%arg0: i32) -> (i32, i32) {
    %c0_i32 = arith.constant 0 : i32
    %c0_i32_0 = arith.constant 0 : i32
    %c0_i32_1 = arith.constant 0 : i32
    return %c0_i32, %c0_i32_0 : i32, i32
  }
  func.func @transform_3(%arg0: i32) -> (i32, i32) {
    %c0_i32 = arith.constant 0 : i32
    %c0_i32_0 = arith.constant 0 : i32
    %c0_i32_1 = arith.constant 0 : i32
    return %c0_i32, %c0_i32_0 : i32, i32
  }
  func.func @transform_4(%arg0: i32) -> (i32, i32, i32) {
    %c0_i32 = arith.constant 0 : i32
    %c0_i32_0 = arith.constant 0 : i32
    %c0_i32_1 = arith.constant 0 : i32
    return %arg0, %c0_i32, %c0_i32_0 : i32, i32, i32
  }
}

module attributes {stable_mosaic.version = 11 : i64} {
  func.func @conv_gelu_kernel(%arg0: i32, %arg1: memref<1x31x96xf32, #tpu.memory_space<vmem>>, %arg2: memref<96x32xf32, #tpu.memory_space<vmem>>, %arg3: memref<1x31x32xf32, #tpu.memory_space<vmem>>) attributes {dimension_semantics = [#tpu.dimension_semantics<parallel>], iteration_bounds = array<i64: 2>, scalar_prefetch = 0 : i64, scratch_operands = 0 : i64, tpu.core_type = #tpu.core_type<tc>, window_params = [{transform_indices = @transform_0, window_bounds = array<i64: 1, 31, 96>}, {pipeline_mode = #tpu.pipeline_mode<synchronous>, transform_indices = @transform_1, window_bounds = array<i64: 96, 32>}, {transform_indices = @transform_2, window_bounds = array<i64: 1, 31, 32>}]} {
    %c0 = arith.constant 0 : index
    %c0_0 = arith.constant 0 : index
    %c0_1 = arith.constant 0 : index
    %0 = vector.load %arg1[%c0, %c0_0, %c0_1] : memref<1x31x96xf32, #tpu.memory_space<vmem>>, vector<1x31x96xf32>
    %1 = vector.shape_cast %0 : vector<1x31x96xf32> to vector<31x96xf32>
    %c0_2 = arith.constant 0 : index
    %c0_3 = arith.constant 0 : index
    %2 = vector.load %arg2[%c0_2, %c0_3] : memref<96x32xf32, #tpu.memory_space<vmem>>, vector<96x32xf32>
    %cst = arith.constant dense<0.000000e+00> : vector<31x32xf32>
    %3 = tpu.matmul %1, %2, %cst {dimension_numbers = #tpu.dot_dimension_numbers<[1], [0], [0], [1], [0, 0, 1, 1], [], []>} : vector<31x96xf32>, vector<96x32xf32>, vector<31x32xf32> -> vector<31x32xf32>
    %4 = arith.mulf %3, %3 : vector<31x32xf32>
    %5 = arith.mulf %3, %4 : vector<31x32xf32>
    %cst_4 = arith.constant 4.471500e-02 : f32
    %6 = vector.broadcast %cst_4 : f32 to vector<31x32xf32>
    %7 = arith.mulf %6, %5 : vector<31x32xf32>
    %8 = arith.addf %3, %7 : vector<31x32xf32>
    %cst_5 = arith.constant 0.797884583 : f32
    %9 = vector.broadcast %cst_5 : f32 to vector<31x32xf32>
    %10 = arith.mulf %9, %8 : vector<31x32xf32>
    %11 = math.tanh %10 : vector<31x32xf32>
    %cst_6 = arith.constant 1.000000e+00 : f32
    %12 = vector.broadcast %cst_6 : f32 to vector<31x32xf32>
    %13 = arith.addf %12, %11 : vector<31x32xf32>
    %cst_7 = arith.constant 5.000000e-01 : f32
    %14 = vector.broadcast %cst_7 : f32 to vector<31x32xf32>
    %15 = arith.mulf %14, %13 : vector<31x32xf32>
    %16 = arith.mulf %3, %15 : vector<31x32xf32>
    %c0_8 = arith.constant 0 : index
    %c0_9 = arith.constant 0 : index
    %c0_10 = arith.constant 0 : index
    %17 = vector.load %arg3[%c0_8, %c0_9, %c0_10] : memref<1x31x32xf32, #tpu.memory_space<vmem>>, vector<1x31x32xf32>
    %18 = vector.shape_cast %17 : vector<1x31x32xf32> to vector<31x32xf32>
    %19 = vector.shape_cast %16 : vector<31x32xf32> to vector<1x31x32xf32>
    tpu.vector_store %arg3[%c0_8, %c0_9, %c0_10], %19 {strides = array<i32>} : memref<1x31x32xf32, #tpu.memory_space<vmem>>, vector<1x31x32xf32>,
    return
  }
  func.func @transform_0(%arg0: i32) -> (i32, i32, i32) {
    %c0_i32 = arith.constant 0 : i32
    %c0_i32_0 = arith.constant 0 : i32
    %c0_i32_1 = arith.constant 0 : i32
    return %arg0, %c0_i32, %c0_i32_0 : i32, i32, i32
  }
  func.func @transform_1(%arg0: i32) -> (i32, i32) {
    %c0_i32 = arith.constant 0 : i32
    %c0_i32_0 = arith.constant 0 : i32
    %c0_i32_1 = arith.constant 0 : i32
    return %c0_i32, %c0_i32_0 : i32, i32
  }
  func.func @transform_2(%arg0: i32) -> (i32, i32, i32) {
    %c0_i32 = arith.constant 0 : i32
    %c0_i32_0 = arith.constant 0 : i32
    %c0_i32_1 = arith.constant 0 : i32
    return %arg0, %c0_i32, %c0_i32_0 : i32, i32, i32
  }
}

module attributes {stable_mosaic.version = 11 : i64} {
  func.func @conv_gelu_kernel(%arg0: i32, %arg1: memref<1x15x64xf32, #tpu.memory_space<vmem>>, %arg2: memref<64x32xf32, #tpu.memory_space<vmem>>, %arg3: memref<1x15x32xf32, #tpu.memory_space<vmem>>) attributes {dimension_semantics = [#tpu.dimension_semantics<parallel>], iteration_bounds = array<i64: 2>, scalar_prefetch = 0 : i64, scratch_operands = 0 : i64, tpu.core_type = #tpu.core_type<tc>, window_params = [{transform_indices = @transform_0, window_bounds = array<i64: 1, 15, 64>}, {pipeline_mode = #tpu.pipeline_mode<synchronous>, transform_indices = @transform_1, window_bounds = array<i64: 64, 32>}, {transform_indices = @transform_2, window_bounds = array<i64: 1, 15, 32>}]} {
    %c0 = arith.constant 0 : index
    %c0_0 = arith.constant 0 : index
    %c0_1 = arith.constant 0 : index
    %0 = vector.load %arg1[%c0, %c0_0, %c0_1] : memref<1x15x64xf32, #tpu.memory_space<vmem>>, vector<1x15x64xf32>
    %1 = vector.shape_cast %0 : vector<1x15x64xf32> to vector<15x64xf32>
    %c0_2 = arith.constant 0 : index
    %c0_3 = arith.constant 0 : index
    %2 = vector.load %arg2[%c0_2, %c0_3] : memref<64x32xf32, #tpu.memory_space<vmem>>, vector<64x32xf32>
    %cst = arith.constant dense<0.000000e+00> : vector<15x32xf32>
    %3 = tpu.matmul %1, %2, %cst {dimension_numbers = #tpu.dot_dimension_numbers<[1], [0], [0], [1], [0, 0, 1, 1], [], []>} : vector<15x64xf32>, vector<64x32xf32>, vector<15x32xf32> -> vector<15x32xf32>
    %4 = arith.mulf %3, %3 : vector<15x32xf32>
    %5 = arith.mulf %3, %4 : vector<15x32xf32>
    %cst_4 = arith.constant 4.471500e-02 : f32
    %6 = vector.broadcast %cst_4 : f32 to vector<15x32xf32>
    %7 = arith.mulf %6, %5 : vector<15x32xf32>
    %8 = arith.addf %3, %7 : vector<15x32xf32>
    %cst_5 = arith.constant 0.797884583 : f32
    %9 = vector.broadcast %cst_5 : f32 to vector<15x32xf32>
    %10 = arith.mulf %9, %8 : vector<15x32xf32>
    %11 = math.tanh %10 : vector<15x32xf32>
    %cst_6 = arith.constant 1.000000e+00 : f32
    %12 = vector.broadcast %cst_6 : f32 to vector<15x32xf32>
    %13 = arith.addf %12, %11 : vector<15x32xf32>
    %cst_7 = arith.constant 5.000000e-01 : f32
    %14 = vector.broadcast %cst_7 : f32 to vector<15x32xf32>
    %15 = arith.mulf %14, %13 : vector<15x32xf32>
    %16 = arith.mulf %3, %15 : vector<15x32xf32>
    %c0_8 = arith.constant 0 : index
    %c0_9 = arith.constant 0 : index
    %c0_10 = arith.constant 0 : index
    %17 = vector.load %arg3[%c0_8, %c0_9, %c0_10] : memref<1x15x32xf32, #tpu.memory_space<vmem>>, vector<1x15x32xf32>
    %18 = vector.shape_cast %17 : vector<1x15x32xf32> to vector<15x32xf32>
    %19 = vector.shape_cast %16 : vector<15x32xf32> to vector<1x15x32xf32>
    tpu.vector_store %arg3[%c0_8, %c0_9, %c0_10], %19 {strides = array<i32>} : memref<1x15x32xf32, #tpu.memory_space<vmem>>, vector<1x15x32xf32>,
    return
  }
  func.func @transform_0(%arg0: i32) -> (i32, i32, i32) {
    %c0_i32 = arith.constant 0 : i32
    %c0_i32_0 = arith.constant 0 : i32
    %c0_i32_1 = arith.constant 0 : i32
    return %arg0, %c0_i32, %c0_i32_0 : i32, i32, i32
  }
  func.func @transform_1(%arg0: i32) -> (i32, i32) {
    %c0_i32 = arith.constant 0 : i32
    %c0_i32_0 = arith.constant 0 : i32
    %c0_i32_1 = arith.constant 0 : i32
    return %c0_i32, %c0_i32_0 : i32, i32
  }
  func.func @transform_2(%arg0: i32) -> (i32, i32, i32) {
    %c0_i32 = arith.constant 0 : i32
    %c0_i32_0 = arith.constant 0 : i32
    %c0_i32_1 = arith.constant 0 : i32
    return %arg0, %c0_i32, %c0_i32_0 : i32, i32, i32
  }
}

module attributes {stable_mosaic.version = 11 : i64} {
  func.func @encoder_kernel(%arg0: i32, %arg1: memref<1x15x32xf32, #tpu.memory_space<vmem>>, %arg2: memref<1x32xf32, #tpu.memory_space<vmem>>, %arg3: memref<1x32xf32, #tpu.memory_space<vmem>>, %arg4: memref<32x32xf32, #tpu.memory_space<vmem>>, %arg5: memref<1x32xf32, #tpu.memory_space<vmem>>, %arg6: memref<4x32x32xf32, #tpu.memory_space<vmem>>, %arg7: memref<1x32xf32, #tpu.memory_space<vmem>>, %arg8: memref<1x32xf32, #tpu.memory_space<vmem>>, %arg9: memref<1x32xf32, #tpu.memory_space<vmem>>, %arg10: memref<2x32x96xf32, #tpu.memory_space<vmem>>, %arg11: memref<2x1x96xf32, #tpu.memory_space<vmem>>, %arg12: memref<2x32x32xf32, #tpu.memory_space<vmem>>, %arg13: memref<2x1x32xf32, #tpu.memory_space<vmem>>, %arg14: memref<2x1x32xf32, #tpu.memory_space<vmem>>, %arg15: memref<2x1x32xf32, #tpu.memory_space<vmem>>, %arg16: memref<2x32x128xf32, #tpu.memory_space<vmem>>, %arg17: memref<2x1x128xf32, #tpu.memory_space<vmem>>, %arg18: memref<2x128x32xf32, #tpu.memory_space<vmem>>, %arg19: memref<2x1x32xf32, #tpu.memory_space<vmem>>, %arg20: memref<2x1x32xf32, #tpu.memory_space<vmem>>, %arg21: memref<2x1x32xf32, #tpu.memory_space<vmem>>, %arg22: memref<1x1x32xf32, #tpu.memory_space<vmem>>) attributes {dimension_semantics = [#tpu.dimension_semantics<parallel>], iteration_bounds = array<i64: 2>, scalar_prefetch = 0 : i64, scratch_operands = 0 : i64, tpu.core_type = #tpu.core_type<tc>, window_params = [{transform_indices = @transform_0, window_bounds = array<i64: 1, 15, 32>}, {pipeline_mode = #tpu.pipeline_mode<synchronous>, transform_indices = @transform_1, window_bounds = array<i64: 1, 32>}, {pipeline_mode = #tpu.pipeline_mode<synchronous>, transform_indices = @transform_2, window_bounds = array<i64: 1, 32>}, {pipeline_mode = #tpu.pipeline_mode<synchronous>, transform_indices = @transform_3, window_bounds = array<i64: 32, 32>}, {pipeline_mode = #tpu.pipeline_mode<synchronous>, transform_indices = @transform_4, window_bounds = array<i64: 1, 32>}, {pipeline_mode = #tpu.pipeline_mode<synchronous>, transform_indices = @transform_5, window_bounds = array<i64: 4, 32, 32>}, {pipeline_mode = #tpu.pipeline_mode<synchronous>, transform_indices = @transform_6, window_bounds = array<i64: 1, 32>}, {pipeline_mode = #tpu.pipeline_mode<synchronous>, transform_indices = @transform_7, window_bounds = array<i64: 1, 32>}, {pipeline_mode = #tpu.pipeline_mode<synchronous>, transform_indices = @transform_8, window_bounds = array<i64: 1, 32>}, {pipeline_mode = #tpu.pipeline_mode<synchronous>, transform_indices = @transform_9, window_bounds = array<i64: 2, 32, 96>}, {pipeline_mode = #tpu.pipeline_mode<synchronous>, transform_indices = @transform_10, window_bounds = array<i64: 2, 1, 96>}, {pipeline_mode = #tpu.pipeline_mode<synchronous>, transform_indices = @transform_11, window_bounds = array<i64: 2, 32, 32>}, {pipeline_mode = #tpu.pipeline_mode<synchronous>, transform_indices = @transform_12, window_bounds = array<i64: 2, 1, 32>}, {pipeline_mode = #tpu.pipeline_mode<synchronous>, transform_indices = @transform_13, window_bounds = array<i64: 2, 1, 32>}, {pipeline_mode = #tpu.pipeline_mode<synchronous>, transform_indices = @transform_14, window_bounds = array<i64: 2, 1, 32>}, {pipeline_mode = #tpu.pipeline_mode<synchronous>, transform_indices = @transform_15, window_bounds = array<i64: 2, 32, 128>}, {pipeline_mode = #tpu.pipeline_mode<synchronous>, transform_indices = @transform_16, window_bounds = array<i64: 2, 1, 128>}, {pipeline_mode = #tpu.pipeline_mode<synchronous>, transform_indices = @transform_17, window_bounds = array<i64: 2, 128, 32>}, {pipeline_mode = #tpu.pipeline_mode<synchronous>, transform_indices = @transform_18, window_bounds = array<i64: 2, 1, 32>}, {pipeline_mode = #tpu.pipeline_mode<synchronous>, transform_indices = @transform_19, window_bounds = array<i64: 2, 1, 32>}, {pipeline_mode = #tpu.pipeline_mode<synchronous>, transform_indices = @transform_20, window_bounds = array<i64: 2, 1, 32>}, {transform_indices = @transform_21, window_bounds = array<i64: 1, 1, 32>}]} {
    %c0 = arith.constant 0 : index
    %c0_0 = arith.constant 0 : index
    %c0_1 = arith.constant 0 : index
    %0 = vector.load %arg1[%c0, %c0_0, %c0_1] : memref<1x15x32xf32, #tpu.memory_space<vmem>>, vector<1x15x32xf32>
    %1 = vector.shape_cast %0 : vector<1x15x32xf32> to vector<15x32xf32>
    %c0_2 = arith.constant 0 : index
    %c0_3 = arith.constant 0 : index
    %2 = vector.load %arg2[%c0_2, %c0_3] : memref<1x32xf32, #tpu.memory_space<vmem>>, vector<1x32xf32>
    %c0_4 = arith.constant 0 : index
    %c0_5 = arith.constant 0 : index
    %3 = vector.load %arg3[%c0_4, %c0_5] : memref<1x32xf32, #tpu.memory_space<vmem>>, vector<1x32xf32>
    %cst = arith.constant dense<0.000000e+00> : vector<15xf32>
    %4 = vector.multi_reduction <add>, %1, %cst [1] : vector<15x32xf32> to vector<15xf32>
    %5 = vector.shape_cast %4 : vector<15xf32> to vector<15x1xf32>
    %cst_6 = arith.constant 3.200000e+01 : f32
    %6 = vector.broadcast %cst_6 : f32 to vector<15x1xf32>
    %7 = arith.divf %5, %6 : vector<15x1xf32>
    %8 = vector.broadcast %7 : vector<15x1xf32> to vector<15x32xf32>
    %9 = arith.subf %1, %8 : vector<15x32xf32>
    %10 = arith.mulf %9, %9 : vector<15x32xf32>
    %cst_7 = arith.constant dense<0.000000e+00> : vector<15xf32>
    %11 = vector.multi_reduction <add>, %10, %cst_7 [1] : vector<15x32xf32> to vector<15xf32>
    %12 = vector.shape_cast %11 : vector<15xf32> to vector<15x1xf32>
    %cst_8 = arith.constant 3.200000e+01 : f32
    %13 = vector.broadcast %cst_8 : f32 to vector<15x1xf32>
    %14 = arith.divf %12, %13 : vector<15x1xf32>
    %15 = vector.broadcast %7 : vector<15x1xf32> to vector<15x32xf32>
    %16 = arith.subf %1, %15 : vector<15x32xf32>
    %cst_9 = arith.constant 9.99999974E-6 : f32
    %17 = vector.broadcast %cst_9 : f32 to vector<15x1xf32>
    %18 = arith.addf %14, %17 : vector<15x1xf32>
    %19 = math.rsqrt %18 : vector<15x1xf32>
    %20 = vector.broadcast %19 : vector<15x1xf32> to vector<15x32xf32>
    %21 = arith.mulf %16, %20 : vector<15x32xf32>
    %22 = vector.broadcast %2 : vector<1x32xf32> to vector<15x32xf32>
    %23 = arith.mulf %21, %22 : vector<15x32xf32>
    %24 = vector.broadcast %3 : vector<1x32xf32> to vector<15x32xf32>
    %25 = arith.addf %23, %24 : vector<15x32xf32>
    %c0_10 = arith.constant 0 : index
    %c0_11 = arith.constant 0 : index
    %26 = vector.load %arg4[%c0_10, %c0_11] : memref<32x32xf32, #tpu.memory_space<vmem>>, vector<32x32xf32>
    %cst_12 = arith.constant dense<0.000000e+00> : vector<15x32xf32>
    %27 = tpu.matmul %25, %26, %cst_12 {dimension_numbers = #tpu.dot_dimension_numbers<[1], [0], [0], [1], [0, 0, 1, 1], [], []>} : vector<15x32xf32>, vector<32x32xf32>, vector<15x32xf32> -> vector<15x32xf32>
    %c0_13 = arith.constant 0 : index
    %c0_14 = arith.constant 0 : index
    %28 = vector.load %arg5[%c0_13, %c0_14] : memref<1x32xf32, #tpu.memory_space<vmem>>, vector<1x32xf32>
    %29 = vector.broadcast %28 : vector<1x32xf32> to vector<15x32xf32>
    %30 = arith.addf %27, %29 : vector<15x32xf32>
    %cst_15 = arith.constant 0.000000e+00 : f32
    %31 = vector.broadcast %cst_15 : f32 to vector<2x32xf32>
    %32 = tpu.concatenate %31, %30, %31 in 0 : vector<2x32xf32>, vector<15x32xf32>, vector<2x32xf32> -> vector<19x32xf32>
    %cst_16 = arith.constant 0.000000e+00 : f32
    %33 = vector.broadcast %cst_16 : f32 to vector<15x32xf32>
    %34 = vector.extract_strided_slice %32 {offsets = [0, 0], sizes = [15, 32], strides = [1, 1]} : vector<19x32xf32> to vector<15x32xf32>
    %c0_17 = arith.constant 0 : index
    %c0_18 = arith.constant 0 : index
    %c0_19 = arith.constant 0 : index
    %35 = vector.load %arg6[%c0_17, %c0_18, %c0_19] : memref<4x32x32xf32, #tpu.memory_space<vmem>>, vector<1x32x32xf32>
    %36 = vector.shape_cast %35 : vector<1x32x32xf32> to vector<32x32xf32>
    %cst_20 = arith.constant dense<0.000000e+00> : vector<15x32xf32>
    %37 = tpu.matmul %34, %36, %cst_20 {dimension_numbers = #tpu.dot_dimension_numbers<[1], [0], [0], [1], [0, 0, 1, 1], [], []>} : vector<15x32xf32>, vector<32x32xf32>, vector<15x32xf32> -> vector<15x32xf32>
    %38 = arith.addf %33, %37 : vector<15x32xf32>
    %39 = vector.extract_strided_slice %32 {offsets = [1, 0], sizes = [15, 32], strides = [1, 1]} : vector<19x32xf32> to vector<15x32xf32>
    %c1 = arith.constant 1 : index
    %c0_21 = arith.constant 0 : index
    %c0_22 = arith.constant 0 : index
    %40 = vector.load %arg6[%c1, %c0_21, %c0_22] : memref<4x32x32xf32, #tpu.memory_space<vmem>>, vector<1x32x32xf32>
    %41 = vector.shape_cast %40 : vector<1x32x32xf32> to vector<32x32xf32>
    %cst_23 = arith.constant dense<0.000000e+00> : vector<15x32xf32>
    %42 = tpu.matmul %39, %41, %cst_23 {dimension_numbers = #tpu.dot_dimension_numbers<[1], [0], [0], [1], [0, 0, 1, 1], [], []>} : vector<15x32xf32>, vector<32x32xf32>, vector<15x32xf32> -> vector<15x32xf32>
    %43 = arith.addf %38, %42 : vector<15x32xf32>
    %44 = vector.extract_strided_slice %32 {offsets = [2, 0], sizes = [15, 32], strides = [1, 1]} : vector<19x32xf32> to vector<15x32xf32>
    %c2 = arith.constant 2 : index
    %c0_24 = arith.constant 0 : index
    %c0_25 = arith.constant 0 : index
    %45 = vector.load %arg6[%c2, %c0_24, %c0_25] : memref<4x32x32xf32, #tpu.memory_space<vmem>>, vector<1x32x32xf32>
    %46 = vector.shape_cast %45 : vector<1x32x32xf32> to vector<32x32xf32>
    %cst_26 = arith.constant dense<0.000000e+00> : vector<15x32xf32>
    %47 = tpu.matmul %44, %46, %cst_26 {dimension_numbers = #tpu.dot_dimension_numbers<[1], [0], [0], [1], [0, 0, 1, 1], [], []>} : vector<15x32xf32>, vector<32x32xf32>, vector<15x32xf32> -> vector<15x32xf32>
    %48 = arith.addf %43, %47 : vector<15x32xf32>
    %49 = vector.extract_strided_slice %32 {offsets = [3, 0], sizes = [15, 32], strides = [1, 1]} : vector<19x32xf32> to vector<15x32xf32>
    %c3 = arith.constant 3 : index
    %c0_27 = arith.constant 0 : index
    %c0_28 = arith.constant 0 : index
    %50 = vector.load %arg6[%c3, %c0_27, %c0_28] : memref<4x32x32xf32, #tpu.memory_space<vmem>>, vector<1x32x32xf32>
    %51 = vector.shape_cast %50 : vector<1x32x32xf32> to vector<32x32xf32>
    %cst_29 = arith.constant dense<0.000000e+00> : vector<15x32xf32>
    %52 = tpu.matmul %49, %51, %cst_29 {dimension_numbers = #tpu.dot_dimension_numbers<[1], [0], [0], [1], [0, 0, 1, 1], [], []>} : vector<15x32xf32>, vector<32x32xf32>, vector<15x32xf32> -> vector<15x32xf32>
    %53 = arith.addf %48, %52 : vector<15x32xf32>
    %c0_30 = arith.constant 0 : index
    %c0_31 = arith.constant 0 : index
    %54 = vector.load %arg7[%c0_30, %c0_31] : memref<1x32xf32, #tpu.memory_space<vmem>>, vector<1x32xf32>
    %55 = vector.broadcast %54 : vector<1x32xf32> to vector<15x32xf32>
    %56 = arith.addf %53, %55 : vector<15x32xf32>
    %57 = arith.mulf %56, %56 : vector<15x32xf32>
    %58 = arith.mulf %56, %57 : vector<15x32xf32>
    %cst_32 = arith.constant 4.471500e-02 : f32
    %59 = vector.broadcast %cst_32 : f32 to vector<15x32xf32>
    %60 = arith.mulf %59, %58 : vector<15x32xf32>
    %61 = arith.addf %56, %60 : vector<15x32xf32>
    %cst_33 = arith.constant 0.797884583 : f32
    %62 = vector.broadcast %cst_33 : f32 to vector<15x32xf32>
    %63 = arith.mulf %62, %61 : vector<15x32xf32>
    %64 = math.tanh %63 : vector<15x32xf32>
    %cst_34 = arith.constant 1.000000e+00 : f32
    %65 = vector.broadcast %cst_34 : f32 to vector<15x32xf32>
    %66 = arith.addf %65, %64 : vector<15x32xf32>
    %cst_35 = arith.constant 5.000000e-01 : f32
    %67 = vector.broadcast %cst_35 : f32 to vector<15x32xf32>
    %68 = arith.mulf %67, %66 : vector<15x32xf32>
    %69 = arith.mulf %56, %68 : vector<15x32xf32>
    %70 = arith.addf %30, %69 : vector<15x32xf32>
    %c0_36 = arith.constant 0 : index
    %c0_37 = arith.constant 0 : index
    %71 = vector.load %arg8[%c0_36, %c0_37] : memref<1x32xf32, #tpu.memory_space<vmem>>, vector<1x32xf32>
    %c0_38 = arith.constant 0 : index
    %c0_39 = arith.constant 0 : index
    %72 = vector.load %arg9[%c0_38, %c0_39] : memref<1x32xf32, #tpu.memory_space<vmem>>, vector<1x32xf32>
    %cst_40 = arith.constant dense<0.000000e+00> : vector<15xf32>
    %73 = vector.multi_reduction <add>, %70, %cst_40 [1] : vector<15x32xf32> to vector<15xf32>
    %74 = vector.shape_cast %73 : vector<15xf32> to vector<15x1xf32>
    %cst_41 = arith.constant 3.200000e+01 : f32
    %75 = vector.broadcast %cst_41 : f32 to vector<15x1xf32>
    %76 = arith.divf %74, %75 : vector<15x1xf32>
    %77 = vector.broadcast %76 : vector<15x1xf32> to vector<15x32xf32>
    %78 = arith.subf %70, %77 : vector<15x32xf32>
    %79 = arith.mulf %78, %78 : vector<15x32xf32>
    %cst_42 = arith.constant dense<0.000000e+00> : vector<15xf32>
    %80 = vector.multi_reduction <add>, %79, %cst_42 [1] : vector<15x32xf32> to vector<15xf32>
    %81 = vector.shape_cast %80 : vector<15xf32> to vector<15x1xf32>
    %cst_43 = arith.constant 3.200000e+01 : f32
    %82 = vector.broadcast %cst_43 : f32 to vector<15x1xf32>
    %83 = arith.divf %81, %82 : vector<15x1xf32>
    %84 = vector.broadcast %76 : vector<15x1xf32> to vector<15x32xf32>
    %85 = arith.subf %70, %84 : vector<15x32xf32>
    %cst_44 = arith.constant 9.99999974E-6 : f32
    %86 = vector.broadcast %cst_44 : f32 to vector<15x1xf32>
    %87 = arith.addf %83, %86 : vector<15x1xf32>
    %88 = math.rsqrt %87 : vector<15x1xf32>
    %89 = vector.broadcast %88 : vector<15x1xf32> to vector<15x32xf32>
    %90 = arith.mulf %85, %89 : vector<15x32xf32>
    %91 = vector.broadcast %71 : vector<1x32xf32> to vector<15x32xf32>
    %92 = arith.mulf %90, %91 : vector<15x32xf32>
    %93 = vector.broadcast %72 : vector<1x32xf32> to vector<15x32xf32>
    %94 = arith.addf %92, %93 : vector<15x32xf32>
    %c0_45 = arith.constant 0 : index
    %c0_46 = arith.constant 0 : index
    %c0_47 = arith.constant 0 : index
    %95 = vector.load %arg10[%c0_45, %c0_46, %c0_47] : memref<2x32x96xf32, #tpu.memory_space<vmem>>, vector<1x32x96xf32>
    %96 = vector.shape_cast %95 : vector<1x32x96xf32> to vector<32x96xf32>
    %cst_48 = arith.constant dense<0.000000e+00> : vector<15x96xf32>
    %97 = tpu.matmul %94, %96, %cst_48 {dimension_numbers = #tpu.dot_dimension_numbers<[1], [0], [0], [1], [0, 0, 1, 1], [], []>} : vector<15x32xf32>, vector<32x96xf32>, vector<15x96xf32> -> vector<15x96xf32>
    %c0_49 = arith.constant 0 : index
    %c0_50 = arith.constant 0 : index
    %c0_51 = arith.constant 0 : index
    %98 = vector.load %arg11[%c0_49, %c0_50, %c0_51] : memref<2x1x96xf32, #tpu.memory_space<vmem>>, vector<1x1x96xf32>
    %99 = vector.shape_cast %98 : vector<1x1x96xf32> to vector<1x96xf32>
    %100 = vector.broadcast %99 : vector<1x96xf32> to vector<15x96xf32>
    %101 = arith.addf %97, %100 : vector<15x96xf32>
    %102 = vector.extract_strided_slice %101 {offsets = [0, 0], sizes = [15, 32], strides = [1, 1]} : vector<15x96xf32> to vector<15x32xf32>
    %cst_52 = arith.constant 0.353553385 : f32
    %103 = vector.broadcast %cst_52 : f32 to vector<15x32xf32>
    %104 = arith.mulf %102, %103 : vector<15x32xf32>
    %105 = vector.extract_strided_slice %101 {offsets = [0, 32], sizes = [15, 32], strides = [1, 1]} : vector<15x96xf32> to vector<15x32xf32>
    %106 = vector.extract_strided_slice %101 {offsets = [0, 64], sizes = [15, 32], strides = [1, 1]} : vector<15x96xf32> to vector<15x32xf32>
    %107 = vector.extract_strided_slice %104 {offsets = [0, 0], sizes = [15, 8], strides = [1, 1]} : vector<15x32xf32> to vector<15x8xf32>
    %108 = vector.extract_strided_slice %105 {offsets = [0, 0], sizes = [15, 8], strides = [1, 1]} : vector<15x32xf32> to vector<15x8xf32>
    %109 = vector.extract_strided_slice %106 {offsets = [0, 0], sizes = [15, 8], strides = [1, 1]} : vector<15x32xf32> to vector<15x8xf32>
    %110 = tpu.transpose %108, [1, 0] : vector<15x8xf32> -> vector<8x15xf32>
    %cst_53 = arith.constant dense<0.000000e+00> : vector<15x15xf32>
    %111 = tpu.matmul %107, %110, %cst_53 {dimension_numbers = #tpu.dot_dimension_numbers<[1], [0], [0], [1], [0, 0, 1, 1], [], []>} : vector<15x8xf32>, vector<8x15xf32>, vector<15x15xf32> -> vector<15x15xf32>
    %cst_54 = arith.constant dense<0xFF800000> : vector<15xf32>
    %112 = vector.multi_reduction <maximumf>, %111, %cst_54 [1] : vector<15x15xf32> to vector<15xf32>
    %113 = vector.shape_cast %112 : vector<15xf32> to vector<15x1xf32>
    %114 = vector.broadcast %113 : vector<15x1xf32> to vector<15x15xf32>
    %115 = arith.subf %111, %114 : vector<15x15xf32>
    %116 = math.exp %115 : vector<15x15xf32>
    %cst_55 = arith.constant dense<0.000000e+00> : vector<15xf32>
    %117 = vector.multi_reduction <add>, %116, %cst_55 [1] : vector<15x15xf32> to vector<15xf32>
    %118 = vector.shape_cast %117 : vector<15xf32> to vector<15x1xf32>
    %119 = tpu.reciprocal %118 {approx = true} : vector<15x1xf32> -> vector<15x1xf32>
    %120 = vector.broadcast %119 : vector<15x1xf32> to vector<15x15xf32>
    %121 = arith.mulf %116, %120 : vector<15x15xf32>
    %cst_56 = arith.constant dense<0.000000e+00> : vector<15x8xf32>
    %122 = tpu.matmul %121, %109, %cst_56 {dimension_numbers = #tpu.dot_dimension_numbers<[1], [0], [0], [1], [0, 0, 1, 1], [], []>} : vector<15x15xf32>, vector<15x8xf32>, vector<15x8xf32> -> vector<15x8xf32>
    %123 = vector.extract_strided_slice %104 {offsets = [0, 8], sizes = [15, 8], strides = [1, 1]} : vector<15x32xf32> to vector<15x8xf32>
    %124 = vector.extract_strided_slice %105 {offsets = [0, 8], sizes = [15, 8], strides = [1, 1]} : vector<15x32xf32> to vector<15x8xf32>
    %125 = vector.extract_strided_slice %106 {offsets = [0, 8], sizes = [15, 8], strides = [1, 1]} : vector<15x32xf32> to vector<15x8xf32>
    %126 = tpu.transpose %124, [1, 0] : vector<15x8xf32> -> vector<8x15xf32>
    %cst_57 = arith.constant dense<0.000000e+00> : vector<15x15xf32>
    %127 = tpu.matmul %123, %126, %cst_57 {dimension_numbers = #tpu.dot_dimension_numbers<[1], [0], [0], [1], [0, 0, 1, 1], [], []>} : vector<15x8xf32>, vector<8x15xf32>, vector<15x15xf32> -> vector<15x15xf32>
    %cst_58 = arith.constant dense<0xFF800000> : vector<15xf32>
    %128 = vector.multi_reduction <maximumf>, %127, %cst_58 [1] : vector<15x15xf32> to vector<15xf32>
    %129 = vector.shape_cast %128 : vector<15xf32> to vector<15x1xf32>
    %130 = vector.broadcast %129 : vector<15x1xf32> to vector<15x15xf32>
    %131 = arith.subf %127, %130 : vector<15x15xf32>
    %132 = math.exp %131 : vector<15x15xf32>
    %cst_59 = arith.constant dense<0.000000e+00> : vector<15xf32>
    %133 = vector.multi_reduction <add>, %132, %cst_59 [1] : vector<15x15xf32> to vector<15xf32>
    %134 = vector.shape_cast %133 : vector<15xf32> to vector<15x1xf32>
    %135 = tpu.reciprocal %134 {approx = true} : vector<15x1xf32> -> vector<15x1xf32>
    %136 = vector.broadcast %135 : vector<15x1xf32> to vector<15x15xf32>
    %137 = arith.mulf %132, %136 : vector<15x15xf32>
    %cst_60 = arith.constant dense<0.000000e+00> : vector<15x8xf32>
    %138 = tpu.matmul %137, %125, %cst_60 {dimension_numbers = #tpu.dot_dimension_numbers<[1], [0], [0], [1], [0, 0, 1, 1], [], []>} : vector<15x15xf32>, vector<15x8xf32>, vector<15x8xf32> -> vector<15x8xf32>
    %139 = vector.extract_strided_slice %104 {offsets = [0, 16], sizes = [15, 8], strides = [1, 1]} : vector<15x32xf32> to vector<15x8xf32>
    %140 = vector.extract_strided_slice %105 {offsets = [0, 16], sizes = [15, 8], strides = [1, 1]} : vector<15x32xf32> to vector<15x8xf32>
    %141 = vector.extract_strided_slice %106 {offsets = [0, 16], sizes = [15, 8], strides = [1, 1]} : vector<15x32xf32> to vector<15x8xf32>
    %142 = tpu.transpose %140, [1, 0] : vector<15x8xf32> -> vector<8x15xf32>
    %cst_61 = arith.constant dense<0.000000e+00> : vector<15x15xf32>
    %143 = tpu.matmul %139, %142, %cst_61 {dimension_numbers = #tpu.dot_dimension_numbers<[1], [0], [0], [1], [0, 0, 1, 1], [], []>} : vector<15x8xf32>, vector<8x15xf32>, vector<15x15xf32> -> vector<15x15xf32>
    %cst_62 = arith.constant dense<0xFF800000> : vector<15xf32>
    %144 = vector.multi_reduction <maximumf>, %143, %cst_62 [1] : vector<15x15xf32> to vector<15xf32>
    %145 = vector.shape_cast %144 : vector<15xf32> to vector<15x1xf32>
    %146 = vector.broadcast %145 : vector<15x1xf32> to vector<15x15xf32>
    %147 = arith.subf %143, %146 : vector<15x15xf32>
    %148 = math.exp %147 : vector<15x15xf32>
    %cst_63 = arith.constant dense<0.000000e+00> : vector<15xf32>
    %149 = vector.multi_reduction <add>, %148, %cst_63 [1] : vector<15x15xf32> to vector<15xf32>
    %150 = vector.shape_cast %149 : vector<15xf32> to vector<15x1xf32>
    %151 = tpu.reciprocal %150 {approx = true} : vector<15x1xf32> -> vector<15x1xf32>
    %152 = vector.broadcast %151 : vector<15x1xf32> to vector<15x15xf32>
    %153 = arith.mulf %148, %152 : vector<15x15xf32>
    %cst_64 = arith.constant dense<0.000000e+00> : vector<15x8xf32>
    %154 = tpu.matmul %153, %141, %cst_64 {dimension_numbers = #tpu.dot_dimension_numbers<[1], [0], [0], [1], [0, 0, 1, 1], [], []>} : vector<15x15xf32>, vector<15x8xf32>, vector<15x8xf32> -> vector<15x8xf32>
    %155 = vector.extract_strided_slice %104 {offsets = [0, 24], sizes = [15, 8], strides = [1, 1]} : vector<15x32xf32> to vector<15x8xf32>
    %156 = vector.extract_strided_slice %105 {offsets = [0, 24], sizes = [15, 8], strides = [1, 1]} : vector<15x32xf32> to vector<15x8xf32>
    %157 = vector.extract_strided_slice %106 {offsets = [0, 24], sizes = [15, 8], strides = [1, 1]} : vector<15x32xf32> to vector<15x8xf32>
    %158 = tpu.transpose %156, [1, 0] : vector<15x8xf32> -> vector<8x15xf32>
    %cst_65 = arith.constant dense<0.000000e+00> : vector<15x15xf32>
    %159 = tpu.matmul %155, %158, %cst_65 {dimension_numbers = #tpu.dot_dimension_numbers<[1], [0], [0], [1], [0, 0, 1, 1], [], []>} : vector<15x8xf32>, vector<8x15xf32>, vector<15x15xf32> -> vector<15x15xf32>
    %cst_66 = arith.constant dense<0xFF800000> : vector<15xf32>
    %160 = vector.multi_reduction <maximumf>, %159, %cst_66 [1] : vector<15x15xf32> to vector<15xf32>
    %161 = vector.shape_cast %160 : vector<15xf32> to vector<15x1xf32>
    %162 = vector.broadcast %161 : vector<15x1xf32> to vector<15x15xf32>
    %163 = arith.subf %159, %162 : vector<15x15xf32>
    %164 = math.exp %163 : vector<15x15xf32>
    %cst_67 = arith.constant dense<0.000000e+00> : vector<15xf32>
    %165 = vector.multi_reduction <add>, %164, %cst_67 [1] : vector<15x15xf32> to vector<15xf32>
    %166 = vector.shape_cast %165 : vector<15xf32> to vector<15x1xf32>
    %167 = tpu.reciprocal %166 {approx = true} : vector<15x1xf32> -> vector<15x1xf32>
    %168 = vector.broadcast %167 : vector<15x1xf32> to vector<15x15xf32>
    %169 = arith.mulf %164, %168 : vector<15x15xf32>
    %cst_68 = arith.constant dense<0.000000e+00> : vector<15x8xf32>
    %170 = tpu.matmul %169, %157, %cst_68 {dimension_numbers = #tpu.dot_dimension_numbers<[1], [0], [0], [1], [0, 0, 1, 1], [], []>} : vector<15x15xf32>, vector<15x8xf32>, vector<15x8xf32> -> vector<15x8xf32>
    %171 = tpu.concatenate %122, %138, %154, %170 in 1 : vector<15x8xf32>, vector<15x8xf32>, vector<15x8xf32>, vector<15x8xf32> -> vector<15x32xf32>
    %c0_69 = arith.constant 0 : index
    %c0_70 = arith.constant 0 : index
    %c0_71 = arith.constant 0 : index
    %172 = vector.load %arg12[%c0_69, %c0_70, %c0_71] : memref<2x32x32xf32, #tpu.memory_space<vmem>>, vector<1x32x32xf32>
    %173 = vector.shape_cast %172 : vector<1x32x32xf32> to vector<32x32xf32>
    %cst_72 = arith.constant dense<0.000000e+00> : vector<15x32xf32>
    %174 = tpu.matmul %171, %173, %cst_72 {dimension_numbers = #tpu.dot_dimension_numbers<[1], [0], [0], [1], [0, 0, 1, 1], [], []>} : vector<15x32xf32>, vector<32x32xf32>, vector<15x32xf32> -> vector<15x32xf32>
    %c0_73 = arith.constant 0 : index
    %c0_74 = arith.constant 0 : index
    %c0_75 = arith.constant 0 : index
    %175 = vector.load %arg13[%c0_73, %c0_74, %c0_75] : memref<2x1x32xf32, #tpu.memory_space<vmem>>, vector<1x1x32xf32>
    %176 = vector.shape_cast %175 : vector<1x1x32xf32> to vector<1x32xf32>
    %177 = vector.broadcast %176 : vector<1x32xf32> to vector<15x32xf32>
    %178 = arith.addf %174, %177 : vector<15x32xf32>
    %179 = arith.addf %94, %178 : vector<15x32xf32>
    %c0_76 = arith.constant 0 : index
    %c0_77 = arith.constant 0 : index
    %c0_78 = arith.constant 0 : index
    %180 = vector.load %arg14[%c0_76, %c0_77, %c0_78] : memref<2x1x32xf32, #tpu.memory_space<vmem>>, vector<1x1x32xf32>
    %181 = vector.shape_cast %180 : vector<1x1x32xf32> to vector<1x32xf32>
    %c0_79 = arith.constant 0 : index
    %c0_80 = arith.constant 0 : index
    %c0_81 = arith.constant 0 : index
    %182 = vector.load %arg15[%c0_79, %c0_80, %c0_81] : memref<2x1x32xf32, #tpu.memory_space<vmem>>, vector<1x1x32xf32>
    %183 = vector.shape_cast %182 : vector<1x1x32xf32> to vector<1x32xf32>
    %cst_82 = arith.constant dense<0.000000e+00> : vector<15xf32>
    %184 = vector.multi_reduction <add>, %179, %cst_82 [1] : vector<15x32xf32> to vector<15xf32>
    %185 = vector.shape_cast %184 : vector<15xf32> to vector<15x1xf32>
    %cst_83 = arith.constant 3.200000e+01 : f32
    %186 = vector.broadcast %cst_83 : f32 to vector<15x1xf32>
    %187 = arith.divf %185, %186 : vector<15x1xf32>
    %188 = vector.broadcast %187 : vector<15x1xf32> to vector<15x32xf32>
    %189 = arith.subf %179, %188 : vector<15x32xf32>
    %190 = arith.mulf %189, %189 : vector<15x32xf32>
    %cst_84 = arith.constant dense<0.000000e+00> : vector<15xf32>
    %191 = vector.multi_reduction <add>, %190, %cst_84 [1] : vector<15x32xf32> to vector<15xf32>
    %192 = vector.shape_cast %191 : vector<15xf32> to vector<15x1xf32>
    %cst_85 = arith.constant 3.200000e+01 : f32
    %193 = vector.broadcast %cst_85 : f32 to vector<15x1xf32>
    %194 = arith.divf %192, %193 : vector<15x1xf32>
    %195 = vector.broadcast %187 : vector<15x1xf32> to vector<15x32xf32>
    %196 = arith.subf %179, %195 : vector<15x32xf32>
    %cst_86 = arith.constant 9.99999974E-6 : f32
    %197 = vector.broadcast %cst_86 : f32 to vector<15x1xf32>
    %198 = arith.addf %194, %197 : vector<15x1xf32>
    %199 = math.rsqrt %198 : vector<15x1xf32>
    %200 = vector.broadcast %199 : vector<15x1xf32> to vector<15x32xf32>
    %201 = arith.mulf %196, %200 : vector<15x32xf32>
    %202 = vector.broadcast %181 : vector<1x32xf32> to vector<15x32xf32>
    %203 = arith.mulf %201, %202 : vector<15x32xf32>
    %204 = vector.broadcast %183 : vector<1x32xf32> to vector<15x32xf32>
    %205 = arith.addf %203, %204 : vector<15x32xf32>
    %c0_87 = arith.constant 0 : index
    %c0_88 = arith.constant 0 : index
    %c0_89 = arith.constant 0 : index
    %206 = vector.load %arg16[%c0_87, %c0_88, %c0_89] : memref<2x32x128xf32, #tpu.memory_space<vmem>>, vector<1x32x128xf32>
    %207 = vector.shape_cast %206 : vector<1x32x128xf32> to vector<32x128xf32>
    %cst_90 = arith.constant dense<0.000000e+00> : vector<15x128xf32>
    %208 = tpu.matmul %205, %207, %cst_90 {dimension_numbers = #tpu.dot_dimension_numbers<[1], [0], [0], [1], [0, 0, 1, 1], [], []>} : vector<15x32xf32>, vector<32x128xf32>, vector<15x128xf32> -> vector<15x128xf32>
    %c0_91 = arith.constant 0 : index
    %c0_92 = arith.constant 0 : index
    %c0_93 = arith.constant 0 : index
    %209 = vector.load %arg17[%c0_91, %c0_92, %c0_93] : memref<2x1x128xf32, #tpu.memory_space<vmem>>, vector<1x1x128xf32>
    %210 = vector.shape_cast %209 : vector<1x1x128xf32> to vector<1x128xf32>
    %211 = vector.broadcast %210 : vector<1x128xf32> to vector<15x128xf32>
    %212 = arith.addf %208, %211 : vector<15x128xf32>
    %213 = arith.mulf %212, %212 : vector<15x128xf32>
    %214 = arith.mulf %212, %213 : vector<15x128xf32>
    %cst_94 = arith.constant 4.471500e-02 : f32
    %215 = vector.broadcast %cst_94 : f32 to vector<15x128xf32>
    %216 = arith.mulf %215, %214 : vector<15x128xf32>
    %217 = arith.addf %212, %216 : vector<15x128xf32>
    %cst_95 = arith.constant 0.797884583 : f32
    %218 = vector.broadcast %cst_95 : f32 to vector<15x128xf32>
    %219 = arith.mulf %218, %217 : vector<15x128xf32>
    %220 = math.tanh %219 : vector<15x128xf32>
    %cst_96 = arith.constant 1.000000e+00 : f32
    %221 = vector.broadcast %cst_96 : f32 to vector<15x128xf32>
    %222 = arith.addf %221, %220 : vector<15x128xf32>
    %cst_97 = arith.constant 5.000000e-01 : f32
    %223 = vector.broadcast %cst_97 : f32 to vector<15x128xf32>
    %224 = arith.mulf %223, %222 : vector<15x128xf32>
    %225 = arith.mulf %212, %224 : vector<15x128xf32>
    %c0_98 = arith.constant 0 : index
    %c0_99 = arith.constant 0 : index
    %c0_100 = arith.constant 0 : index
    %226 = vector.load %arg18[%c0_98, %c0_99, %c0_100] : memref<2x128x32xf32, #tpu.memory_space<vmem>>, vector<1x128x32xf32>
    %227 = vector.shape_cast %226 : vector<1x128x32xf32> to vector<128x32xf32>
    %cst_101 = arith.constant dense<0.000000e+00> : vector<15x32xf32>
    %228 = tpu.matmul %225, %227, %cst_101 {dimension_numbers = #tpu.dot_dimension_numbers<[1], [0], [0], [1], [0, 0, 1, 1], [], []>} : vector<15x128xf32>, vector<128x32xf32>, vector<15x32xf32> -> vector<15x32xf32>
    %c0_102 = arith.constant 0 : index
    %c0_103 = arith.constant 0 : index
    %c0_104 = arith.constant 0 : index
    %229 = vector.load %arg19[%c0_102, %c0_103, %c0_104] : memref<2x1x32xf32, #tpu.memory_space<vmem>>, vector<1x1x32xf32>
    %230 = vector.shape_cast %229 : vector<1x1x32xf32> to vector<1x32xf32>
    %231 = vector.broadcast %230 : vector<1x32xf32> to vector<15x32xf32>
    %232 = arith.addf %228, %231 : vector<15x32xf32>
    %233 = arith.addf %205, %232 : vector<15x32xf32>
    %c0_105 = arith.constant 0 : index
    %c0_106 = arith.constant 0 : index
    %c0_107 = arith.constant 0 : index
    %234 = vector.load %arg20[%c0_105, %c0_106, %c0_107] : memref<2x1x32xf32, #tpu.memory_space<vmem>>, vector<1x1x32xf32>
    %235 = vector.shape_cast %234 : vector<1x1x32xf32> to vector<1x32xf32>
    %c0_108 = arith.constant 0 : index
    %c0_109 = arith.constant 0 : index
    %c0_110 = arith.constant 0 : index
    %236 = vector.load %arg21[%c0_108, %c0_109, %c0_110] : memref<2x1x32xf32, #tpu.memory_space<vmem>>, vector<1x1x32xf32>
    %237 = vector.shape_cast %236 : vector<1x1x32xf32> to vector<1x32xf32>
    %cst_111 = arith.constant dense<0.000000e+00> : vector<15xf32>
    %238 = vector.multi_reduction <add>, %233, %cst_111 [1] : vector<15x32xf32> to vector<15xf32>
    %239 = vector.shape_cast %238 : vector<15xf32> to vector<15x1xf32>
    %cst_112 = arith.constant 3.200000e+01 : f32
    %240 = vector.broadcast %cst_112 : f32 to vector<15x1xf32>
    %241 = arith.divf %239, %240 : vector<15x1xf32>
    %242 = vector.broadcast %241 : vector<15x1xf32> to vector<15x32xf32>
    %243 = arith.subf %233, %242 : vector<15x32xf32>
    %244 = arith.mulf %243, %243 : vector<15x32xf32>
    %cst_113 = arith.constant dense<0.000000e+00> : vector<15xf32>
    %245 = vector.multi_reduction <add>, %244, %cst_113 [1] : vector<15x32xf32> to vector<15xf32>
    %246 = vector.shape_cast %245 : vector<15xf32> to vector<15x1xf32>
    %cst_114 = arith.constant 3.200000e+01 : f32
    %247 = vector.broadcast %cst_114 : f32 to vector<15x1xf32>
    %248 = arith.divf %246, %247 : vector<15x1xf32>
    %249 = vector.broadcast %241 : vector<15x1xf32> to vector<15x32xf32>
    %250 = arith.subf %233, %249 : vector<15x32xf32>
    %cst_115 = arith.constant 9.99999974E-6 : f32
    %251 = vector.broadcast %cst_115 : f32 to vector<15x1xf32>
    %252 = arith.addf %248, %251 : vector<15x1xf32>
    %253 = math.rsqrt %252 : vector<15x1xf32>
    %254 = vector.broadcast %253 : vector<15x1xf32> to vector<15x32xf32>
    %255 = arith.mulf %250, %254 : vector<15x32xf32>
    %256 = vector.broadcast %235 : vector<1x32xf32> to vector<15x32xf32>
    %257 = arith.mulf %255, %256 : vector<15x32xf32>
    %258 = vector.broadcast %237 : vector<1x32xf32> to vector<15x32xf32>
    %259 = arith.addf %257, %258 : vector<15x32xf32>
    %c1_116 = arith.constant 1 : index
    %c0_117 = arith.constant 0 : index
    %c0_118 = arith.constant 0 : index
    %260 = vector.load %arg10[%c1_116, %c0_117, %c0_118] : memref<2x32x96xf32, #tpu.memory_space<vmem>>, vector<1x32x96xf32>
    %261 = vector.shape_cast %260 : vector<1x32x96xf32> to vector<32x96xf32>
    %cst_119 = arith.constant dense<0.000000e+00> : vector<15x96xf32>
    %262 = tpu.matmul %259, %261, %cst_119 {dimension_numbers = #tpu.dot_dimension_numbers<[1], [0], [0], [1], [0, 0, 1, 1], [], []>} : vector<15x32xf32>, vector<32x96xf32>, vector<15x96xf32> -> vector<15x96xf32>
    %c1_120 = arith.constant 1 : index
    %c0_121 = arith.constant 0 : index
    %c0_122 = arith.constant 0 : index
    %263 = vector.load %arg11[%c1_120, %c0_121, %c0_122] : memref<2x1x96xf32, #tpu.memory_space<vmem>>, vector<1x1x96xf32>
    %264 = vector.shape_cast %263 : vector<1x1x96xf32> to vector<1x96xf32>
    %265 = vector.broadcast %264 : vector<1x96xf32> to vector<15x96xf32>
    %266 = arith.addf %262, %265 : vector<15x96xf32>
    %267 = vector.extract_strided_slice %266 {offsets = [0, 0], sizes = [15, 32], strides = [1, 1]} : vector<15x96xf32> to vector<15x32xf32>
    %cst_123 = arith.constant 0.353553385 : f32
    %268 = vector.broadcast %cst_123 : f32 to vector<15x32xf32>
    %269 = arith.mulf %267, %268 : vector<15x32xf32>
    %270 = vector.extract_strided_slice %266 {offsets = [0, 32], sizes = [15, 32], strides = [1, 1]} : vector<15x96xf32> to vector<15x32xf32>
    %271 = vector.extract_strided_slice %266 {offsets = [0, 64], sizes = [15, 32], strides = [1, 1]} : vector<15x96xf32> to vector<15x32xf32>
    %272 = vector.extract_strided_slice %269 {offsets = [0, 0], sizes = [15, 8], strides = [1, 1]} : vector<15x32xf32> to vector<15x8xf32>
    %273 = vector.extract_strided_slice %270 {offsets = [0, 0], sizes = [15, 8], strides = [1, 1]} : vector<15x32xf32> to vector<15x8xf32>
    %274 = vector.extract_strided_slice %271 {offsets = [0, 0], sizes = [15, 8], strides = [1, 1]} : vector<15x32xf32> to vector<15x8xf32>
    %275 = tpu.transpose %273, [1, 0] : vector<15x8xf32> -> vector<8x15xf32>
    %cst_124 = arith.constant dense<0.000000e+00> : vector<15x15xf32>
    %276 = tpu.matmul %272, %275, %cst_124 {dimension_numbers = #tpu.dot_dimension_numbers<[1], [0], [0], [1], [0, 0, 1, 1], [], []>} : vector<15x8xf32>, vector<8x15xf32>, vector<15x15xf32> -> vector<15x15xf32>
    %cst_125 = arith.constant dense<0xFF800000> : vector<15xf32>
    %277 = vector.multi_reduction <maximumf>, %276, %cst_125 [1] : vector<15x15xf32> to vector<15xf32>
    %278 = vector.shape_cast %277 : vector<15xf32> to vector<15x1xf32>
    %279 = vector.broadcast %278 : vector<15x1xf32> to vector<15x15xf32>
    %280 = arith.subf %276, %279 : vector<15x15xf32>
    %281 = math.exp %280 : vector<15x15xf32>
    %cst_126 = arith.constant dense<0.000000e+00> : vector<15xf32>
    %282 = vector.multi_reduction <add>, %281, %cst_126 [1] : vector<15x15xf32> to vector<15xf32>
    %283 = vector.shape_cast %282 : vector<15xf32> to vector<15x1xf32>
    %284 = tpu.reciprocal %283 {approx = true} : vector<15x1xf32> -> vector<15x1xf32>
    %285 = vector.broadcast %284 : vector<15x1xf32> to vector<15x15xf32>
    %286 = arith.mulf %281, %285 : vector<15x15xf32>
    %cst_127 = arith.constant dense<0.000000e+00> : vector<15x8xf32>
    %287 = tpu.matmul %286, %274, %cst_127 {dimension_numbers = #tpu.dot_dimension_numbers<[1], [0], [0], [1], [0, 0, 1, 1], [], []>} : vector<15x15xf32>, vector<15x8xf32>, vector<15x8xf32> -> vector<15x8xf32>
    %288 = vector.extract_strided_slice %269 {offsets = [0, 8], sizes = [15, 8], strides = [1, 1]} : vector<15x32xf32> to vector<15x8xf32>
    %289 = vector.extract_strided_slice %270 {offsets = [0, 8], sizes = [15, 8], strides = [1, 1]} : vector<15x32xf32> to vector<15x8xf32>
    %290 = vector.extract_strided_slice %271 {offsets = [0, 8], sizes = [15, 8], strides = [1, 1]} : vector<15x32xf32> to vector<15x8xf32>
    %291 = tpu.transpose %289, [1, 0] : vector<15x8xf32> -> vector<8x15xf32>
    %cst_128 = arith.constant dense<0.000000e+00> : vector<15x15xf32>
    %292 = tpu.matmul %288, %291, %cst_128 {dimension_numbers = #tpu.dot_dimension_numbers<[1], [0], [0], [1], [0, 0, 1, 1], [], []>} : vector<15x8xf32>, vector<8x15xf32>, vector<15x15xf32> -> vector<15x15xf32>
    %cst_129 = arith.constant dense<0xFF800000> : vector<15xf32>
    %293 = vector.multi_reduction <maximumf>, %292, %cst_129 [1] : vector<15x15xf32> to vector<15xf32>
    %294 = vector.shape_cast %293 : vector<15xf32> to vector<15x1xf32>
    %295 = vector.broadcast %294 : vector<15x1xf32> to vector<15x15xf32>
    %296 = arith.subf %292, %295 : vector<15x15xf32>
    %297 = math.exp %296 : vector<15x15xf32>
    %cst_130 = arith.constant dense<0.000000e+00> : vector<15xf32>
    %298 = vector.multi_reduction <add>, %297, %cst_130 [1] : vector<15x15xf32> to vector<15xf32>
    %299 = vector.shape_cast %298 : vector<15xf32> to vector<15x1xf32>
    %300 = tpu.reciprocal %299 {approx = true} : vector<15x1xf32> -> vector<15x1xf32>
    %301 = vector.broadcast %300 : vector<15x1xf32> to vector<15x15xf32>
    %302 = arith.mulf %297, %301 : vector<15x15xf32>
    %cst_131 = arith.constant dense<0.000000e+00> : vector<15x8xf32>
    %303 = tpu.matmul %302, %290, %cst_131 {dimension_numbers = #tpu.dot_dimension_numbers<[1], [0], [0], [1], [0, 0, 1, 1], [], []>} : vector<15x15xf32>, vector<15x8xf32>, vector<15x8xf32> -> vector<15x8xf32>
    %304 = vector.extract_strided_slice %269 {offsets = [0, 16], sizes = [15, 8], strides = [1, 1]} : vector<15x32xf32> to vector<15x8xf32>
    %305 = vector.extract_strided_slice %270 {offsets = [0, 16], sizes = [15, 8], strides = [1, 1]} : vector<15x32xf32> to vector<15x8xf32>
    %306 = vector.extract_strided_slice %271 {offsets = [0, 16], sizes = [15, 8], strides = [1, 1]} : vector<15x32xf32> to vector<15x8xf32>
    %307 = tpu.transpose %305, [1, 0] : vector<15x8xf32> -> vector<8x15xf32>
    %cst_132 = arith.constant dense<0.000000e+00> : vector<15x15xf32>
    %308 = tpu.matmul %304, %307, %cst_132 {dimension_numbers = #tpu.dot_dimension_numbers<[1], [0], [0], [1], [0, 0, 1, 1], [], []>} : vector<15x8xf32>, vector<8x15xf32>, vector<15x15xf32> -> vector<15x15xf32>
    %cst_133 = arith.constant dense<0xFF800000> : vector<15xf32>
    %309 = vector.multi_reduction <maximumf>, %308, %cst_133 [1] : vector<15x15xf32> to vector<15xf32>
    %310 = vector.shape_cast %309 : vector<15xf32> to vector<15x1xf32>
    %311 = vector.broadcast %310 : vector<15x1xf32> to vector<15x15xf32>
    %312 = arith.subf %308, %311 : vector<15x15xf32>
    %313 = math.exp %312 : vector<15x15xf32>
    %cst_134 = arith.constant dense<0.000000e+00> : vector<15xf32>
    %314 = vector.multi_reduction <add>, %313, %cst_134 [1] : vector<15x15xf32> to vector<15xf32>
    %315 = vector.shape_cast %314 : vector<15xf32> to vector<15x1xf32>
    %316 = tpu.reciprocal %315 {approx = true} : vector<15x1xf32> -> vector<15x1xf32>
    %317 = vector.broadcast %316 : vector<15x1xf32> to vector<15x15xf32>
    %318 = arith.mulf %313, %317 : vector<15x15xf32>
    %cst_135 = arith.constant dense<0.000000e+00> : vector<15x8xf32>
    %319 = tpu.matmul %318, %306, %cst_135 {dimension_numbers = #tpu.dot_dimension_numbers<[1], [0], [0], [1], [0, 0, 1, 1], [], []>} : vector<15x15xf32>, vector<15x8xf32>, vector<15x8xf32> -> vector<15x8xf32>
    %320 = vector.extract_strided_slice %269 {offsets = [0, 24], sizes = [15, 8], strides = [1, 1]} : vector<15x32xf32> to vector<15x8xf32>
    %321 = vector.extract_strided_slice %270 {offsets = [0, 24], sizes = [15, 8], strides = [1, 1]} : vector<15x32xf32> to vector<15x8xf32>
    %322 = vector.extract_strided_slice %271 {offsets = [0, 24], sizes = [15, 8], strides = [1, 1]} : vector<15x32xf32> to vector<15x8xf32>
    %323 = tpu.transpose %321, [1, 0] : vector<15x8xf32> -> vector<8x15xf32>
    %cst_136 = arith.constant dense<0.000000e+00> : vector<15x15xf32>
    %324 = tpu.matmul %320, %323, %cst_136 {dimension_numbers = #tpu.dot_dimension_numbers<[1], [0], [0], [1], [0, 0, 1, 1], [], []>} : vector<15x8xf32>, vector<8x15xf32>, vector<15x15xf32> -> vector<15x15xf32>
    %cst_137 = arith.constant dense<0xFF800000> : vector<15xf32>
    %325 = vector.multi_reduction <maximumf>, %324, %cst_137 [1] : vector<15x15xf32> to vector<15xf32>
    %326 = vector.shape_cast %325 : vector<15xf32> to vector<15x1xf32>
    %327 = vector.broadcast %326 : vector<15x1xf32> to vector<15x15xf32>
    %328 = arith.subf %324, %327 : vector<15x15xf32>
    %329 = math.exp %328 : vector<15x15xf32>
    %cst_138 = arith.constant dense<0.000000e+00> : vector<15xf32>
    %330 = vector.multi_reduction <add>, %329, %cst_138 [1] : vector<15x15xf32> to vector<15xf32>
    %331 = vector.shape_cast %330 : vector<15xf32> to vector<15x1xf32>
    %332 = tpu.reciprocal %331 {approx = true} : vector<15x1xf32> -> vector<15x1xf32>
    %333 = vector.broadcast %332 : vector<15x1xf32> to vector<15x15xf32>
    %334 = arith.mulf %329, %333 : vector<15x15xf32>
    %cst_139 = arith.constant dense<0.000000e+00> : vector<15x8xf32>
    %335 = tpu.matmul %334, %322, %cst_139 {dimension_numbers = #tpu.dot_dimension_numbers<[1], [0], [0], [1], [0, 0, 1, 1], [], []>} : vector<15x15xf32>, vector<15x8xf32>, vector<15x8xf32> -> vector<15x8xf32>
    %336 = tpu.concatenate %287, %303, %319, %335 in 1 : vector<15x8xf32>, vector<15x8xf32>, vector<15x8xf32>, vector<15x8xf32> -> vector<15x32xf32>
    %c1_140 = arith.constant 1 : index
    %c0_141 = arith.constant 0 : index
    %c0_142 = arith.constant 0 : index
    %337 = vector.load %arg12[%c1_140, %c0_141, %c0_142] : memref<2x32x32xf32, #tpu.memory_space<vmem>>, vector<1x32x32xf32>
    %338 = vector.shape_cast %337 : vector<1x32x32xf32> to vector<32x32xf32>
    %cst_143 = arith.constant dense<0.000000e+00> : vector<15x32xf32>
    %339 = tpu.matmul %336, %338, %cst_143 {dimension_numbers = #tpu.dot_dimension_numbers<[1], [0], [0], [1], [0, 0, 1, 1], [], []>} : vector<15x32xf32>, vector<32x32xf32>, vector<15x32xf32> -> vector<15x32xf32>
    %c1_144 = arith.constant 1 : index
    %c0_145 = arith.constant 0 : index
    %c0_146 = arith.constant 0 : index
    %340 = vector.load %arg13[%c1_144, %c0_145, %c0_146] : memref<2x1x32xf32, #tpu.memory_space<vmem>>, vector<1x1x32xf32>
    %341 = vector.shape_cast %340 : vector<1x1x32xf32> to vector<1x32xf32>
    %342 = vector.broadcast %341 : vector<1x32xf32> to vector<15x32xf32>
    %343 = arith.addf %339, %342 : vector<15x32xf32>
    %344 = arith.addf %259, %343 : vector<15x32xf32>
    %c1_147 = arith.constant 1 : index
    %c0_148 = arith.constant 0 : index
    %c0_149 = arith.constant 0 : index
    %345 = vector.load %arg14[%c1_147, %c0_148, %c0_149] : memref<2x1x32xf32, #tpu.memory_space<vmem>>, vector<1x1x32xf32>
    %346 = vector.shape_cast %345 : vector<1x1x32xf32> to vector<1x32xf32>
    %c1_150 = arith.constant 1 : index
    %c0_151 = arith.constant 0 : index
    %c0_152 = arith.constant 0 : index
    %347 = vector.load %arg15[%c1_150, %c0_151, %c0_152] : memref<2x1x32xf32, #tpu.memory_space<vmem>>, vector<1x1x32xf32>
    %348 = vector.shape_cast %347 : vector<1x1x32xf32> to vector<1x32xf32>
    %cst_153 = arith.constant dense<0.000000e+00> : vector<15xf32>
    %349 = vector.multi_reduction <add>, %344, %cst_153 [1] : vector<15x32xf32> to vector<15xf32>
    %350 = vector.shape_cast %349 : vector<15xf32> to vector<15x1xf32>
    %cst_154 = arith.constant 3.200000e+01 : f32
    %351 = vector.broadcast %cst_154 : f32 to vector<15x1xf32>
    %352 = arith.divf %350, %351 : vector<15x1xf32>
    %353 = vector.broadcast %352 : vector<15x1xf32> to vector<15x32xf32>
    %354 = arith.subf %344, %353 : vector<15x32xf32>
    %355 = arith.mulf %354, %354 : vector<15x32xf32>
    %cst_155 = arith.constant dense<0.000000e+00> : vector<15xf32>
    %356 = vector.multi_reduction <add>, %355, %cst_155 [1] : vector<15x32xf32> to vector<15xf32>
    %357 = vector.shape_cast %356 : vector<15xf32> to vector<15x1xf32>
    %cst_156 = arith.constant 3.200000e+01 : f32
    %358 = vector.broadcast %cst_156 : f32 to vector<15x1xf32>
    %359 = arith.divf %357, %358 : vector<15x1xf32>
    %360 = vector.broadcast %352 : vector<15x1xf32> to vector<15x32xf32>
    %361 = arith.subf %344, %360 : vector<15x32xf32>
    %cst_157 = arith.constant 9.99999974E-6 : f32
    %362 = vector.broadcast %cst_157 : f32 to vector<15x1xf32>
    %363 = arith.addf %359, %362 : vector<15x1xf32>
    %364 = math.rsqrt %363 : vector<15x1xf32>
    %365 = vector.broadcast %364 : vector<15x1xf32> to vector<15x32xf32>
    %366 = arith.mulf %361, %365 : vector<15x32xf32>
    %367 = vector.broadcast %346 : vector<1x32xf32> to vector<15x32xf32>
    %368 = arith.mulf %366, %367 : vector<15x32xf32>
    %369 = vector.broadcast %348 : vector<1x32xf32> to vector<15x32xf32>
    %370 = arith.addf %368, %369 : vector<15x32xf32>
    %c1_158 = arith.constant 1 : index
    %c0_159 = arith.constant 0 : index
    %c0_160 = arith.constant 0 : index
    %371 = vector.load %arg16[%c1_158, %c0_159, %c0_160] : memref<2x32x128xf32, #tpu.memory_space<vmem>>, vector<1x32x128xf32>
    %372 = vector.shape_cast %371 : vector<1x32x128xf32> to vector<32x128xf32>
    %cst_161 = arith.constant dense<0.000000e+00> : vector<15x128xf32>
    %373 = tpu.matmul %370, %372, %cst_161 {dimension_numbers = #tpu.dot_dimension_numbers<[1], [0], [0], [1], [0, 0, 1, 1], [], []>} : vector<15x32xf32>, vector<32x128xf32>, vector<15x128xf32> -> vector<15x128xf32>
    %c1_162 = arith.constant 1 : index
    %c0_163 = arith.constant 0 : index
    %c0_164 = arith.constant 0 : index
    %374 = vector.load %arg17[%c1_162, %c0_163, %c0_164] : memref<2x1x128xf32, #tpu.memory_space<vmem>>, vector<1x1x128xf32>
    %375 = vector.shape_cast %374 : vector<1x1x128xf32> to vector<1x128xf32>
    %376 = vector.broadcast %375 : vector<1x128xf32> to vector<15x128xf32>
    %377 = arith.addf %373, %376 : vector<15x128xf32>
    %378 = arith.mulf %377, %377 : vector<15x128xf32>
    %379 = arith.mulf %377, %378 : vector<15x128xf32>
    %cst_165 = arith.constant 4.471500e-02 : f32
    %380 = vector.broadcast %cst_165 : f32 to vector<15x128xf32>
    %381 = arith.mulf %380, %379 : vector<15x128xf32>
    %382 = arith.addf %377, %381 : vector<15x128xf32>
    %cst_166 = arith.constant 0.797884583 : f32
    %383 = vector.broadcast %cst_166 : f32 to vector<15x128xf32>
    %384 = arith.mulf %383, %382 : vector<15x128xf32>
    %385 = math.tanh %384 : vector<15x128xf32>
    %cst_167 = arith.constant 1.000000e+00 : f32
    %386 = vector.broadcast %cst_167 : f32 to vector<15x128xf32>
    %387 = arith.addf %386, %385 : vector<15x128xf32>
    %cst_168 = arith.constant 5.000000e-01 : f32
    %388 = vector.broadcast %cst_168 : f32 to vector<15x128xf32>
    %389 = arith.mulf %388, %387 : vector<15x128xf32>
    %390 = arith.mulf %377, %389 : vector<15x128xf32>
    %c1_169 = arith.constant 1 : index
    %c0_170 = arith.constant 0 : index
    %c0_171 = arith.constant 0 : index
    %391 = vector.load %arg18[%c1_169, %c0_170, %c0_171] : memref<2x128x32xf32, #tpu.memory_space<vmem>>, vector<1x128x32xf32>
    %392 = vector.shape_cast %391 : vector<1x128x32xf32> to vector<128x32xf32>
    %cst_172 = arith.constant dense<0.000000e+00> : vector<15x32xf32>
    %393 = tpu.matmul %390, %392, %cst_172 {dimension_numbers = #tpu.dot_dimension_numbers<[1], [0], [0], [1], [0, 0, 1, 1], [], []>} : vector<15x128xf32>, vector<128x32xf32>, vector<15x32xf32> -> vector<15x32xf32>
    %c1_173 = arith.constant 1 : index
    %c0_174 = arith.constant 0 : index
    %c0_175 = arith.constant 0 : index
    %394 = vector.load %arg19[%c1_173, %c0_174, %c0_175] : memref<2x1x32xf32, #tpu.memory_space<vmem>>, vector<1x1x32xf32>
    %395 = vector.shape_cast %394 : vector<1x1x32xf32> to vector<1x32xf32>
    %396 = vector.broadcast %395 : vector<1x32xf32> to vector<15x32xf32>
    %397 = arith.addf %393, %396 : vector<15x32xf32>
    %398 = arith.addf %370, %397 : vector<15x32xf32>
    %c1_176 = arith.constant 1 : index
    %c0_177 = arith.constant 0 : index
    %c0_178 = arith.constant 0 : index
    %399 = vector.load %arg20[%c1_176, %c0_177, %c0_178] : memref<2x1x32xf32, #tpu.memory_space<vmem>>, vector<1x1x32xf32>
    %400 = vector.shape_cast %399 : vector<1x1x32xf32> to vector<1x32xf32>
    %c1_179 = arith.constant 1 : index
    %c0_180 = arith.constant 0 : index
    %c0_181 = arith.constant 0 : index
    %401 = vector.load %arg21[%c1_179, %c0_180, %c0_181] : memref<2x1x32xf32, #tpu.memory_space<vmem>>, vector<1x1x32xf32>
    %402 = vector.shape_cast %401 : vector<1x1x32xf32> to vector<1x32xf32>
    %cst_182 = arith.constant dense<0.000000e+00> : vector<15xf32>
    %403 = vector.multi_reduction <add>, %398, %cst_182 [1] : vector<15x32xf32> to vector<15xf32>
    %404 = vector.shape_cast %403 : vector<15xf32> to vector<15x1xf32>
    %cst_183 = arith.constant 3.200000e+01 : f32
    %405 = vector.broadcast %cst_183 : f32 to vector<15x1xf32>
    %406 = arith.divf %404, %405 : vector<15x1xf32>
    %407 = vector.broadcast %406 : vector<15x1xf32> to vector<15x32xf32>
    %408 = arith.subf %398, %407 : vector<15x32xf32>
    %409 = arith.mulf %408, %408 : vector<15x32xf32>
    %cst_184 = arith.constant dense<0.000000e+00> : vector<15xf32>
    %410 = vector.multi_reduction <add>, %409, %cst_184 [1] : vector<15x32xf32> to vector<15xf32>
    %411 = vector.shape_cast %410 : vector<15xf32> to vector<15x1xf32>
    %cst_185 = arith.constant 3.200000e+01 : f32
    %412 = vector.broadcast %cst_185 : f32 to vector<15x1xf32>
    %413 = arith.divf %411, %412 : vector<15x1xf32>
    %414 = vector.broadcast %406 : vector<15x1xf32> to vector<15x32xf32>
    %415 = arith.subf %398, %414 : vector<15x32xf32>
    %cst_186 = arith.constant 9.99999974E-6 : f32
    %416 = vector.broadcast %cst_186 : f32 to vector<15x1xf32>
    %417 = arith.addf %413, %416 : vector<15x1xf32>
    %418 = math.rsqrt %417 : vector<15x1xf32>
    %419 = vector.broadcast %418 : vector<15x1xf32> to vector<15x32xf32>
    %420 = arith.mulf %415, %419 : vector<15x32xf32>
    %421 = vector.broadcast %400 : vector<1x32xf32> to vector<15x32xf32>
    %422 = arith.mulf %420, %421 : vector<15x32xf32>
    %423 = vector.broadcast %402 : vector<1x32xf32> to vector<15x32xf32>
    %424 = arith.addf %422, %423 : vector<15x32xf32>
    %cst_187 = arith.constant dense<0.000000e+00> : vector<32xf32>
    %425 = vector.multi_reduction <add>, %424, %cst_187 [0] : vector<15x32xf32> to vector<32xf32>
    %426 = vector.shape_cast %425 : vector<32xf32> to vector<1x32xf32>
    %cst_188 = arith.constant 1.500000e+01 : f32
    %427 = vector.broadcast %cst_188 : f32 to vector<1x32xf32>
    %428 = arith.divf %426, %427 : vector<1x32xf32>
    %c0_189 = arith.constant 0 : index
    %c0_190 = arith.constant 0 : index
    %c0_191 = arith.constant 0 : index
    %429 = vector.load %arg22[%c0_189, %c0_190, %c0_191] : memref<1x1x32xf32, #tpu.memory_space<vmem>>, vector<1x1x32xf32>
    %430 = vector.shape_cast %429 : vector<1x1x32xf32> to vector<1x32xf32>
    %431 = vector.shape_cast %428 : vector<1x32xf32> to vector<1x1x32xf32>
    tpu.vector_store %arg22[%c0_189, %c0_190, %c0_191], %431 {strides = array<i32>} : memref<1x1x32xf32, #tpu.memory_space<vmem>>, vector<1x1x32xf32>,
    return
  }
  func.func @transform_0(%arg0: i32) -> (i32, i32, i32) {
    %c0_i32 = arith.constant 0 : i32
    %c0_i32_0 = arith.constant 0 : i32
    %c0_i32_1 = arith.constant 0 : i32
    return %arg0, %c0_i32, %c0_i32_0 : i32, i32, i32
  }
  func.func @transform_1(%arg0: i32) -> (i32, i32) {
    %c0_i32 = arith.constant 0 : i32
    %c0_i32_0 = arith.constant 0 : i32
    %c0_i32_1 = arith.constant 0 : i32
    return %c0_i32, %c0_i32_0 : i32, i32
  }
  func.func @transform_2(%arg0: i32) -> (i32, i32) {
    %c0_i32 = arith.constant 0 : i32
    %c0_i32_0 = arith.constant 0 : i32
    %c0_i32_1 = arith.constant 0 : i32
    return %c0_i32, %c0_i32_0 : i32, i32
  }
  func.func @transform_3(%arg0: i32) -> (i32, i32) {
    %c0_i32 = arith.constant 0 : i32
    %c0_i32_0 = arith.constant 0 : i32
    %c0_i32_1 = arith.constant 0 : i32
    return %c0_i32, %c0_i32_0 : i32, i32
  }
  func.func @transform_4(%arg0: i32) -> (i32, i32) {
    %c0_i32 = arith.constant 0 : i32
    %c0_i32_0 = arith.constant 0 : i32
    %c0_i32_1 = arith.constant 0 : i32
    return %c0_i32, %c0_i32_0 : i32, i32
  }
  func.func @transform_5(%arg0: i32) -> (i32, i32, i32) {
    %c0_i32 = arith.constant 0 : i32
    %c0_i32_0 = arith.constant 0 : i32
    %c0_i32_1 = arith.constant 0 : i32
    %c0_i32_2 = arith.constant 0 : i32
    return %c0_i32, %c0_i32_0, %c0_i32_1 : i32, i32, i32
  }
  func.func @transform_6(%arg0: i32) -> (i32, i32) {
    %c0_i32 = arith.constant 0 : i32
    %c0_i32_0 = arith.constant 0 : i32
    %c0_i32_1 = arith.constant 0 : i32
    return %c0_i32, %c0_i32_0 : i32, i32
  }
  func.func @transform_7(%arg0: i32) -> (i32, i32) {
    %c0_i32 = arith.constant 0 : i32
    %c0_i32_0 = arith.constant 0 : i32
    %c0_i32_1 = arith.constant 0 : i32
    return %c0_i32, %c0_i32_0 : i32, i32
  }
  func.func @transform_8(%arg0: i32) -> (i32, i32) {
    %c0_i32 = arith.constant 0 : i32
    %c0_i32_0 = arith.constant 0 : i32
    %c0_i32_1 = arith.constant 0 : i32
    return %c0_i32, %c0_i32_0 : i32, i32
  }
  func.func @transform_9(%arg0: i32) -> (i32, i32, i32) {
    %c0_i32 = arith.constant 0 : i32
    %c0_i32_0 = arith.constant 0 : i32
    %c0_i32_1 = arith.constant 0 : i32
    %c0_i32_2 = arith.constant 0 : i32
    return %c0_i32, %c0_i32_0, %c0_i32_1 : i32, i32, i32
  }
  func.func @transform_10(%arg0: i32) -> (i32, i32, i32) {
    %c0_i32 = arith.constant 0 : i32
    %c0_i32_0 = arith.constant 0 : i32
    %c0_i32_1 = arith.constant 0 : i32
    %c0_i32_2 = arith.constant 0 : i32
    return %c0_i32, %c0_i32_0, %c0_i32_1 : i32, i32, i32
  }
  func.func @transform_11(%arg0: i32) -> (i32, i32, i32) {
    %c0_i32 = arith.constant 0 : i32
    %c0_i32_0 = arith.constant 0 : i32
    %c0_i32_1 = arith.constant 0 : i32
    %c0_i32_2 = arith.constant 0 : i32
    return %c0_i32, %c0_i32_0, %c0_i32_1 : i32, i32, i32
  }
  func.func @transform_12(%arg0: i32) -> (i32, i32, i32) {
    %c0_i32 = arith.constant 0 : i32
    %c0_i32_0 = arith.constant 0 : i32
    %c0_i32_1 = arith.constant 0 : i32
    %c0_i32_2 = arith.constant 0 : i32
    return %c0_i32, %c0_i32_0, %c0_i32_1 : i32, i32, i32
  }
  func.func @transform_13(%arg0: i32) -> (i32, i32, i32) {
    %c0_i32 = arith.constant 0 : i32
    %c0_i32_0 = arith.constant 0 : i32
    %c0_i32_1 = arith.constant 0 : i32
    %c0_i32_2 = arith.constant 0 : i32
    return %c0_i32, %c0_i32_0, %c0_i32_1 : i32, i32, i32
  }
  func.func @transform_14(%arg0: i32) -> (i32, i32, i32) {
    %c0_i32 = arith.constant 0 : i32
    %c0_i32_0 = arith.constant 0 : i32
    %c0_i32_1 = arith.constant 0 : i32
    %c0_i32_2 = arith.constant 0 : i32
    return %c0_i32, %c0_i32_0, %c0_i32_1 : i32, i32, i32
  }
  func.func @transform_15(%arg0: i32) -> (i32, i32, i32) {
    %c0_i32 = arith.constant 0 : i32
    %c0_i32_0 = arith.constant 0 : i32
    %c0_i32_1 = arith.constant 0 : i32
    %c0_i32_2 = arith.constant 0 : i32
    return %c0_i32, %c0_i32_0, %c0_i32_1 : i32, i32, i32
  }
  func.func @transform_16(%arg0: i32) -> (i32, i32, i32) {
    %c0_i32 = arith.constant 0 : i32
    %c0_i32_0 = arith.constant 0 : i32
    %c0_i32_1 = arith.constant 0 : i32
    %c0_i32_2 = arith.constant 0 : i32
    return %c0_i32, %c0_i32_0, %c0_i32_1 : i32, i32, i32
  }
  func.func @transform_17(%arg0: i32) -> (i32, i32, i32) {
    %c0_i32 = arith.constant 0 : i32
    %c0_i32_0 = arith.constant 0 : i32
    %c0_i32_1 = arith.constant 0 : i32
    %c0_i32_2 = arith.constant 0 : i32
    return %c0_i32, %c0_i32_0, %c0_i32_1 : i32, i32, i32
  }
  func.func @transform_18(%arg0: i32) -> (i32, i32, i32) {
    %c0_i32 = arith.constant 0 : i32
    %c0_i32_0 = arith.constant 0 : i32
    %c0_i32_1 = arith.constant 0 : i32
    %c0_i32_2 = arith.constant 0 : i32
    return %c0_i32, %c0_i32_0, %c0_i32_1 : i32, i32, i32
  }
  func.func @transform_19(%arg0: i32) -> (i32, i32, i32) {
    %c0_i32 = arith.constant 0 : i32
    %c0_i32_0 = arith.constant 0 : i32
    %c0_i32_1 = arith.constant 0 : i32
    %c0_i32_2 = arith.constant 0 : i32
    return %c0_i32, %c0_i32_0, %c0_i32_1 : i32, i32, i32
  }
  func.func @transform_20(%arg0: i32) -> (i32, i32, i32) {
    %c0_i32 = arith.constant 0 : i32
    %c0_i32_0 = arith.constant 0 : i32
    %c0_i32_1 = arith.constant 0 : i32
    %c0_i32_2 = arith.constant 0 : i32
    return %c0_i32, %c0_i32_0, %c0_i32_1 : i32, i32, i32
  }
  func.func @transform_21(%arg0: i32) -> (i32, i32, i32) {
    %c0_i32 = arith.constant 0 : i32
    %c0_i32_0 = arith.constant 0 : i32
    %c0_i32_1 = arith.constant 0 : i32
    return %arg0, %c0_i32, %c0_i32_0 : i32, i32, i32
  }
}

</mosaic_0001>

<bundles_post_ra>
// kernel: wav2vec2_forward.5
= control target key start
LH: loop header
LB: loop body
LE: loop exit
PB: predicated region body
PF: predicated region fallthrough
CT: control target
= control target key end

     0   :  { %v14_v0 = vlaneseq  ;;  %v115_v1 = vmov 1983009808   ;;  %vm29_vm0 = vcmask 1041408   ;;  %vm33_vm1 = vcmask 517120   ;;  %s140_s0 = inlined_call_operand.vmem [shape: f32[2,320], index: 0, kind: input, shape index: {}]   ;;  %s141_s1 = inlined_call_operand.vmem [shape: f32[2,320], index: 1, kind: output, shape index: {}]  }
   0x1   :  { %v12_v2 = vunpack.c.l.s4 %v115_v1  ;;  %v8_v3 = vld [vmem:[%s140_s0] sm:$0x3f]  ;;  %v116_v16 = vmov 269488144   ;;  %vm99_vm4 = vcmask 1043458   ;;  %vm101_vm6 = vcmask 521220  }
   0x2   :  { %v15_v4 = vshrl.u32 %v14_v0, 7  ;;  %v10_v5 = vcombine.high %v8_v3, %v8_v3  ;;  %v42_v17 = vunpack.c.l.s4 %v116_v16  ;;  %vm100_vm5 = vmor %vm99_vm4, %vm29_vm0 }
   0x3   :  { %v13_v6 = vunpack.c.0.s8 %v12_v2  ;;  %vm102_vm7 = vmor %vm101_vm6, %vm100_vm5 }
   0x4   :  { %v43_v18 = vunpack.c.0.s8 %v42_v17 }
   0x5   :  { %v16_v7 = vsub.s32 %v13_v6, %v15_v4 }
   0x6   :  { %v46_v19 = vsub.s32 %v43_v18, %v15_v4 }
   0x7   :  { %v17_v8 = vrot.slane %v8_v3, %v16_v7  ;;  %v24_v9 = vrot.slane %v10_v5, %v16_v7 }
   0x9   :  { %v25_v10 = vcombine.high %v17_v8, %v17_v8  ;;  %v30_v11 = vsel %vm29_vm0, %v17_v8, 0.0  ;;  %v34_v13 = vsel %vm33_vm1, %v24_v9, 0.0 }
   0xb   :  { %v31_v12 = vsel %vm29_vm0, %v25_v10, 0.0 }
   0xc   :  { %v32_v14 = vadd.f32 %v31_v12, %v30_v11 }
   0xe   :  { %v35_v15 = vadd.f32 %v34_v13, %v32_v14 }
  0x10   :  { %36 = vadd.xlane.f32.xlu0 %v35_v15 }
  0x99   :  { %v37_v20 = vpop.xlane.xlu0 %36 }
  0x9a   :  { %v39_v21 = vmul.f32 0.003125, %v37_v20 }
  0x9c   :  { %v47_v22 = vrot.slane %v39_v21, %v46_v19 }
  0x9e   :  { %v49_v23 = vsub.f32 %v8_v3, %v47_v22 }
  0xa0   :  { %v50_v24 = vmul.f32 %v49_v23, %v49_v23 }
  0xa2   :  { %v52_v25 = vcombine.high %v50_v24, %v50_v24  ;;  %v59_v26 = vrot.slane %v50_v24, %v16_v7 }
  0xa4   :  { %v66_v27 = vrot.slane %v52_v25, %v16_v7  ;;  %v67_v28 = vcombine.high %v59_v26, %v59_v26  ;;  %v71_v29 = vsel %vm29_vm0, %v59_v26, 0.0 }
  0xa6   :  { %v72_v30 = vsel %vm29_vm0, %v67_v28, 0.0  ;;  %v74_v32 = vsel %vm33_vm1, %v66_v27, 0.0 }
  0xa7   :  { %v73_v31 = vadd.f32 %v72_v30, %v71_v29 }
  0xa9   :  { %v75_v33 = vadd.f32 %v74_v32, %v73_v31 }
  0xab   :  { %76 = vadd.xlane.f32.xlu0 %v75_v33 }
 0x134   :  { %v77_v34 = vpop.xlane.xlu0 %76 }
 0x135   :  { %v79_v35 = vmul.f32 0.0031347962, %v77_v34 }
 0x137   :  { %111 = vrsqrt.f32 %v79_v35  ;;  %vm82_vm2 = vcmp.eq.f32.partialorder %v79_v35, inf  ;;  %v85_v38 = vand.u32 2147483648, %v79_v35  ;;  %vm84_vm3 = vcmp.eq.f32.partialorder %v79_v35, 0.0 }
 0x144   :  { %v112_v36 = vpop.eup %111 }
 0x145   :  { %v81_v37 = vmul.f32 %v112_v36, %v79_v35 }
 0x147   :  { %v83_v39 = vsel %vm82_vm2, %v79_v35, %v81_v37 }
 0x148   :  { %v86_v40 = vsel %vm84_vm3, %v85_v38, %v83_v39 }
 0x149   :  { %v87_v41 = vmax.f32 %v86_v40, 1e-09 }
 0x14b   :  { %v95_v42 = vrot.slane %v87_v41, %v46_v19 }
 0x14d   :  { %113 = vrcp.f32 %v95_v42 }
 0x15a   :  { %v114_v43 = vpop.eup %113 }
 0x15b   :  { %v98_v44 = vmul.f32 %v114_v43, %v49_v23 }
 0x15d   :  { %103 = vst.msk [vmem:[%s141_s1] sm:$0x3f] %vm102_vm7, %v98_v44 }

// kernel: wav2vec2_forward.6
= control target key start
LH: loop header
LB: loop body
LE: loop exit
PB: predicated region body
PF: predicated region fallthrough
CT: control target
= control target key end

     0   :  { %s693_s15 = smov 0   ;;  %s827_s0 = inlined_call_operand.vmem [shape: f32[2,63,10], index: 0, kind: input, shape index: {}]   ;;  %s828_s1 = inlined_call_operand.vmem [shape: f32[10,32], index: 1, kind: input, shape index: {}]   ;;  %s829_s2 = inlined_call_operand.vmem [shape: f32[1,32], index: 2, kind: input, shape index: {}]   ;;  %s830_s3 = inlined_call_operand.vmem [shape: f32[1,32], index: 3, kind: input, shape index: {}]   ;;  %s831_s4 = inlined_call_operand.vmem [shape: f32[2,63,32], index: 4, kind: output, shape index: {}]  }
   0x1 LB: > { %s580_s16 = sadd.s32 4294967295, %s666_s15   ;;  %p584_p0 = scmp.ge.s32.totalorder %s666_s15, 1  ;;  %s666_s15 = sphi %s693_s15, %s14_s15  }
   0x2   : > { %p162_p1 = scmp.lt.s32.totalorder %s666_s15, 3 }
   0x4   : > { %p163_p2 = pnand %p584_p0, %p162_p1 }
   0x5   : > { %p188_p3 = scmp.lt.s32.totalorder (!%p163_p2), %s580_s16, 1 }
   0x6   : > { %166 = sbr.rel (%p163_p2) target bundleno = 336 (0x150), region = 36 }
   0xb   : > { %v207_v0 = vld [vmem:[%s828_s1 + $0x8] sm:$0x3]  ;;  %vm233_vm0 = vcmask 1041408   ;;  %v206_v1 = vld [vmem:[%s828_s1] sm:$0xff]  ;;  %s833_s16 = smov (!%p188_p3, %s580_s16), 1  ;;  %vm208_vm1 = vcmask 80896  }
   0xc   : > { %614 = vmatprep.subr.msk.mxu0 %vm233_vm0, %v207_v0  ;;  %630 = vmatprep.subr.msk.mxu1 %vm233_vm0, %v207_v0  ;;  %s602_s21 = sshll.u32 %s833_s16, 6  ;;  %vm342_vm2 = vcmask 261120   ;;  %vm356_vm3 = vcmask 260096  }
   0xd   : > { %615 = vmatpush3.msk.msra.mxu0 %vm233_vm0, %v207_v0  ;;  %632 = vmatpush3.msk.msra.mxu1 %vm233_vm0, %v207_v0  ;;  %s192_s24 = scalar_lea.vmem %s827_s0, %s602_s21  ;;  %s798_s5 = scalar_lea.vmem %s831_s4, %s602_s21 }
   0xe   : > { %616 = vmatprep.subr.mxu0 %v206_v1  ;;  %631 = vmatprep.subr.mxu1 %v206_v1  ;;  %v198_v2 = vld [vmem:[%s192_s24] sm:$0xff]  ;;  %v199_v3 = vld [vmem:[%s192_s24 + $0x8] sm:$0xff]  ;;  %v200_v4 = vld [vmem:[%s192_s24 + $0x10] sm:$0xff] }
   0xf   : > { %617 = vmatpush3.msra.mxu0 %v206_v1  ;;  %633 = vmatpush3.msra.mxu1 %v206_v1  ;;  %v202_v5 = vld [vmem:[%s192_s24 + $0x20] sm:$0xff]  ;;  %v203_v6 = vld [vmem:[%s192_s24 + $0x28] sm:$0xff]  ;;  %v204_v7 = vld [vmem:[%s192_s24 + $0x30] sm:$0xff] }
  0x10   : > { %618 = vmatprep.mubr.msk.f32.mxu0 %vm208_vm1, %v198_v2  ;;  %624 = vmatprep.mubr.msk.f32.mxu1 %vm208_vm1, %v202_v5  ;;  %v201_v8 = vld [vmem:[%s192_s24 + $0x18] sm:$0xff] }
  0x11   : > { %619 = vmatmul.mubr.msk.f32.vlgmr.msra.gmra.mxu0 %vm208_vm1, %v199_v3  ;;  %625 = vmatmul.mubr.msk.f32.vlgmr.msra.gmra.mxu1 %vm208_vm1, %v203_v6  ;;  %v205_v9 = vld [vmem:[%s192_s24 + $0x38] sm:$0x7f] }
  0x12   : > { %621 = vmatprep.mubr.msk.f32.mxu0 %vm208_vm1, %v200_v4  ;;  %627 = vmatprep.mubr.msk.f32.mxu1 %vm208_vm1, %v204_v7 }
  0x15   : > { %622 = vmatmul.mubr.msk.f32.gmra.mxu0 %vm208_vm1, %v201_v8  ;;  %628 = vmatmul.mubr.msk.f32.gmra.mxu1 %vm208_vm1, %v205_v9 }
  0xd1   : > { %v620_v10 = vpop.f32.mrf.mxu0  ;;  %v626_v11 = vpop.f32.mrf.mxu1 }
  0xd2   : > { %v344_v16 = vsel %vm342_vm2, %v620_v10, 0.0  ;;  %v352_v27 = vsel %vm342_vm2, %v626_v11, 0.0 }
  0xd3   : > { %v303_v12 = vpop.f32.mrf.mxu0  ;;  %v323_v15 = vpop.f32.mrf.mxu1 }
  0xd4   : > { %v343_v13 = vsel %vm342_vm2, %v303_v12, 0.0  ;;  %v350_v24 = vsel %vm342_vm2, %v323_v15, 0.0 }
  0xd5   : > { %v623_v14 = vpop.f32.mrf.mxu0  ;;  %v345_v17 = vadd.f32 %v344_v16, %v343_v13  ;;  %v629_v21 = vpop.f32.mrf.mxu1  ;;  %v598_v16 = vld [vmem:[%s829_s2] ss:$0 sm:$0xff] }
  0xd6   : > { %v348_v22 = vsel %vm342_vm2, %v623_v14, 0.0  ;;  %v357_v31 = vsel %vm356_vm3, %v629_v21, 0.0 }
  0xd7   : > { %v313_v18 = vpop.f32.mrf.mxu0  ;;  %v333_v26 = vpop.f32.mrf.mxu1 }
  0xd8   : > { %v346_v19 = vsel %vm342_vm2, %v313_v18, 0.0  ;;  %v354_v29 = vsel %vm342_vm2, %v333_v26, 0.0 }
  0xd9   : > { %v347_v20 = vadd.f32 %v346_v19, %v345_v17 }
  0xdb   : > { %v349_v23 = vadd.f32 %v348_v22, %v347_v20 }
  0xdd   : > { %v351_v25 = vadd.f32 %v350_v24, %v349_v23 }
  0xdf   : > { %v353_v28 = vadd.f32 %v352_v27, %v351_v25  ;;  %v599_v25 = vld [vmem:[%s830_s3] ss:$0 sm:$0xff] }
  0xe1   : > { %v355_v30 = vadd.f32 %v354_v29, %v353_v28 }
  0xe3   : > { %v358_v32 = vadd.f32 %v357_v31, %v355_v30 }
  0xe5   : > { %v359_v33 = vrot.slane %v358_v32, 4 }
  0xe7   : > { %v360_v34 = vadd.f32 %v359_v33, %v358_v32 }
  0xe9   : > { %v361_v35 = vrot.slane %v360_v34, 2 }
  0xeb   : > { %v362_v36 = vadd.f32 %v361_v35, %v360_v34 }
  0xed   : > { %v363_v37 = vrot.slane %v362_v36, 1 }
  0xef   : > { %v364_v38 = vadd.f32 %v363_v37, %v362_v36 }
  0xf1   : > { %v366_v39 = vmul.f32 0.015873017, %v364_v38 }
  0xf3   : > { %v367_v40 = vsub.f32 %v303_v12, %v366_v39  ;;  %v368_v41 = vsub.f32 %v620_v10, %v366_v39  ;;  %v369_v42 = vsub.f32 %v313_v18, %v366_v39  ;;  %v370_v43 = vsub.f32 %v623_v14, %v366_v39 }
  0xf4   : > { %v371_v44 = vsub.f32 %v323_v15, %v366_v39  ;;  %v372_v48 = vsub.f32 %v626_v11, %v366_v39  ;;  %v373_v53 = vsub.f32 %v333_v26, %v366_v39  ;;  %v374_v57 = vsub.f32 %v629_v21, %v366_v39 }
  0xf5   : > { %v375_v45 = vmul.f32 %v367_v40, %v367_v40  ;;  %v376_v46 = vmul.f32 %v368_v41, %v368_v41  ;;  %v377_v47 = vmul.f32 %v369_v42, %v369_v42  ;;  %v378_v49 = vmul.f32 %v370_v43, %v370_v43 }
  0xf6   : > { %v379_v54 = vmul.f32 %v371_v44, %v371_v44  ;;  %v380_v58 = vmul.f32 %v372_v48, %v372_v48  ;;  %v381_v61 = vmul.f32 %v373_v53, %v373_v53  ;;  %v382_v0 = vmul.f32 %v374_v57, %v374_v57 }
  0xf7   : > { %v383_v50 = vsel %vm342_vm2, %v375_v45, 0.0  ;;  %v384_v51 = vsel %vm342_vm2, %v376_v46, 0.0  ;;  %v386_v55 = vsel %vm342_vm2, %v377_v47, 0.0  ;;  %v388_v59 = vsel %vm342_vm2, %v378_v49, 0.0 }
  0xf8   : > { %v385_v52 = vadd.f32 %v384_v51, %v383_v50  ;;  %v390_v62 = vsel %vm342_vm2, %v379_v54, 0.0  ;;  %v392_v1 = vsel %vm342_vm2, %v380_v58, 0.0  ;;  %v394_v3 = vsel %vm342_vm2, %v381_v61, 0.0 }
  0xf9   : > { %v396_v5 = vsel %vm356_vm3, %v382_v0, 0.0 }
  0xfa   : > { %v387_v56 = vadd.f32 %v386_v55, %v385_v52 }
  0xfc   : > { %v389_v60 = vadd.f32 %v388_v59, %v387_v56 }
  0xfe   : > { %v391_v63 = vadd.f32 %v390_v62, %v389_v60 }
 0x100   : > { %v393_v2 = vadd.f32 %v392_v1, %v391_v63 }
 0x102   : > { %v395_v4 = vadd.f32 %v394_v3, %v393_v2 }
 0x104   : > { %v397_v6 = vadd.f32 %v396_v5, %v395_v4 }
 0x106   : > { %v398_v7 = vrot.slane %v397_v6, 4 }
 0x108   : > { %v399_v8 = vadd.f32 %v398_v7, %v397_v6 }
 0x10a   : > { %v400_v9 = vrot.slane %v399_v8, 2 }
 0x10c   : > { %v401_v10 = vadd.f32 %v400_v9, %v399_v8 }
 0x10e   : > { %v402_v11 = vrot.slane %v401_v10, 1 }
 0x110   : > { %v403_v12 = vadd.f32 %v402_v11, %v401_v10 }
 0x112   : > { %v404_v13 = vmul.f32 0.015873017, %v403_v12 }
 0x114   : > { %v405_v14 = vadd.f32 1e-05, %v404_v13 }
 0x116   : > { %642 = vrsqrt.f32 %v405_v14 }
 0x123   : > { %v643_v15 = vpop.eup %642 }
 0x124   : > { %v407_v17 = vmul.f32 %v643_v15, %v367_v40  ;;  %v408_v18 = vmul.f32 %v643_v15, %v368_v41  ;;  %v409_v19 = vmul.f32 %v643_v15, %v369_v42  ;;  %v410_v20 = vmul.f32 %v643_v15, %v370_v43 }
 0x125   : > { %v411_v21 = vmul.f32 %v643_v15, %v371_v44  ;;  %v412_v22 = vmul.f32 %v643_v15, %v372_v48  ;;  %v413_v23 = vmul.f32 %v643_v15, %v373_v53  ;;  %v414_v24 = vmul.f32 %v643_v15, %v374_v57 }
 0x126   : > { %v422_v26 = vmul.f32 %v598_v16, %v407_v17  ;;  %v423_v27 = vmul.f32 %v598_v16, %v408_v18  ;;  %v424_v28 = vmul.f32 %v598_v16, %v409_v19  ;;  %v425_v29 = vmul.f32 %v598_v16, %v410_v20 }
 0x127   : > { %v426_v30 = vmul.f32 %v598_v16, %v411_v21  ;;  %v427_v31 = vmul.f32 %v598_v16, %v412_v22  ;;  %v428_v32 = vmul.f32 %v598_v16, %v413_v23  ;;  %v429_v33 = vmul.f32 %v598_v16, %v414_v24 }
 0x128   : > { %v745_v34 = vadd.f32 %v599_v25, %v422_v26  ;;  %v747_v35 = vadd.f32 %v599_v25, %v423_v27  ;;  %v749_v36 = vadd.f32 %v599_v25, %v424_v28  ;;  %v751_v37 = vadd.f32 %v599_v25, %v425_v29 }
 0x129   : > { %v753_v38 = vadd.f32 %v599_v25, %v426_v30  ;;  %v755_v39 = vadd.f32 %v599_v25, %v427_v31  ;;  %v757_v40 = vadd.f32 %v599_v25, %v428_v32  ;;  %v759_v41 = vadd.f32 %v599_v25, %v429_v33 }
 0x12a   : > { %v445_v42 = vmul.f32 %v745_v34, %v745_v34  ;;  %v446_v43 = vmul.f32 %v747_v35, %v747_v35  ;;  %v447_v44 = vmul.f32 %v749_v36, %v749_v36  ;;  %v448_v45 = vmul.f32 %v751_v37, %v751_v37 }
 0x12b   : > { %v449_v46 = vmul.f32 %v753_v38, %v753_v38  ;;  %v450_v47 = vmul.f32 %v755_v39, %v755_v39  ;;  %v451_v48 = vmul.f32 %v757_v40, %v757_v40  ;;  %v452_v49 = vmul.f32 %v759_v41, %v759_v41 }
 0x12c   : > { %v453_v50 = vmul.f32 %v445_v42, %v745_v34  ;;  %v454_v51 = vmul.f32 %v446_v43, %v747_v35  ;;  %v455_v52 = vmul.f32 %v447_v44, %v749_v36  ;;  %v456_v53 = vmul.f32 %v448_v45, %v751_v37 }
 0x12d   : > { %v457_v54 = vmul.f32 %v449_v46, %v753_v38  ;;  %v458_v55 = vmul.f32 %v450_v47, %v755_v39  ;;  %v459_v56 = vmul.f32 %v451_v48, %v757_v40  ;;  %v460_v57 = vmul.f32 %v452_v49, %v759_v41 }
 0x12e   : > { %v461_v58 = vmul.f32 0.044715, %v453_v50  ;;  %v462_v59 = vmul.f32 0.044715, %v454_v51  ;;  %v463_v60 = vmul.f32 0.044715, %v455_v52 }
 0x12f   : > { %v464_v61 = vmul.f32 0.044715, %v456_v53  ;;  %v465_v62 = vmul.f32 0.044715, %v457_v54  ;;  %v466_v63 = vmul.f32 0.044715, %v458_v55 }
 0x130   : > { %v467_v0 = vmul.f32 0.044715, %v459_v56  ;;  %v468_v1 = vmul.f32 0.044715, %v460_v57  ;;  %v469_v2 = vadd.f32 %v461_v58, %v745_v34  ;;  %v470_v3 = vadd.f32 %v462_v59, %v747_v35 }
 0x131   : > { %v471_v4 = vadd.f32 %v463_v60, %v749_v36  ;;  %v472_v5 = vadd.f32 %v464_v61, %v751_v37  ;;  %v473_v6 = vadd.f32 %v465_v62, %v753_v38  ;;  %v474_v7 = vadd.f32 %v466_v63, %v755_v39 }
 0x132   : > { %v475_v8 = vadd.f32 %v467_v0, %v757_v40  ;;  %v477_v9 = vmul.f32 0.7978846, %v469_v2  ;;  %v478_v10 = vmul.f32 0.7978846, %v470_v3  ;;  %v476_v11 = vadd.f32 %v468_v1, %v759_v41 }
 0x133   : > { %v479_v12 = vmul.f32 0.7978846, %v471_v4  ;;  %v480_v13 = vmul.f32 0.7978846, %v472_v5  ;;  %v481_v14 = vmul.f32 0.7978846, %v473_v6 }
 0x134   : > { %644 = vtanh.f32 %v477_v9  ;;  %v482_v15 = vmul.f32 0.7978846, %v474_v7  ;;  %v483_v16 = vmul.f32 0.7978846, %v475_v8  ;;  %v484_v17 = vmul.f32 0.7978846, %v476_v11 }
 0x135   : > { %646 = vtanh.f32 %v478_v10 }
 0x136   : > { %648 = vtanh.f32 %v479_v12 }
 0x137   : > { %650 = vtanh.f32 %v480_v13 }
 0x138   : > { %652 = vtanh.f32 %v481_v14 }
 0x139   : > { %654 = vtanh.f32 %v482_v15 }
 0x13a   : > { %656 = vtanh.f32 %v483_v16 }
 0x13b   : > { %658 = vtanh.f32 %v484_v17 }
 0x141   : > { %v645_v18 = vpop.eup %644 }
 0x142   : > { %v647_v19 = vpop.eup %646  ;;  %v493_v20 = vadd.f32 1.0, %v645_v18 }
 0x143   : > { %v649_v21 = vpop.eup %648  ;;  %v494_v22 = vadd.f32 1.0, %v647_v19 }
 0x144   : > { %v651_v23 = vpop.eup %650  ;;  %v495_v24 = vadd.f32 1.0, %v649_v21  ;;  %v501_v25 = vmul.f32 0.5, %v493_v20 }
 0x145   : > { %v653_v26 = vpop.eup %652  ;;  %v496_v27 = vadd.f32 1.0, %v651_v23  ;;  %v502_v28 = vmul.f32 0.5, %v494_v22 }
 0x146   : > { %v655_v29 = vpop.eup %654  ;;  %v497_v30 = vadd.f32 1.0, %v653_v26  ;;  %v503_v31 = vmul.f32 0.5, %v495_v24  ;;  %v509_v32 = vmul.f32 %v501_v25, %v745_v34 }
 0x147   : > { %v657_v33 = vpop.eup %656  ;;  %v498_v42 = vadd.f32 1.0, %v655_v29  ;;  %v504_v43 = vmul.f32 0.5, %v496_v27  ;;  %v510_v44 = vmul.f32 %v502_v28, %v747_v35 }
 0x148   : > { %v659_v45 = vpop.eup %658  ;;  %v499_v46 = vadd.f32 1.0, %v657_v33  ;;  %v505_v47 = vmul.f32 0.5, %v497_v30  ;;  %v511_v48 = vmul.f32 %v503_v31, %v749_v36  ;;  %517 = vst.msk [vmem:[%s798_s5] sm:$0xff] %vm342_vm2, %v509_v32 }
 0x149   : > { %v500_v49 = vadd.f32 1.0, %v659_v45  ;;  %v506_v34 = vmul.f32 0.5, %v498_v42  ;;  %v512_v50 = vmul.f32 %v504_v43, %v751_v37  ;;  %518 = vst.msk [vmem:[%s798_s5 + $0x8] sm:$0xff] %vm342_vm2, %v510_v44 }
 0x14a   : > { %v507_v51 = vmul.f32 0.5, %v499_v46  ;;  %v513_v35 = vmul.f32 %v505_v47, %v753_v38  ;;  %519 = vst.msk [vmem:[%s798_s5 + $0x10] sm:$0xff] %vm342_vm2, %v511_v48 }
 0x14b   : > { %v508_v52 = vmul.f32 0.5, %v500_v49  ;;  %v514_v53 = vmul.f32 %v506_v34, %v755_v39  ;;  %520 = vst.msk [vmem:[%s798_s5 + $0x18] sm:$0xff] %vm342_vm2, %v512_v50 }
 0x14c   : > { %v515_v36 = vmul.f32 %v507_v51, %v757_v40  ;;  %521 = vst.msk [vmem:[%s798_s5 + $0x20] sm:$0xff] %vm342_vm2, %v513_v35 }
 0x14d   : > { %v516_v54 = vmul.f32 %v508_v52, %v759_v41  ;;  %522 = vst.msk [vmem:[%s798_s5 + $0x28] sm:$0xff] %vm342_vm2, %v514_v53 }
 0x14e   : > { %523 = vst.msk [vmem:[%s798_s5 + $0x30] sm:$0xff] %vm342_vm2, %v515_v36 }
 0x14f   : > { %524 = vst.msk [vmem:[%s798_s5 + $0x38] sm:$0x7f] %vm356_vm3, %v516_v54 }
 0x150 PF: > { %s14_s15 = sadd.s32 1, %s666_s15  }
 0x151   : > { %p11_p4 = scmp.ge.s32.totalorder %s14_s15, 4  }
 0x153   :  { %13 = sbr.rel (!%p11_p4) target bundleno = 1 (0x1), region = 66 }

// kernel: wav2vec2_forward.7
= control target key start
LH: loop header
LB: loop body
LE: loop exit
PB: predicated region body
PF: predicated region fallthrough
CT: control target
= control target key end

     0   :  { %s481_s9 = smov 0   ;;  %s545_s0 = inlined_call_operand.vmem [shape: f32[2,31,96], index: 0, kind: input, shape index: {}]   ;;  %s546_s1 = inlined_call_operand.vmem [shape: f32[96,32], index: 1, kind: input, shape index: {}]   ;;  %s547_s2 = inlined_call_operand.vmem [shape: f32[2,31,32], index: 2, kind: output, shape index: {}]  }
   0x1 LB: > { %s355_s10 = sadd.s32 4294967295, %s464_s9   ;;  %p359_p0 = scmp.ge.s32.totalorder %s464_s9, 1  ;;  %s464_s9 = sphi %s481_s9, %s12_s9  }
   0x2   : > { %p112_p1 = scmp.lt.s32.totalorder %s464_s9, 3 }
   0x4   : > { %p113_p2 = pnand %p359_p0, %p112_p1 }
   0x5   : > { %p134_p3 = scmp.lt.s32.totalorder (!%p113_p2), %s355_s10, 1 }
   0x6   : > { %116 = sbr.rel (%p113_p2) target bundleno = 264 (0x108), region = 28 }
   0xb   : > { %v159_v0 = vld [vmem:[%s546_s1 + $0x58] sm:$0xff]  ;;  %v158_v1 = vld [vmem:[%s546_s1 + $0x50] sm:$0xff]  ;;  %v157_v2 = vld [vmem:[%s546_s1 + $0x48] sm:$0xff]  ;;  %s549_s10 = smov (!%p134_p3, %s355_s10), 1  ;;  %vm160_vm0 = vcmask 785408   ;;  %vm294_vm1 = vcmask 261120  }
   0xc   : > { %388 = vmatprep.subr.mxu0 %v159_v0  ;;  %418 = vmatprep.subr.mxu1 %v159_v0  ;;  %v156_v3 = vld [vmem:[%s546_s1 + $0x40] sm:$0xff]  ;;  %v155_v4 = vld [vmem:[%s546_s1 + $0x38] sm:$0xff]  ;;  %v154_v5 = vld [vmem:[%s546_s1 + $0x30] sm:$0xff]  ;;  %s370_s3 = sshll.u32 %s549_s10, 5  ;;  %vm298_vm2 = vcmask 260096  }
   0xd   : > { %389 = vmatpush3.msra.mxu0 %v159_v0  ;;  %430 = vmatpush3.msra.mxu1 %v159_v0  ;;  %v153_v6 = vld [vmem:[%s546_s1 + $0x28] sm:$0xff]  ;;  %v152_v7 = vld [vmem:[%s546_s1 + $0x20] sm:$0xff]  ;;  %v151_v8 = vld [vmem:[%s546_s1 + $0x18] sm:$0xff]  ;;  %s138_s8 = scalar_lea.vmem %s545_s0, %s370_s3  ;;  %s143_s15 = scalar_lea.vmem %s547_s2, %s370_s3 }
   0xe   : > { %390 = vmatprep.subr.mxu0 %v158_v1  ;;  %419 = vmatprep.subr.mxu1 %v158_v1  ;;  %v150_v9 = vld [vmem:[%s546_s1 + $0x10] sm:$0xff]  ;;  %v149_v10 = vld [vmem:[%s546_s1 + $0x8] sm:$0xff]  ;;  %v148_v11 = vld [vmem:[%s546_s1] sm:$0xff] }
   0xf   : > { %391 = vmatpush3.msra.mxu0 %v158_v1  ;;  %431 = vmatpush3.msra.mxu1 %v158_v1  ;;  %v144_v12 = vld [vmem:[%s138_s8] sm:$0xff]  ;;  %v146_v13 = vld [vmem:[%s138_s8 + $0x10] sm:$0xff]  ;;  %v145_v14 = vld [vmem:[%s138_s8 + $0x8] sm:$0xff] }
  0x10   : > { %392 = vmatprep.subr.mxu0 %v157_v2  ;;  %420 = vmatprep.subr.mxu1 %v157_v2  ;;  %v147_v15 = vld [vmem:[%s138_s8 + $0x18] sm:$0x7f] }
  0x11   : > { %393 = vmatpush3.msra.mxu0 %v157_v2  ;;  %432 = vmatpush3.msra.mxu1 %v157_v2 }
  0x12   : > { %394 = vmatprep.subr.mxu0 %v156_v3  ;;  %421 = vmatprep.subr.mxu1 %v156_v3 }
  0x13   : > { %395 = vmatpush3.msra.mxu0 %v156_v3  ;;  %433 = vmatpush3.msra.mxu1 %v156_v3 }
  0x14   : > { %396 = vmatprep.subr.mxu0 %v155_v4  ;;  %422 = vmatprep.subr.mxu1 %v155_v4 }
  0x15   : > { %397 = vmatpush3.msra.mxu0 %v155_v4  ;;  %434 = vmatpush3.msra.mxu1 %v155_v4 }
  0x16   : > { %398 = vmatprep.subr.mxu0 %v154_v5  ;;  %423 = vmatprep.subr.mxu1 %v154_v5 }
  0x17   : > { %399 = vmatpush3.msra.mxu0 %v154_v5  ;;  %435 = vmatpush3.msra.mxu1 %v154_v5 }
  0x18   : > { %400 = vmatprep.subr.mxu0 %v153_v6  ;;  %424 = vmatprep.subr.mxu1 %v153_v6 }
  0x19   : > { %401 = vmatpush3.msra.mxu0 %v153_v6  ;;  %436 = vmatpush3.msra.mxu1 %v153_v6 }
  0x1a   : > { %402 = vmatprep.subr.mxu0 %v152_v7  ;;  %425 = vmatprep.subr.mxu1 %v152_v7 }
  0x1b   : > { %403 = vmatpush3.msra.mxu0 %v152_v7  ;;  %437 = vmatpush3.msra.mxu1 %v152_v7 }
  0x1c   : > { %404 = vmatprep.subr.mxu0 %v151_v8  ;;  %426 = vmatprep.subr.mxu1 %v151_v8 }
  0x1d   : > { %405 = vmatpush3.msra.mxu0 %v151_v8  ;;  %438 = vmatpush3.msra.mxu1 %v151_v8 }
  0x1e   : > { %406 = vmatprep.subr.mxu0 %v150_v9  ;;  %427 = vmatprep.subr.mxu1 %v150_v9 }
  0x1f   : > { %407 = vmatpush3.msra.mxu0 %v150_v9  ;;  %439 = vmatpush3.msra.mxu1 %v150_v9 }
  0x20   : > { %408 = vmatprep.subr.mxu0 %v149_v10  ;;  %428 = vmatprep.subr.mxu1 %v149_v10 }
  0x21   : > { %409 = vmatpush3.msra.mxu0 %v149_v10  ;;  %440 = vmatpush3.msra.mxu1 %v149_v10 }
  0x22   : > { %410 = vmatprep.subr.mxu0 %v148_v11  ;;  %429 = vmatprep.subr.mxu1 %v148_v11 }
  0x23   : > { %411 = vmatpush3.msra.mxu0 %v148_v11  ;;  %441 = vmatpush3.msra.mxu1 %v148_v11 }
  0x24   : > { %412 = vmatprep.mubr.msk.f32.mxu0 %vm160_vm0, %v144_v12  ;;  %415 = vmatprep.mubr.msk.f32.mxu1 %vm160_vm0, %v146_v13 }
  0x25   : > { %413 = vmatmul.mubr.msk.f32.vlgmr.msra.gmra.mxu0 %vm160_vm0, %v145_v14  ;;  %416 = vmatmul.mubr.msk.f32.vlgmr.msra.gmra.mxu1 %vm160_vm0, %v147_v15 }
  0xe5   : > { %v414_v16 = vpop.f32.mrf.mxu0  ;;  %v417_v17 = vpop.f32.mrf.mxu1 }
  0xe6   : > { %v259_v18 = vmul.f32 %v414_v16, %v414_v16  ;;  %v261_v19 = vmul.f32 %v417_v17, %v417_v17 }
  0xe7   : > { %v239_v20 = vpop.f32.mrf.mxu0  ;;  %v249_v21 = vpop.f32.mrf.mxu1 }
  0xe8   : > { %v263_v22 = vmul.f32 %v414_v16, %v259_v18  ;;  %v265_v23 = vmul.f32 %v417_v17, %v261_v19  ;;  %v258_v24 = vmul.f32 %v239_v20, %v239_v20  ;;  %v260_v25 = vmul.f32 %v249_v21, %v249_v21 }
  0xea   : > { %v267_v26 = vmul.f32 0.044715, %v263_v22  ;;  %v269_v27 = vmul.f32 0.044715, %v265_v23  ;;  %v262_v28 = vmul.f32 %v258_v24, %v239_v20  ;;  %v264_v29 = vmul.f32 %v260_v25, %v249_v21 }
  0xec   : > { %v271_v30 = vadd.f32 %v414_v16, %v267_v26  ;;  %v273_v31 = vadd.f32 %v417_v17, %v269_v27  ;;  %v266_v32 = vmul.f32 0.044715, %v262_v28  ;;  %v268_v33 = vmul.f32 0.044715, %v264_v29 }
  0xee   : > { %v275_v34 = vmul.f32 0.7978846, %v271_v30  ;;  %v277_v35 = vmul.f32 0.7978846, %v273_v31  ;;  %v270_v36 = vadd.f32 %v266_v32, %v239_v20  ;;  %v272_v37 = vadd.f32 %v268_v33, %v249_v21 }
  0xf0   : > { %450 = vtanh.f32 %v275_v34  ;;  %v274_v38 = vmul.f32 0.7978846, %v270_v36  ;;  %v276_v39 = vmul.f32 0.7978846, %v272_v37 }
  0xf1   : > { %452 = vtanh.f32 %v277_v35 }
  0xf2   : > { %454 = vtanh.f32 %v274_v38 }
  0xf3   : > { %456 = vtanh.f32 %v276_v39 }
  0xfd   : > { %v451_v40 = vpop.eup %450 }
  0xfe   : > { %v453_v41 = vpop.eup %452  ;;  %v283_v42 = vadd.f32 1.0, %v451_v40 }
  0xff   : > { %v455_v43 = vpop.eup %454  ;;  %v285_v44 = vadd.f32 1.0, %v453_v41 }
 0x100   : > { %v457_v45 = vpop.eup %456  ;;  %v287_v46 = vmul.f32 0.5, %v283_v42  ;;  %v282_v47 = vadd.f32 1.0, %v455_v43 }
 0x101   : > { %v289_v48 = vmul.f32 0.5, %v285_v44  ;;  %v284_v49 = vadd.f32 1.0, %v457_v45 }
 0x102   : > { %v291_v50 = vmul.f32 %v414_v16, %v287_v46  ;;  %v286_v51 = vmul.f32 0.5, %v282_v47 }
 0x103   : > { %v293_v52 = vmul.f32 %v417_v17, %v289_v48  ;;  %v288_v53 = vmul.f32 0.5, %v284_v49 }
 0x104   : > { %296 = vst.msk [vmem:[%s143_s15 + $0x8] sm:$0xff] %vm294_vm1, %v291_v50  ;;  %v290_v54 = vmul.f32 %v286_v51, %v239_v20 }
 0x105   : > { %299 = vst.msk [vmem:[%s143_s15 + $0x18] sm:$0x7f] %vm298_vm2, %v293_v52  ;;  %v292_v55 = vmul.f32 %v288_v53, %v249_v21 }
 0x106   : > { %295 = vst.msk [vmem:[%s143_s15] sm:$0xff] %vm294_vm1, %v290_v54 }
 0x107   : > { %297 = vst.msk [vmem:[%s143_s15 + $0x10] sm:$0xff] %vm294_vm1, %v292_v55 }
 0x108 PF: > { %s12_s9 = sadd.s32 1, %s464_s9  }
 0x109   : > { %p9_p4 = scmp.ge.s32.totalorder %s12_s9, 4  }
 0x10b   :  { %11 = sbr.rel (!%p9_p4) target bundleno = 1 (0x1), region = 58 }

// kernel: wav2vec2_forward.8
= control target key start
LH: loop header
LB: loop body
LE: loop exit
PB: predicated region body
PF: predicated region fallthrough
CT: control target
= control target key end

     0   :  { %s392_s9 = smov 0   ;;  %s442_s0 = inlined_call_operand.vmem [shape: f32[2,15,64], index: 0, kind: input, shape index: {}]   ;;  %s443_s1 = inlined_call_operand.vmem [shape: f32[64,32], index: 1, kind: input, shape index: {}]   ;;  %s444_s2 = inlined_call_operand.vmem [shape: f32[2,15,32], index: 2, kind: output, shape index: {}]  }
   0x1 LB: > { %s313_s10 = sadd.s32 4294967295, %s375_s9   ;;  %p317_p0 = scmp.ge.s32.totalorder %s375_s9, 1  ;;  %s375_s9 = sphi %s392_s9, %s12_s9  }
   0x2   : > { %p112_p1 = scmp.lt.s32.totalorder %s375_s9, 3 }
   0x4   : > { %p113_p2 = pnand %p317_p0, %p112_p1 }
   0x5   : > { %p134_p3 = scmp.lt.s32.totalorder (!%p113_p2), %s313_s10, 1 }
   0x6   : > { %116 = sbr.rel (%p113_p2) target bundleno = 254 (0xfe), region = 28 }
   0xb   : > { %v153_v0 = vld [vmem:[%s443_s1 + $0x38] sm:$0xff]  ;;  %v152_v1 = vld [vmem:[%s443_s1 + $0x30] sm:$0xff]  ;;  %v151_v2 = vld [vmem:[%s443_s1 + $0x28] sm:$0xff]  ;;  %s446_s10 = smov (!%p134_p3, %s313_s10), 1  ;;  %vm154_vm0 = vcmask 523264   ;;  %vm256_vm1 = vcmask 260096  }
   0xc   : > { %338 = vmatprep.subr.mxu0 %v153_v0  ;;  %v150_v3 = vld [vmem:[%s443_s1 + $0x20] sm:$0xff]  ;;  %s326_s19 = sshll.u32 %s446_s10, 4  ;;  %v149_v4 = vld [vmem:[%s443_s1 + $0x18] sm:$0xff]  ;;  %v148_v6 = vld [vmem:[%s443_s1 + $0x10] sm:$0xff]  ;;  %vm254_vm2 = vcmask 261120  }
   0xd   : > { %339 = vmatpush3.msra.mxu0 %v153_v0  ;;  %s138_s22 = scalar_lea.vmem %s442_s0, %s326_s19  ;;  %v147_v7 = vld [vmem:[%s443_s1 + $0x8] sm:$0xff]  ;;  %v146_v8 = vld [vmem:[%s443_s1] sm:$0xff]  ;;  %s143_s5 = scalar_lea.vmem %s444_s2, %s326_s19 }
   0xe   : > { %340 = vmatprep.subr.mxu0 %v152_v1  ;;  %v144_v5 = vld [vmem:[%s138_s22] sm:$0xff]  ;;  %v145_v9 = vld [vmem:[%s138_s22 + $0x8] sm:$0x7f] }
   0xf   : > { %341 = vmatpush3.msra.mxu0 %v152_v1  ;;  %354 = vmatprep.mubr.msk.f32.mxu0 %vm154_vm0, %v144_v5 }
  0x10   : > { %342 = vmatprep.subr.mxu0 %v151_v2 }
  0x11   : > { %343 = vmatpush3.msra.mxu0 %v151_v2 }
  0x12   : > { %344 = vmatprep.subr.mxu0 %v150_v3 }
  0x13   : > { %345 = vmatpush3.msra.mxu0 %v150_v3 }
  0x14   : > { %346 = vmatprep.subr.mxu0 %v149_v4 }
  0x15   : > { %347 = vmatpush3.msra.mxu0 %v149_v4 }
  0x16   : > { %348 = vmatprep.subr.mxu0 %v148_v6 }
  0x17   : > { %349 = vmatpush3.msra.mxu0 %v148_v6 }
  0x18   : > { %350 = vmatprep.subr.mxu0 %v147_v7 }
  0x19   : > { %351 = vmatpush3.msra.mxu0 %v147_v7 }
  0x1a   : > { %352 = vmatprep.subr.mxu0 %v146_v8 }
  0x1b   : > { %353 = vmatpush3.msra.mxu0 %v146_v8 }
  0x1c   : > { %355 = vmatmul.mubr.msk.f32.vlgmr.msra.gmra.mxu0 %vm154_vm0, %v145_v9 }
  0xdc   : > { %v356_v10 = vpop.f32.mrf.mxu0 }
  0xdd   : > { %v237_v11 = vmul.f32 %v356_v10, %v356_v10 }
  0xde   : > { %v227_v12 = vpop.f32.mrf.mxu0 }
  0xdf   : > { %v239_v13 = vmul.f32 %v356_v10, %v237_v11  ;;  %v236_v14 = vmul.f32 %v227_v12, %v227_v12 }
  0xe1   : > { %v241_v15 = vmul.f32 0.044715, %v239_v13  ;;  %v238_v16 = vmul.f32 %v236_v14, %v227_v12 }
  0xe3   : > { %v243_v17 = vadd.f32 %v356_v10, %v241_v15  ;;  %v240_v18 = vmul.f32 0.044715, %v238_v16 }
  0xe5   : > { %v245_v19 = vmul.f32 0.7978846, %v243_v17  ;;  %v242_v20 = vadd.f32 %v240_v18, %v227_v12 }
  0xe7   : > { %365 = vtanh.f32 %v245_v19  ;;  %v244_v21 = vmul.f32 0.7978846, %v242_v20 }
  0xe9   : > { %367 = vtanh.f32 %v244_v21 }
  0xf4   : > { %v366_v22 = vpop.eup %365 }
  0xf5   : > { %v249_v23 = vadd.f32 1.0, %v366_v22 }
  0xf6   : > { %v368_v24 = vpop.eup %367 }
  0xf7   : > { %v251_v25 = vmul.f32 0.5, %v249_v23  ;;  %v248_v26 = vadd.f32 1.0, %v368_v24 }
  0xf9   : > { %v253_v27 = vmul.f32 %v356_v10, %v251_v25  ;;  %v250_v28 = vmul.f32 0.5, %v248_v26 }
  0xfb   : > { %257 = vst.msk [vmem:[%s143_s5 + $0x8] sm:$0x7f] %vm256_vm1, %v253_v27  ;;  %v252_v29 = vmul.f32 %v250_v28, %v227_v12 }
  0xfd   : > { %255 = vst.msk [vmem:[%s143_s5] sm:$0xff] %vm254_vm2, %v252_v29 }
  0xfe PF: > { %s12_s9 = sadd.s32 1, %s375_s9  }
  0xff   : > { %p9_p4 = scmp.ge.s32.totalorder %s12_s9, 4  }
 0x101   :  { %11 = sbr.rel (!%p9_p4) target bundleno = 1 (0x1), region = 58 }

// kernel: wav2vec2_forward.9
= control target key start
LH: loop header
LB: loop body
LE: loop exit
PB: predicated region body
PF: predicated region fallthrough
CT: control target
= control target key end

     0   :  { %s5679_s0 = inlined_call_operand.vmem [shape: f32[2,15,32], index: 0, kind: input, shape index: {}]   ;;  %s5680_s1 = inlined_call_operand.vmem [shape: f32[1,32], index: 1, kind: input, shape index: {}]   ;;  %s5681_s2 = inlined_call_operand.vmem [shape: f32[1,32], index: 2, kind: input, shape index: {}]   ;;  %s5682_s3 = inlined_call_operand.vmem [shape: f32[32,32], index: 3, kind: input, shape index: {}]   ;;  %s5683_s4 = inlined_call_operand.vmem [shape: f32[1,32], index: 4, kind: input, shape index: {}]   ;;  %s5684_s5 = inlined_call_operand.vmem [shape: f32[4,32,32], index: 5, kind: input, shape index: {}]   ;;  %s5685_s6 = inlined_call_operand.vmem [shape: f32[1,32], index: 6, kind: input, shape index: {}]   ;;  %s5686_s7 = inlined_call_operand.vmem [shape: f32[1,32], index: 7, kind: input, shape index: {}]   ;;  %s5687_s8 = inlined_call_operand.vmem [shape: f32[1,32], index: 8, kind: input, shape index: {}]   ;;  %s5688_s9 = inlined_call_operand.vmem [shape: f32[2,32,96], index: 9, kind: input, shape index: {}]   ;;  %s5689_s10 = inlined_call_operand.vmem [shape: f32[2,1,96], index: 10, kind: input, shape index: {}]   ;;  %s5690_s11 = inlined_call_operand.vmem [shape: f32[2,32,32], index: 11, kind: input, shape index: {}]   ;;  %s5691_s12 = inlined_call_operand.vmem [shape: f32[2,1,32], index: 12, kind: input, shape index: {}]   ;;  %s5692_s13 = inlined_call_operand.vmem [shape: f32[2,1,32], index: 13, kind: input, shape index: {}]   ;;  %s5693_s14 = inlined_call_operand.vmem [shape: f32[2,1,32], index: 14, kind: input, shape index: {}]   ;;  %s5694_s15 = inlined_call_operand.vmem [shape: f32[2,32,128], index: 15, kind: input, shape index: {}]   ;;  %s5695_s16 = inlined_call_operand.vmem [shape: f32[2,1,128], index: 16, kind: input, shape index: {}]   ;;  %s5696_s17 = inlined_call_operand.vmem [shape: f32[2,128,32], index: 17, kind: input, shape index: {}]   ;;  %s5697_s18 = inlined_call_operand.vmem [shape: f32[2,1,32], index: 18, kind: input, shape index: {}]   ;;  %s5698_s19 = inlined_call_operand.vmem [shape: f32[2,1,32], index: 19, kind: input, shape index: {}]   ;;  %s5699_s20 = inlined_call_operand.vmem [shape: f32[2,1,32], index: 20, kind: input, shape index: {}]   ;;  %s5700_s21 = inlined_call_operand.hbm [shape: f32[2,1,32], index: 21, kind: output, shape index: {}]  }
   0x1   :  { %5733 = sst [smem:[#allocation10_spill]] %s5679_s0 }
   0x2   :  { %5734 = sst [smem:[#allocation11_spill]] %s5680_s1 }
   0x3   :  { %5735 = sst [smem:[#allocation12_spill]] %s5681_s2 }
   0x4   :  { %5736 = sst [smem:[#allocation13_spill]] %s5682_s3 }
   0x5   :  { %5737 = sst [smem:[#allocation14_spill]] %s5683_s4 }
   0x6   :  { %5738 = sst [smem:[#allocation15_spill]] %s5684_s5 }
   0x7   :  { %5739 = sst [smem:[#allocation16_spill]] %s5685_s6 }
   0x8   :  { %5740 = sst [smem:[#allocation17_spill]] %s5686_s7 }
   0x9   :  { %26 = vsyncpa [#allocation3], 0 }
   0xa   :  { %28 = vsyncpa [#allocation3 + $0x1], 0  ;;  %s4941_s2 = smov 0   ;;  %s4943_s25 = smov 0  }
   0xb   :  { %s4945_s26 = smov 0   ;;  %s4947_s27 = smov 0  }
   0xc LB: > { %5741 = sst [smem:[#allocation5_spill]] %s4802_s2  ;;  %s4962_s3 = sadd.s32 4294967295, %s4814_s27   ;;  %s4814_s27 = sphi %s4947_s27, %s5770_s27   ;;  %s4810_s26 = sphi %s4945_s26, %s5772_s26   ;;  %s4806_s25 = sphi %s4943_s25, %s5774_s25   ;;  %s4802_s2 = sphi %s4941_s2, %s5773_s2  }
   0xd   : > { %5742 = sst [smem:[#allocation6_spill]] %s4810_s26  ;;  %s3974_s28 = sadd.s32 4294967294, %s4814_s27  }
   0xe   : > { %s4966_s29 = sadd.s32 1, %s4814_s27   ;;  %s487_s0 = sadd.s32 1, %s4810_s26 }
   0xf   : > { %5743 = sst [smem:[#allocation7_spill]] %s4966_s29  ;;  %s484_s4 = ssub.s32 %s4814_s27, %s4966_s29 }
  0x10   : > { %p497_p0 = scmp.ne.s32.totalorder %s4810_s26, %s4806_s25  ;;  %p485_p1 = scmp.eq.s32.totalorder %s484_s4, 0 }
  0x11   : > { %p498_p2 = scmp.eq.s32.totalorder %s4962_s3, 1  ;;  %p503_p3 = scmp.ne.s32.totalorder %s4806_s25, %s4802_s2 }
  0x12   : > { %p504_p4 = scmp.eq.s32.totalorder %s3974_s28, 1  ;;  %p3977_p7 = scmp.ge.s32.totalorder %s4814_s27, 1 }
  0x13   : > { %s4977_s30 = scalar_select %p485_p1, %s4810_s26, %s487_s0  }
  0x14   : > { %p4979_p5 = por %p498_p2, %p497_p0  ;;  %p4983_p6 = por %p504_p4, %p503_p3 }
  0x15   : > { %5744 = sst [smem:[#allocation8_spill]] %s4977_s30  ;;  %p590_p8 = scmp.lt.s32.totalorder %s4814_s27, 3 }
  0x16   : > { %s5746_s22 = scalar_select %p4983_p6, 1, 0 }
  0x17   : > { %p591_p9 = pnand %p3977_p7, %p590_p8 }
  0x18   : > { %5747 = sst [smem:[#allocation9_spill]] %s5746_s22  ;;  %p649_p10 = scmp.lt.s32.totalorder (!%p591_p9), %s4962_s3, 1 }
  0x19   : > { %594 = sbr.rel (%p591_p9) target bundleno = 8511 (0x213f), region = 104  ;;  %s5748_s0 = sld [smem:[#allocation10_spill]] (!%p591_p9) }
  0x1a   : > { %s5749_s24 = sld [smem:[#allocation13_spill]] (!%p591_p9)  ;;  %s4816_s2 = smov (!%p591_p9), 96  }
  0x1b   : > { %s5751_s26 = sld [smem:[#allocation12_spill]] (!%p591_p9)  ;;  %s4817_s22 = smov (!%p591_p9), 64  }
  0x1c   : > { %s5753_s30 = sld [smem:[#allocation14_spill]] (!%p591_p9)  ;;  %s5721_s28 = smov (!%p591_p9), 56  }
  0x1d   : > { %s5754_s6 = sld [smem:[#allocation16_spill]] (!%p591_p9)  ;;  %s5713_s29 = smov (!%p591_p9), 48  }
  0x1e   : > { %s650_s23 = scalar_select %p649_p10, %s4962_s3, 1  ;;  %vm658_vm0 = vcmask 261120   ;;  %vm662_vm1 = vcmask 260096   ;;  %vm804_vm2 = vcmask 1040384   ;;  %vm797_vm3 = vcmask 1041408  }
  0x1f   : > { %vm816_vm4 = vcmask 1046528   ;;  %vm1076_vm5 = vcmask 1044480   ;;  %vm984_vm6 = vcmask 1045504   ;;  %s5755_s7 = sld [smem:[#allocation17_spill]]  ;;  %vm1336_vm7 = vcmask 64512  }
  0x20   : > { %s4131_s1 = sshll.u32 %s650_s23, 4  ;;  %v706_v14 = vld [vmem:[%s5749_s24 + $0x18] sm:$0xff]  ;;  %v705_v15 = vld [vmem:[%s5749_s24 + $0x10] sm:$0xff]  ;;  %v704_v16 = vld [vmem:[%s5749_s24 + $0x8] sm:$0xff]  ;;  %vm1426_vm8 = vcmask 120832   ;;  %vm1422_vm9 = vcmask 121856  }
  0x21   : > { %s653_s4 = scalar_lea.vmem %s5748_s0, %s4131_s1  ;;  %4298 = vmatprep.subr.mxu1 %v706_v14  ;;  %v703_v17 = vld [vmem:[%s5749_s24] sm:$0xff]  ;;  %s5750_s1 = sld [smem:[#allocation11_spill]]  ;;  %vm2163_vm10 = vcmask 130048   ;;  %vm2166_vm11 = vcmask 195584   ;;  %vm3904_vm12 = vcmask 253952  }
  0x22   : > { %v654_v0 = vld [vmem:[%s653_s4] sm:$0xff]  ;;  %v655_v1 = vld [vmem:[%s653_s4 + $0x8] sm:$0x7f]  ;;  %4299 = vmatpush3.msra.mxu1 %v706_v14  ;;  %s5752_s24 = sld [smem:[#allocation15_spill]]  ;;  %s5729_s23 = smov 88  }
  0x23   : > { %v659_v2 = vsel %vm658_vm0, %v654_v0, 0.0  ;;  %v663_v3 = vsel %vm662_vm1, %v655_v1, 0.0  ;;  %4300 = vmatprep.subr.mxu1 %v705_v15  ;;  %v3981_v27 = vld [vmem:[%s5751_s26] ss:$0 sm:$0xff]  ;;  %s5725_s0 = smov 80   ;;  %s5723_s26 = smov 112  }
  0x24   : > { %660 = vadd.xlane.f32.xlu0 %v659_v2  ;;  %4301 = vmatpush3.msra.mxu1 %v705_v15  ;;  %v3982_v43 = vld [vmem:[%s5753_s30] ss:$0 sm:$0xff]  ;;  %s5711_s4 = smov 72   ;;  %s5709_s30 = smov 104  }
  0x25   : > { %4302 = vmatprep.subr.mxu1 %v704_v16 }
  0x26   : > { %4303 = vmatpush3.msra.mxu1 %v704_v16 }
  0x27   : > { %4304 = vmatprep.subr.mxu1 %v703_v17  ;;  %v3980_v25 = vld [vmem:[%s5750_s1] ss:$0 sm:$0xff]  ;;  %s5727_s1 = smov 120  }
  0x28   : > { %664 = vadd.xlane.f32.xlu0 %v663_v3  ;;  %4305 = vmatpush3.msra.mxu1 %v703_v17  ;;  %v3988_v34 = vld [vmem:[%s5752_s24 + $0x38] sm:$0xff]  ;;  %v3987_v36 = vld [vmem:[%s5752_s24 + $0x30] sm:$0xff]  ;;  %v3986_v38 = vld [vmem:[%s5752_s24 + $0x28] sm:$0xff] }
  0x29   : > { %4309 = vmatprep.subr.mxu1 %v3988_v34  ;;  %v4002_v35 = vld [vmem:[%s5752_s24 + $0x78] sm:$0xff]  ;;  %v4001_v37 = vld [vmem:[%s5752_s24 + $0x70] sm:$0xff]  ;;  %v4000_v39 = vld [vmem:[%s5752_s24 + $0x68] sm:$0xff] }
  0x2a   : > { %4342 = vmatprep.subr.mxu0 %v4002_v35  ;;  %v3985_v40 = vld [vmem:[%s5752_s24 + $0x20] sm:$0xff]  ;;  %v809_v42 = vld [vmem:[%s5752_s24 + $0x18] sm:$0xff]  ;;  %v808_v61 = vld [vmem:[%s5752_s24 + $0x10] sm:$0xff] }
  0x2b   : > { %4343 = vmatpush3.msra.mxu0 %v4002_v35  ;;  %v3999_v41 = vld [vmem:[%s5752_s24 + $0x60] sm:$0xff]  ;;  %v807_v62 = vld [vmem:[%s5752_s24 + $0x8] sm:$0xff]  ;;  %v3996_v2 = vld [vmem:[%s5752_s24 + $0x58] sm:$0xff] }
  0x2c   : > { %4344 = vmatprep.subr.mxu0 %v4001_v37  ;;  %v806_v63 = vld [vmem:[%s5752_s24] sm:$0xff]  ;;  %v3995_v3 = vld [vmem:[%s5752_s24 + $0x50] sm:$0xff] }
  0x2d   : > { %4345 = vmatpush3.msra.mxu0 %v4001_v37 }
  0x2e   : > { %4346 = vmatprep.subr.mxu0 %v4000_v39 }
  0x2f   : > { %4347 = vmatpush3.msra.mxu0 %v4000_v39 }
  0x30   : > { %4348 = vmatprep.subr.mxu0 %v3999_v41 }
  0x31   : > { %4349 = vmatpush3.msra.mxu0 %v3999_v41 }
  0xad   : > { %v661_v4 = vpop.xlane.xlu0 %660 }
  0xae   : > { %v667_v5 = vmul.f32 0.03125, %v661_v4 }
  0xb0   : > { %v669_v6 = vsub.f32 %v654_v0, %v667_v5  ;;  %v3994_v5 = vld [vmem:[%s5752_s24 + $0x48] sm:$0xff] }
  0xb1   : > { %v665_v7 = vpop.xlane.xlu0 %664 }
  0xb2   : > { %v668_v8 = vmul.f32 0.03125, %v665_v7  ;;  %v671_v9 = vmul.f32 %v669_v6, %v669_v6 }
  0xb4   : > { %v670_v10 = vsub.f32 %v655_v1, %v668_v8  ;;  %v673_v11 = vsel %vm658_vm0, %v671_v9, 0.0 }
  0xb5   : > { %674 = vadd.xlane.f32.xlu1 %v673_v11 }
  0xb6   : > { %v672_v12 = vmul.f32 %v670_v10, %v670_v10 }
  0xb8   : > { %v676_v13 = vsel %vm662_vm1, %v672_v12, 0.0 }
  0xb9   : > { %677 = vadd.xlane.f32.xlu1 %v676_v13 }
 0x13e   : > { %v675_v18 = vpop.xlane.xlu1 %674 }
 0x13f   : > { %v679_v19 = vmul.f32 0.03125, %v675_v18  ;;  %v4005_v18 = vld [vmem:[%s5754_s6] ss:$0 sm:$0xff] }
 0x141   : > { %v681_v20 = vadd.f32 1e-05, %v679_v19 }
 0x142   : > { %v678_v21 = vpop.xlane.xlu1 %677 }
 0x143   : > { %4654 = vrsqrt.f32 %v681_v20  ;;  %v680_v22 = vmul.f32 0.03125, %v678_v21 }
 0x145   : > { %v682_v23 = vadd.f32 1e-05, %v680_v22 }
 0x147   : > { %4656 = vrsqrt.f32 %v682_v23 }
 0x150   : > { %v4655_v24 = vpop.eup %4654 }
 0x151   : > { %v685_v26 = vmul.f32 %v4655_v24, %v669_v6  ;;  %v3993_v6 = vld [vmem:[%s5752_s24 + $0x40] sm:$0xff] }
 0x153   : > { %v693_v28 = vmul.f32 %v3980_v25, %v685_v26 }
 0x154   : > { %v4657_v29 = vpop.eup %4656 }
 0x155   : > { %v686_v30 = vmul.f32 %v4657_v29, %v670_v10  ;;  %v701_v31 = vadd.f32 %v3981_v27, %v693_v28 }
 0x157   : > { %v694_v32 = vmul.f32 %v3980_v25, %v686_v30  ;;  %4306 = vmatprep.mubr.msk.f32.mxu1 %vm658_vm0, %v701_v31 }
 0x159   : > { %v702_v33 = vadd.f32 %v3981_v27, %v694_v32 }
 0x15b   : > { %4307 = vmatmul.mubr.msk.f32.vlgmr.msra.gmra.mxu1 %vm658_vm0, %v702_v33 }
 0x15c   : > { %4310 = vmatpush3.msra.mxu1 %v3988_v34 }
 0x15d   : > { %4311 = vmatprep.subr.mxu1 %v3987_v36 }
 0x15e   : > { %4312 = vmatpush3.msra.mxu1 %v3987_v36 }
 0x15f   : > { %4313 = vmatprep.subr.mxu1 %v3986_v38 }
 0x160   : > { %4314 = vmatpush3.msra.mxu1 %v3986_v38 }
 0x161   : > { %4315 = vmatprep.subr.mxu1 %v3985_v40 }
 0x162   : > { %4316 = vmatpush3.msra.mxu1 %v3985_v40 }
 0x163   : > { %4320 = vmatprep.subr.mxu1 %v809_v42 }
 0x21b   : > { %v4308_v44 = vpop.f32.mrf.mxu1 }
 0x21c   : > { %v5048_v45 = vadd.f32 %v4308_v44, %v3982_v43 }
 0x21d   : > { %v786_v46 = vpop.f32.mrf.mxu1 }
 0x21e   : > { %v799_v47 = vrot.slane %v5048_v45, 6  ;;  %v5051_v48 = vadd.f32 %v3982_v43, %v786_v46 }
 0x220   : > { %v805_v49 = vsel %vm804_vm2, %v799_v47, 0.0  ;;  %v798_v50 = vrot.slane %v5051_v48, 6 }
 0x221   : > { %v1080_v51 = vrot.slane %v805_v49, 3  ;;  %v988_v7 = vrot.slane %v805_v49, 2 }
 0x222   : > { %v800_v52 = vsel %vm797_vm3, %v798_v50, %v799_v47  ;;  %v803_v53 = vsel %vm797_vm3, 0.0, %v798_v50 }
 0x223   : > { %v817_v54 = vrot.slane %v803_v53, 1  ;;  %v818_v55 = vrot.slane %v800_v52, 1  ;;  %v1077_v56 = vrot.slane %v803_v53, 3  ;;  %v1078_v57 = vrot.slane %v800_v52, 3 }
 0x224   : > { %v985_v0 = vrot.slane %v803_v53, 2  ;;  %v986_v1 = vrot.slane %v800_v52, 2 }
 0x225   : > { %v819_v58 = vsel %vm816_vm4, %v817_v54, %v818_v55  ;;  %v1079_v59 = vsel %vm1076_vm5, %v1077_v56, %v1078_v57  ;;  %v1081_v60 = vsel %vm1076_vm5, %v1078_v57, %v1080_v51 }
 0x226   : > { %4317 = vmatprep.mubr.msk.f32.mxu1 %vm658_vm0, %v819_v58  ;;  %4350 = vmatprep.mubr.msk.f32.mxu0 %vm658_vm0, %v1079_v59  ;;  %v987_v4 = vsel %vm984_vm6, %v985_v0, %v986_v1  ;;  %v989_v8 = vsel %vm984_vm6, %v986_v1, %v988_v7  ;;  %v1238_v59 = vld [vmem:[%s5688_s9 + $0x10] sm:$0xff] }
 0x227   : > { %4318 = vmatmul.mubr.msk.f32.vlgmr.msra.gmra.mxu1 %vm658_vm0, %v818_v55  ;;  %4351 = vmatmul.mubr.msk.f32.vlgmr.msra.gmra.mxu0 %vm658_vm0, %v1081_v60  ;;  %v1237_v60 = vld [vmem:[%s5688_s9 + $0x8] sm:$0xff] }
 0x228   : > { %4321 = vmatpush3.msra.mxu1 %v809_v42  ;;  %4328 = vmatprep.mubr.msk.f32.mxu1 %vm658_vm0, %v803_v53 }
 0x229   : > { %4322 = vmatprep.subr.mxu1 %v808_v61 }
 0x22a   : > { %4323 = vmatpush3.msra.mxu1 %v808_v61  ;;  %v1236_v61 = vld [vmem:[%s5688_s9] sm:$0xff] }
 0x22b   : > { %4324 = vmatprep.subr.mxu1 %v807_v62 }
 0x22c   : > { %4325 = vmatpush3.msra.mxu1 %v807_v62 }
 0x22d   : > { %4326 = vmatprep.subr.mxu1 %v806_v63 }
 0x22e   : > { %4327 = vmatpush3.msra.mxu1 %v806_v63 }
 0x22f   : > { %4329 = vmatmul.mubr.msk.f32.vlgmr.msra.gmra.mxu1 %vm658_vm0, %v800_v52  ;;  %4331 = vmatprep.subr.mxu1 %v3996_v2 }
 0x230   : > { %4332 = vmatpush3.msra.mxu1 %v3996_v2  ;;  %4339 = vmatprep.mubr.msk.f32.mxu1 %vm658_vm0, %v987_v4 }
 0x231   : > { %4333 = vmatprep.subr.mxu1 %v3995_v3 }
 0x232   : > { %4334 = vmatpush3.msra.mxu1 %v3995_v3 }
 0x233   : > { %4335 = vmatprep.subr.mxu1 %v3994_v5 }
 0x234   : > { %4336 = vmatpush3.msra.mxu1 %v3994_v5  ;;  %v4006_v5 = vld [vmem:[%s5755_s7] ss:$0 sm:$0xff] }
 0x235   : > { %4337 = vmatprep.subr.mxu1 %v3993_v6 }
 0x236   : > { %4338 = vmatpush3.msra.mxu1 %v3993_v6 }
 0x237   : > { %4340 = vmatmul.mubr.msk.f32.vlgmr.msra.gmra.mxu1 %vm658_vm0, %v989_v8 }
 0x2e7   : > { %v4319_v9 = vpop.f32.mrf.mxu1  ;;  %v4352_v14 = vpop.f32.mrf.mxu0 }
 0x2e9   : > { %v890_v10 = vpop.f32.mrf.mxu1  ;;  %v1152_v22 = vpop.f32.mrf.mxu0 }
 0x2ef   : > { %v4330_v11 = vpop.f32.mrf.mxu1 }
 0x2f0   : > { %v975_v13 = vadd.f32 %v4330_v11, %v4319_v9 }
 0x2f1   : > { %v969_v12 = vpop.f32.mrf.mxu1 }
 0x2f2   : > { %v970_v16 = vadd.f32 %v969_v12, %v890_v10  ;;  %v4007_v10 = vld [vmem:[%s5687_s8] ss:$0 sm:$0xff] }
 0x2f7   : > { %v4341_v15 = vpop.f32.mrf.mxu1 }
 0x2f8   : > { %v1070_v17 = vadd.f32 %v4341_v15, %v975_v13 }
 0x2f9   : > { %v1060_v19 = vpop.f32.mrf.mxu1 }
 0x2fa   : > { %v1162_v20 = vadd.f32 %v4352_v14, %v1070_v17  ;;  %v1069_v21 = vadd.f32 %v1060_v19, %v970_v16  ;;  %v4008_v14 = vld [vmem:[%s5689_s10] ss:$0 sm:$0xff] }
 0x2fc   : > { %v1171_v23 = vadd.f32 %v4005_v18, %v1162_v20  ;;  %v1161_v24 = vadd.f32 %v1152_v22, %v1069_v21 }
 0x2fe   : > { %v1173_v25 = vmul.f32 %v1171_v23, %v1171_v23  ;;  %v1170_v26 = vadd.f32 %v4005_v18, %v1161_v24 }
 0x300   : > { %v1175_v27 = vmul.f32 %v1173_v25, %v1171_v23  ;;  %v1172_v28 = vmul.f32 %v1170_v26, %v1170_v26 }
 0x302   : > { %v1177_v29 = vmul.f32 0.044715, %v1175_v27  ;;  %v1174_v30 = vmul.f32 %v1172_v28, %v1170_v26 }
 0x304   : > { %v1176_v31 = vmul.f32 0.044715, %v1174_v30  ;;  %v1179_v32 = vadd.f32 %v1177_v29, %v1171_v23 }
 0x306   : > { %v1181_v33 = vmul.f32 0.7978846, %v1179_v32  ;;  %v1178_v34 = vadd.f32 %v1176_v31, %v1170_v26 }
 0x308   : > { %4658 = vtanh.f32 %v1181_v33  ;;  %v1180_v35 = vmul.f32 0.7978846, %v1178_v34 }
 0x30a   : > { %4660 = vtanh.f32 %v1180_v35 }
 0x315   : > { %v4659_v36 = vpop.eup %4658 }
 0x316   : > { %v1185_v37 = vadd.f32 1.0, %v4659_v36 }
 0x317   : > { %v4661_v38 = vpop.eup %4660 }
 0x318   : > { %v1187_v39 = vmul.f32 0.5, %v1185_v37  ;;  %v1184_v40 = vadd.f32 1.0, %v4661_v38 }
 0x31a   : > { %v1189_v41 = vmul.f32 %v1187_v39, %v1171_v23  ;;  %v1186_v42 = vmul.f32 0.5, %v1184_v40 }
 0x31c   : > { %v1191_v43 = vadd.f32 %v1189_v41, %v5048_v45  ;;  %v1188_v44 = vmul.f32 %v1186_v42, %v1170_v26 }
 0x31e   : > { %v1197_v46 = vsel %vm662_vm1, %v1191_v43, 0.0  ;;  %v1190_v47 = vadd.f32 %v1188_v44, %v5051_v48  ;;  %v1239_v48 = vld [vmem:[%s5688_s9 + $0x18] sm:$0xff] }
 0x31f   : > { %1198 = vadd.xlane.f32.xlu1 %v1197_v46  ;;  %4353 = vmatprep.subr.mxu1 %v1239_v48 }
 0x320   : > { %v1194_v49 = vsel %vm658_vm0, %v1190_v47, 0.0  ;;  %4354 = vmatpush3.msra.mxu1 %v1239_v48 }
 0x321   : > { %1195 = vadd.xlane.f32.xlu0 %v1194_v49  ;;  %4355 = vmatprep.subr.mxu1 %v1238_v59 }
 0x322   : > { %4356 = vmatpush3.msra.mxu1 %v1238_v59 }
 0x323   : > { %4357 = vmatprep.subr.mxu1 %v1237_v60 }
 0x324   : > { %4358 = vmatpush3.msra.mxu1 %v1237_v60 }
 0x325   : > { %4359 = vmatprep.subr.mxu1 %v1236_v61 }
 0x326   : > { %4360 = vmatpush3.msra.mxu1 %v1236_v61 }
 0x3a8   : > { %v1199_v50 = vpop.xlane.xlu1 %1198 }
 0x3a9   : > { %v1201_v51 = vmul.f32 0.03125, %v1199_v50 }
 0x3aa   : > { %v1196_v52 = vpop.xlane.xlu0 %1195 }
 0x3ab   : > { %v1203_v53 = vsub.f32 %v1191_v43, %v1201_v51  ;;  %v1200_v54 = vmul.f32 0.03125, %v1196_v52 }
 0x3ad   : > { %v1202_v55 = vsub.f32 %v1190_v47, %v1200_v54  ;;  %v1205_v56 = vmul.f32 %v1203_v53, %v1203_v53 }
 0x3af   : > { %v1209_v57 = vsel %vm662_vm1, %v1205_v56, 0.0  ;;  %v1204_v58 = vmul.f32 %v1202_v55, %v1202_v55 }
 0x3b0   : > { %1210 = vadd.xlane.f32.xlu1 %v1209_v57 }
 0x3b1   : > { %v1206_v45 = vsel %vm658_vm0, %v1204_v58, 0.0 }
 0x3b2   : > { %1207 = vadd.xlane.f32.xlu0 %v1206_v45 }
 0x439   : > { %v1211_v62 = vpop.xlane.xlu1 %1210 }
 0x43a   : > { %v1213_v63 = vmul.f32 0.03125, %v1211_v62 }
 0x43b   : > { %v1208_v0 = vpop.xlane.xlu0 %1207 }
 0x43c   : > { %v1215_v1 = vadd.f32 1e-05, %v1213_v63  ;;  %v1212_v2 = vmul.f32 0.03125, %v1208_v0 }
 0x43e   : > { %4662 = vrsqrt.f32 %v1215_v1  ;;  %v1214_v3 = vadd.f32 1e-05, %v1212_v2 }
 0x440   : > { %4664 = vrsqrt.f32 %v1214_v3 }
 0x44b   : > { %v4663_v4 = vpop.eup %4662 }
 0x44c   : > { %v1219_v6 = vmul.f32 %v4663_v4, %v1203_v53 }
 0x44d   : > { %v4665_v7 = vpop.eup %4664 }
 0x44e   : > { %v1218_v8 = vmul.f32 %v4665_v7, %v1202_v55  ;;  %v1227_v9 = vmul.f32 %v4006_v5, %v1219_v6 }
 0x450   : > { %v1226_v11 = vmul.f32 %v4006_v5, %v1218_v8  ;;  %v5115_v13 = vadd.f32 %v4007_v10, %v1227_v9 }
 0x452   : > { %v5113_v12 = vadd.f32 %v4007_v10, %v1226_v11 }
 0x454   : > { %4361 = vmatprep.mubr.msk.f32.mxu1 %vm658_vm0, %v5113_v12 }
 0x455   : > { %4362 = vmatmul.mubr.msk.f32.vlgmr.msra.gmra.mxu1 %vm658_vm0, %v5115_v13 }
 0x515   : > { %v4363_v15 = vpop.f32.mrf.mxu1 }
 0x516   : > { %v5124_v16 = vadd.f32 %v4363_v15, %v4008_v14 }
 0x517   : > { %v1319_v17 = vpop.f32.mrf.mxu1 }
 0x518   : > { %v5126_v18 = vadd.f32 %v4008_v14, %v1319_v17  ;;  %1334 = vrot.lane.b32.xlu0 %v5124_v16, %s4816_s2  ;;  %v5142_v22 = vmul.f32 0.35355338, %v5124_v16 }
 0x51a   : > { %1332 = vrot.lane.b32.xlu1 %v5126_v18, %s4816_s2  ;;  %v5133_v19 = vmul.f32 0.35355338, %v5126_v18 }
 0x51c   : > { %4368 = vmatprep.mubr.msk.f32.mxu0 %vm1336_vm7, %v5133_v19 }
 0x58a   : > { %v1335_v20 = vpop.permute.xlu0 %1334 }
 0x58b   : > { %4364 = vmatprep.subr.msk.mxu0 %vm1336_vm7, %v1335_v20 }
 0x58c   : > { %4365 = vmatpush3.xpose.msk.msra.mxu0 %vm1336_vm7, %v1335_v20  ;;  %v1333_v21 = vpop.permute.xlu1 %1332 }
 0x58d   : > { %4366 = vmatprep.subr.msk.mxu0 %vm1336_vm7, %v1333_v21 }
 0x590   : > { %4367 = vmatpush3.xpose.msk.msra.mxu0 %vm1336_vm7, %v1333_v21 }
 0x593   : > { %4369 = vmatmul.mubr.msk.f32.vlgmr.msra.gmra.mxu0 %vm1336_vm7, %v5142_v22 }
 0x653   : > { %v4370_v23 = vpop.f32.mrf.mxu0 }
 0x654   : > { %v1427_v24 = vsel %vm1426_vm8, %v4370_v23, -inf }
 0x655   : > { %1428 = vmax.xlane.f32.xlu0 %v1427_v24  ;;  %v1413_v25 = vpop.f32.mrf.mxu0 }
 0x656   : > { %v1423_v26 = vsel %vm1422_vm9, %v1413_v25, -inf }
 0x657   : > { %1424 = vmax.xlane.f32.xlu1 %v1423_v26 }
 0x6de   : > { %v1429_v27 = vpop.xlane.xlu0 %1428 }
 0x6df   : > { %v1431_v28 = vsub.f32 %v4370_v23, %v1429_v27 }
 0x6e0   : > { %v1425_v29 = vpop.xlane.xlu1 %1424 }
 0x6e1   : > { %v1434_v30 = vmul.f32 1.442695, %v1431_v28  ;;  %v1430_v31 = vsub.f32 %v1413_v25, %v1425_v29 }
 0x6e3   : > { %4666 = vpow2.f32 %v1434_v30  ;;  %v1432_v32 = vmul.f32 1.442695, %v1430_v31 }
 0x6e5   : > { %4668 = vpow2.f32 %v1432_v32 }
 0x6f0   : > { %v4667_v33 = vpop.eup %4666 }
 0x6f1   : > { %v1439_v34 = vsel %vm1426_vm8, %v4667_v33, 0.0 }
 0x6f2   : > { %v4669_v35 = vpop.eup %4668  ;;  %1440 = vadd.xlane.f32.xlu1 %v1439_v34 }
 0x6f3   : > { %v1436_v36 = vsel %vm1422_vm9, %v4669_v35, 0.0 }
 0x6f4   : > { %1437 = vadd.xlane.f32.xlu0 %v1436_v36 }
 0x703   : > { %1446 = vrot.lane.b32.xlu1 %v5126_v18, %s4817_s22 }
 0x707   : > { %1540 = vrot.lane.b32.xlu1 %v5124_v16, %s5729_s23 }
 0x70a   : > { %1448 = vrot.lane.b32.xlu0 %v5124_v16, %s4817_s22 }
 0x70b   : > { %1538 = vrot.lane.b32.xlu1 %v5126_v18, %s5729_s23  ;;  %s5758_s23 = smov 80  }
 0x70e   : > { %1534 = vrot.lane.b32.xlu0 %v5133_v19, %s5727_s1 }
 0x70f   : > { %1536 = vrot.lane.b32.xlu1 %v5142_v22, %s5727_s1  ;;  %s5759_s1 = smov 112  }
 0x77b   : > { %v1441_v37 = vpop.xlane.xlu1 %1440 }
 0x77c   : > { %4670 = vrcp.f32 %v1441_v37 }
 0x77d   : > { %v1438_v38 = vpop.xlane.xlu0 %1437 }
 0x77e   : > { %4672 = vrcp.f32 %v1438_v38 }
 0x77f   : > { %v1447_v39 = vpop.permute.xlu1 %1446 }
 0x781   : > { %v1449_v40 = vpop.permute.xlu0 %1448 }
 0x782   : > { %4371 = vmatprep.subr.msk.mxu1 %vm816_vm4, %v1449_v40 }
 0x783   : > { %4372 = vmatpush3.msk.msra.mxu1 %vm816_vm4, %v1449_v40  ;;  %v1541_v41 = vpop.permute.xlu1 %1540 }
 0x784   : > { %4373 = vmatprep.subr.mxu1 %v1447_v39 }
 0x785   : > { %4374 = vmatpush3.msra.mxu1 %v1447_v39  ;;  %v1535_v47 = vpop.permute.xlu0 %1534 }
 0x786   : > { %4378 = vmatprep.subr.msk.mxu1 %vm1336_vm7, %v1541_v41 }
 0x787   : > { %v1539_v49 = vpop.permute.xlu1 %1538 }
 0x789   : > { %v4671_v42 = vpop.eup %4670 }
 0x78a   : > { %v1445_v46 = vmul.f32 %v4671_v42, %v4667_v33 }
 0x78b   : > { %v4673_v43 = vpop.eup %4672  ;;  %v1537_v50 = vpop.permute.xlu1 %1536 }
 0x78c   : > { %v1444_v44 = vmul.f32 %v4673_v43, %v4669_v35 }
 0x78e   : > { %4375 = vmatprep.mubr.msk.f32.mxu1 %vm1422_vm9, %v1444_v44 }
 0x78f   : > { %4376 = vmatmul.mubr.msk.f32.vlgmr.msra.gmra.mxu1 %vm1422_vm9, %v1445_v46 }
 0x790   : > { %4379 = vmatpush3.xpose.msk.msra.mxu1 %vm1336_vm7, %v1541_v41  ;;  %4382 = vmatprep.mubr.msk.f32.mxu1 %vm1336_vm7, %v1535_v47 }
 0x791   : > { %4380 = vmatprep.subr.msk.mxu1 %vm1336_vm7, %v1539_v49 }
 0x794   : > { %4381 = vmatpush3.xpose.msk.msra.mxu1 %vm1336_vm7, %v1539_v49 }
 0x797   : > { %4383 = vmatmul.mubr.msk.f32.vlgmr.msra.gmra.mxu1 %vm1336_vm7, %v1537_v50 }
 0x84f   : > { %v5172_v51 = vpop.f32.mrf.mxu1 }
 0x851   : > { %v5174_v52 = vpop.f32.mrf.mxu1 }
 0x857   : > { %v4384_v53 = vpop.f32.mrf.mxu1 }
 0x858   : > { %v1628_v54 = vsel %vm1426_vm8, %v4384_v53, -inf }
 0x859   : > { %1629 = vmax.xlane.f32.xlu1 %v1628_v54  ;;  %v1616_v55 = vpop.f32.mrf.mxu1 }
 0x85a   : > { %v1625_v56 = vsel %vm1422_vm9, %v1616_v55, -inf }
 0x85b   : > { %1626 = vmax.xlane.f32.xlu0 %v1625_v56 }
 0x86a   : > { %1647 = vrot.lane.b32.xlu1 %v5126_v18, %s5721_s28 }
 0x86e   : > { %1741 = vrot.lane.b32.xlu1 %v5124_v16, %s5725_s0 }
 0x872   : > { %1739 = vrot.lane.b32.xlu1 %v5126_v18, %s5725_s0  ;;  %s5761_s0 = smov 48  }
 0x876   : > { %1737 = vrot.lane.b32.xlu1 %v5142_v22, %s5723_s26 }
 0x8e2   : > { %v1630_v57 = vpop.xlane.xlu1 %1629 }
 0x8e3   : > { %v1632_v58 = vsub.f32 %v4384_v53, %v1630_v57 }
 0x8e4   : > { %v1627_v45 = vpop.xlane.xlu0 %1626 }
 0x8e5   : > { %v1635_v48 = vmul.f32 1.442695, %v1632_v58  ;;  %v1631_v59 = vsub.f32 %v1616_v55, %v1627_v45 }
 0x8e6   : > { %v1648_v3 = vpop.permute.xlu1 %1647 }
 0x8e7   : > { %4674 = vpow2.f32 %v1635_v48  ;;  %v1633_v60 = vmul.f32 1.442695, %v1631_v59 }
 0x8e9   : > { %4676 = vpow2.f32 %v1633_v60 }
 0x8ea   : > { %v1742_v5 = vpop.permute.xlu1 %1741 }
 0x8ee   : > { %v1740_v11 = vpop.permute.xlu1 %1739 }
 0x8f2   : > { %v1738_v14 = vpop.permute.xlu1 %1737 }
 0x8f4   : > { %v4675_v61 = vpop.eup %4674 }
 0x8f5   : > { %v1640_v62 = vsel %vm1426_vm8, %v4675_v61, 0.0 }
 0x8f6   : > { %v4677_v63 = vpop.eup %4676  ;;  %1641 = vadd.xlane.f32.xlu0 %v1640_v62 }
 0x8f7   : > { %v1637_v0 = vsel %vm1422_vm9, %v4677_v63, 0.0 }
 0x8fa   : > { %1638 = vadd.xlane.f32.xlu0 %v1637_v0 }
 0x910   : > { %1649 = vrot.lane.b32.xlu0 %v5124_v16, %s5721_s28  ;;  %s5760_s28 = smov 56  }
 0x914   : > { %1735 = vrot.lane.b32.xlu0 %v5133_v19, %s5723_s26  ;;  %s5762_s26 = smov 72  }
 0x97f   : > { %v1642_v1 = vpop.xlane.xlu0 %1641 }
 0x980   : > { %4678 = vrcp.f32 %v1642_v1 }
 0x983   : > { %v1639_v2 = vpop.xlane.xlu0 %1638 }
 0x984   : > { %4680 = vrcp.f32 %v1639_v2 }
 0x987   : > { %v1650_v4 = vpop.permute.xlu0 %1649 }
 0x988   : > { %4385 = vmatprep.subr.msk.mxu0 %vm816_vm4, %v1650_v4 }
 0x989   : > { %4386 = vmatpush3.msk.msra.mxu0 %vm816_vm4, %v1650_v4 }
 0x98a   : > { %4387 = vmatprep.subr.mxu0 %v1648_v3 }
 0x98b   : > { %4388 = vmatpush3.msra.mxu0 %v1648_v3  ;;  %v1736_v10 = vpop.permute.xlu0 %1735 }
 0x98c   : > { %4392 = vmatprep.subr.msk.mxu0 %vm1336_vm7, %v1742_v5 }
 0x98d   : > { %v4679_v6 = vpop.eup %4678 }
 0x98e   : > { %v1646_v9 = vmul.f32 %v4679_v6, %v4675_v61  ;;  %v2171_v6 = vld [vmem:[%s5690_s11 + $0x10] sm:$0xff] }
 0x991   : > { %v4681_v7 = vpop.eup %4680 }
 0x992   : > { %v1645_v8 = vmul.f32 %v4681_v7, %v4677_v63  ;;  %v2170_v7 = vld [vmem:[%s5690_s11 + $0x8] sm:$0xff] }
 0x994   : > { %4389 = vmatprep.mubr.msk.f32.mxu0 %vm1422_vm9, %v1645_v8  ;;  %v2169_v8 = vld [vmem:[%s5690_s11] sm:$0xff] }
 0x995   : > { %4390 = vmatmul.mubr.msk.f32.vlgmr.msra.gmra.mxu0 %vm1422_vm9, %v1646_v9 }
 0x996   : > { %4393 = vmatpush3.xpose.msk.msra.mxu0 %vm1336_vm7, %v1742_v5  ;;  %4396 = vmatprep.mubr.msk.f32.mxu0 %vm1336_vm7, %v1736_v10 }
 0x997   : > { %4394 = vmatprep.subr.msk.mxu0 %vm1336_vm7, %v1740_v11 }
 0x99a   : > { %4395 = vmatpush3.xpose.msk.msra.mxu0 %vm1336_vm7, %v1740_v11 }
 0x99d   : > { %4397 = vmatmul.mubr.msk.f32.vlgmr.msra.gmra.mxu0 %vm1336_vm7, %v1738_v14 }
 0xa55   : > { %v5202_v15 = vpop.f32.mrf.mxu0 }
 0xa57   : > { %v5204_v17 = vpop.f32.mrf.mxu0 }
 0xa5d   : > { %v4398_v20 = vpop.f32.mrf.mxu0 }
 0xa5e   : > { %v1829_v21 = vsel %vm1426_vm8, %v4398_v20, -inf }
 0xa5f   : > { %1830 = vmax.xlane.f32.xlu1 %v1829_v21  ;;  %v1817_v23 = vpop.f32.mrf.mxu0 }
 0xa60   : > { %v1826_v24 = vsel %vm1422_vm9, %v1817_v23, -inf }
 0xa61   : > { %1827 = vmax.xlane.f32.xlu0 %v1826_v24 }
 0xa70   : > { %1848 = vrot.lane.b32.xlu1 %v5126_v18, %s5713_s29 }
 0xa74   : > { %1942 = vrot.lane.b32.xlu1 %v5124_v16, %s5711_s4 }
 0xa78   : > { %1940 = vrot.lane.b32.xlu1 %v5126_v18, %s5711_s4  ;;  %s5717_s4 = smov 8  }
 0xa7c   : > { %1938 = vrot.lane.b32.xlu1 %v5142_v22, %s5709_s30 }
 0xae8   : > { %v1831_v25 = vpop.xlane.xlu1 %1830 }
 0xae9   : > { %v1833_v26 = vsub.f32 %v4398_v20, %v1831_v25 }
 0xaea   : > { %v1828_v27 = vpop.xlane.xlu0 %1827 }
 0xaeb   : > { %v1836_v28 = vmul.f32 1.442695, %v1833_v26  ;;  %v1832_v29 = vsub.f32 %v1817_v23, %v1828_v27 }
 0xaec   : > { %v1849_v36 = vpop.permute.xlu1 %1848 }
 0xaed   : > { %4682 = vpow2.f32 %v1836_v28  ;;  %v1834_v30 = vmul.f32 1.442695, %v1832_v29 }
 0xaef   : > { %4684 = vpow2.f32 %v1834_v30 }
 0xaf0   : > { %v1943_v38 = vpop.permute.xlu1 %1942 }
 0xaf4   : > { %v1941_v43 = vpop.permute.xlu1 %1940 }
 0xaf8   : > { %v1939_v44 = vpop.permute.xlu1 %1938 }
 0xafa   : > { %v4683_v31 = vpop.eup %4682 }
 0xafb   : > { %v1841_v32 = vsel %vm1426_vm8, %v4683_v31, 0.0 }
 0xafc   : > { %v4685_v33 = vpop.eup %4684  ;;  %1842 = vadd.xlane.f32.xlu0 %v1841_v32 }
 0xafd   : > { %v1838_v34 = vsel %vm1422_vm9, %v4685_v33, 0.0 }
 0xb00   : > { %1839 = vadd.xlane.f32.xlu0 %v1838_v34 }
 0xb16   : > { %1850 = vrot.lane.b32.xlu0 %v5124_v16, %s5713_s29  ;;  %s5715_s29 = smov 16  }
 0xb1a   : > { %1936 = vrot.lane.b32.xlu0 %v5133_v19, %s5709_s30  ;;  %s5719_s30 = smov 40  }
 0xb85   : > { %v1843_v22 = vpop.xlane.xlu0 %1842 }
 0xb86   : > { %4686 = vrcp.f32 %v1843_v22 }
 0xb89   : > { %v1840_v35 = vpop.xlane.xlu0 %1839 }
 0xb8a   : > { %4688 = vrcp.f32 %v1840_v35 }
 0xb8d   : > { %v1851_v37 = vpop.permute.xlu0 %1850 }
 0xb8e   : > { %4399 = vmatprep.subr.msk.mxu1 %vm816_vm4, %v1851_v37 }
 0xb8f   : > { %4400 = vmatpush3.msk.msra.mxu1 %vm816_vm4, %v1851_v37 }
 0xb90   : > { %4401 = vmatprep.subr.mxu1 %v1849_v36 }
 0xb91   : > { %4402 = vmatpush3.msra.mxu1 %v1849_v36  ;;  %v1937_v19 = vpop.permute.xlu0 %1936 }
 0xb92   : > { %4406 = vmatprep.subr.msk.mxu1 %vm1336_vm7, %v1943_v38 }
 0xb93   : > { %v4687_v39 = vpop.eup %4686 }
 0xb94   : > { %v1847_v42 = vmul.f32 %v4687_v39, %v4683_v31 }
 0xb97   : > { %v4689_v40 = vpop.eup %4688 }
 0xb98   : > { %v1846_v41 = vmul.f32 %v4689_v40, %v4685_v33 }
 0xb9a   : > { %4403 = vmatprep.mubr.msk.f32.mxu1 %vm1422_vm9, %v1846_v41 }
 0xb9b   : > { %4404 = vmatmul.mubr.msk.f32.vlgmr.msra.gmra.mxu1 %vm1422_vm9, %v1847_v42 }
 0xb9c   : > { %4407 = vmatpush3.xpose.msk.msra.mxu1 %vm1336_vm7, %v1943_v38  ;;  %4410 = vmatprep.mubr.msk.f32.mxu1 %vm1336_vm7, %v1937_v19 }
 0xb9d   : > { %4408 = vmatprep.subr.msk.mxu1 %vm1336_vm7, %v1941_v43 }
 0xba0   : > { %4409 = vmatpush3.xpose.msk.msra.mxu1 %vm1336_vm7, %v1941_v43  ;;  %v2309_v43 = vld [vmem:[%s5694_s15 + $0x10] sm:$0xff] }
 0xba3   : > { %4411 = vmatmul.mubr.msk.f32.vlgmr.msra.gmra.mxu1 %vm1336_vm7, %v1939_v44  ;;  %v2308_v44 = vld [vmem:[%s5694_s15 + $0x8] sm:$0xff] }
 0xc5b   : > { %v4405_v46 = vpop.f32.mrf.mxu1 }
 0xc5d   : > { %v1927_v47 = vpop.f32.mrf.mxu1 }
 0xc63   : > { %v4412_v49 = vpop.f32.mrf.mxu1 }
 0xc64   : > { %v2030_v50 = vsel %vm1426_vm8, %v4412_v49, -inf }
 0xc65   : > { %2031 = vmax.xlane.f32.xlu1 %v2030_v50  ;;  %v2018_v53 = vpop.f32.mrf.mxu1 }
 0xc66   : > { %v2027_v54 = vsel %vm1422_vm9, %v2018_v53, -inf }
 0xc67   : > { %2028 = vmax.xlane.f32.xlu0 %v2027_v54 }
 0xc76   : > { %2049 = vrot.lane.b32.xlu1 %v5126_v18, %s5719_s30 }
 0xc7a   : > { %2139 = vrot.lane.b32.xlu1 %v5204_v17, %s5717_s4 }
 0xc7e   : > { %2141 = vrot.lane.b32.xlu1 %v5202_v15, %s5717_s4  ;;  %s5763_s4 = smov 104  }
 0xc82   : > { %2149 = vrot.lane.b32.xlu1 %v4405_v46, %s5715_s29  ;;  %v2307_v46 = vld [vmem:[%s5694_s15] sm:$0xff] }
 0xcee   : > { %v2032_v55 = vpop.xlane.xlu1 %2031 }
 0xcef   : > { %v2034_v56 = vsub.f32 %v4412_v49, %v2032_v55 }
 0xcf0   : > { %v2029_v57 = vpop.xlane.xlu0 %2028 }
 0xcf1   : > { %v2037_v58 = vmul.f32 1.442695, %v2034_v56  ;;  %v2033_v45 = vsub.f32 %v2018_v53, %v2029_v57  ;;  %v4042_v57 = vld [vmem:[%s5692_s13] ss:$0 sm:$0xff] }
 0xcf2   : > { %v2050_v1 = vpop.permute.xlu1 %2049 }
 0xcf3   : > { %4690 = vpow2.f32 %v2037_v58  ;;  %v2035_v48 = vmul.f32 1.442695, %v2033_v45  ;;  %v4043_v45 = vld [vmem:[%s5693_s14] ss:$0 sm:$0xff] }
 0xcf5   : > { %4692 = vpow2.f32 %v2035_v48 }
 0xcf6   : > { %v2140_v11 = vpop.permute.xlu1 %2139 }
 0xcf7   : > { %v2161_v20 = vsel %vm1336_vm7, %v5174_v52, %v2140_v11  ;;  %v4039_v52 = vld [vmem:[%s5691_s12] ss:$0 sm:$0xff]  ;;  %v2419_v11 = vld [vmem:[%s5696_s17 + $0x10] sm:$0xff] }
 0xcfa   : > { %v2142_v14 = vpop.permute.xlu1 %2141 }
 0xcfb   : > { %v2162_v23 = vsel %vm1336_vm7, %v5172_v51, %v2142_v14  ;;  %v2418_v14 = vld [vmem:[%s5696_s17 + $0x8] sm:$0xff] }
 0xcfe   : > { %v2150_v15 = vpop.permute.xlu1 %2149 }
 0xcff   : > { %v2165_v26 = vsel %vm2163_vm10, %v2162_v23, %v2150_v15  ;;  %v2417_v15 = vld [vmem:[%s5696_s17] sm:$0xff] }
 0xd00   : > { %v4691_v59 = vpop.eup %4690 }
 0xd01   : > { %v2042_v18 = vsel %vm1426_vm8, %v4691_v59, 0.0 }
 0xd02   : > { %v4693_v60 = vpop.eup %4692  ;;  %2043 = vadd.xlane.f32.xlu0 %v2042_v18 }
 0xd03   : > { %v2039_v61 = vsel %vm1422_vm9, %v4693_v60, 0.0 }
 0xd06   : > { %2040 = vadd.xlane.f32.xlu0 %v2039_v61 }
 0xd1c   : > { %2051 = vrot.lane.b32.xlu0 %v5124_v16, %s5719_s30  ;;  %v2172_v16 = vld [vmem:[%s5690_s11 + $0x18] sm:$0xff]  ;;  %s5765_s30 = smov 8  }
 0xd20   : > { %2147 = vrot.lane.b32.xlu0 %v1927_v47, %s5715_s29  ;;  %s5731_s29 = smov 24  }
 0xd8b   : > { %v2044_v62 = vpop.xlane.xlu0 %2043 }
 0xd8c   : > { %4694 = vrcp.f32 %v2044_v62 }
 0xd8f   : > { %v2041_v63 = vpop.xlane.xlu0 %2040 }
 0xd90   : > { %4696 = vrcp.f32 %v2041_v63  ;;  %v2432_v63 = vld [vmem:[%s5696_s17 + $0x78] sm:$0xff] }
 0xd93   : > { %v2052_v0 = vpop.permute.xlu0 %2051 }
 0xd94   : > { %4413 = vmatprep.subr.msk.mxu0 %vm816_vm4, %v2052_v0 }
 0xd95   : > { %4414 = vmatpush3.msk.msra.mxu0 %vm816_vm4, %v2052_v0  ;;  %v2431_v0 = vld [vmem:[%s5696_s17 + $0x70] sm:$0xff] }
 0xd96   : > { %4415 = vmatprep.subr.mxu0 %v2050_v1 }
 0xd97   : > { %4416 = vmatpush3.msra.mxu0 %v2050_v1  ;;  %v2148_v17 = vpop.permute.xlu0 %2147  ;;  %v2430_v1 = vld [vmem:[%s5696_s17 + $0x68] sm:$0xff] }
 0xd98   : > { %4420 = vmatprep.subr.mxu0 %v2172_v16  ;;  %v2164_v24 = vsel %vm2163_vm10, %v2161_v20, %v2148_v17  ;;  %v4044_v17 = vld [vmem:[%s5695_s16] ss:$0 sm:$0xff] }
 0xd99   : > { %v4695_v2 = vpop.eup %4694 }
 0xd9a   : > { %v2048_v5 = vmul.f32 %v4695_v2, %v4691_v59  ;;  %v2429_v2 = vld [vmem:[%s5696_s17 + $0x60] sm:$0xff] }
 0xd9d   : > { %v4697_v3 = vpop.eup %4696 }
 0xd9e   : > { %v2047_v4 = vmul.f32 %v4697_v3, %v4693_v60  ;;  %v2428_v3 = vld [vmem:[%s5696_s17 + $0x58] sm:$0xff] }
 0xda0   : > { %4417 = vmatprep.mubr.msk.f32.mxu0 %vm1422_vm9, %v2047_v4  ;;  %v2427_v4 = vld [vmem:[%s5696_s17 + $0x50] sm:$0xff] }
 0xda1   : > { %4418 = vmatmul.mubr.msk.f32.vlgmr.msra.gmra.mxu0 %vm1422_vm9, %v2048_v5  ;;  %v2426_v5 = vld [vmem:[%s5696_s17 + $0x48] sm:$0xff] }
 0xda2   : > { %4421 = vmatpush3.msra.mxu0 %v2172_v16  ;;  %v2425_v16 = vld [vmem:[%s5696_s17 + $0x40] sm:$0xff] }
 0xda3   : > { %4422 = vmatprep.subr.mxu0 %v2171_v6 }
 0xda4   : > { %4423 = vmatpush3.msra.mxu0 %v2171_v6  ;;  %v2424_v6 = vld [vmem:[%s5696_s17 + $0x38] sm:$0xff] }
 0xda5   : > { %4424 = vmatprep.subr.mxu0 %v2170_v7 }
 0xda6   : > { %4425 = vmatpush3.msra.mxu0 %v2170_v7  ;;  %v2423_v7 = vld [vmem:[%s5696_s17 + $0x30] sm:$0xff] }
 0xda7   : > { %4426 = vmatprep.subr.mxu0 %v2169_v8 }
 0xda8   : > { %4427 = vmatpush3.msra.mxu0 %v2169_v8  ;;  %v2422_v8 = vld [vmem:[%s5696_s17 + $0x28] sm:$0xff] }
 0xda9   : > { %4442 = vmatprep.subr.mxu0 %v2432_v63 }
 0xe61   : > { %v4419_v9 = vpop.f32.mrf.mxu0 }
 0xe62   : > { %2157 = vrot.lane.b32.xlu1 %v4419_v9, %s5731_s29  ;;  %v2421_v9 = vld [vmem:[%s5696_s17 + $0x20] sm:$0xff] }
 0xe63   : > { %v2128_v10 = vpop.f32.mrf.mxu0 }
 0xe64   : > { %2155 = vrot.lane.b32.xlu0 %v2128_v10, %s5731_s29  ;;  %v2420_v10 = vld [vmem:[%s5696_s17 + $0x18] sm:$0xff]  ;;  %s5764_s29 = smov 40  }
 0xed4   : > { %v2158_v21 = vpop.permute.xlu1 %2157 }
 0xed5   : > { %v2168_v28 = vsel %vm2166_vm11, %v2165_v26, %v2158_v21 }
 0xed6   : > { %v2156_v25 = vpop.permute.xlu0 %2155 }
 0xed7   : > { %v2167_v27 = vsel %vm2166_vm11, %v2164_v24, %v2156_v25 }
 0xed8   : > { %4428 = vmatprep.mubr.msk.f32.mxu0 %vm658_vm0, %v2167_v27 }
 0xed9   : > { %4429 = vmatmul.mubr.msk.f32.vlgmr.msra.gmra.mxu0 %vm658_vm0, %v2168_v28 }
 0xeda   : > { %4443 = vmatpush3.msra.mxu0 %v2432_v63 }
 0xedb   : > { %4444 = vmatprep.subr.mxu0 %v2431_v0 }
 0xedc   : > { %4445 = vmatpush3.msra.mxu0 %v2431_v0 }
 0xedd   : > { %4446 = vmatprep.subr.mxu0 %v2430_v1 }
 0xede   : > { %4447 = vmatpush3.msra.mxu0 %v2430_v1 }
 0xedf   : > { %4448 = vmatprep.subr.mxu0 %v2429_v2 }
 0xee0   : > { %4449 = vmatpush3.msra.mxu0 %v2429_v2 }
 0xee1   : > { %4450 = vmatprep.subr.mxu0 %v2428_v3 }
 0xee2   : > { %4451 = vmatpush3.msra.mxu0 %v2428_v3 }
 0xee3   : > { %4452 = vmatprep.subr.mxu0 %v2427_v4 }
 0xee4   : > { %4453 = vmatpush3.msra.mxu0 %v2427_v4  ;;  %v4048_v4 = vld [vmem:[%s5698_s19] ss:$0 sm:$0xff] }
 0xee5   : > { %4454 = vmatprep.subr.mxu0 %v2426_v5 }
 0xee6   : > { %4455 = vmatpush3.msra.mxu0 %v2426_v5 }
 0xee7   : > { %4456 = vmatprep.subr.mxu0 %v2425_v16 }
 0xee8   : > { %4457 = vmatpush3.msra.mxu0 %v2425_v16 }
 0xee9   : > { %4458 = vmatprep.subr.mxu0 %v2424_v6 }
 0xeea   : > { %4459 = vmatpush3.msra.mxu0 %v2424_v6 }
 0xeeb   : > { %4460 = vmatprep.subr.mxu0 %v2423_v7 }
 0xeec   : > { %4461 = vmatpush3.msra.mxu0 %v2423_v7 }
 0xeed   : > { %4462 = vmatprep.subr.mxu0 %v2422_v8 }
 0xeee   : > { %4463 = vmatpush3.msra.mxu0 %v2422_v8  ;;  %v4049_v8 = vld [vmem:[%s5699_s20] ss:$0 sm:$0xff] }
 0xeef   : > { %4464 = vmatprep.subr.mxu0 %v2421_v9 }
 0xef0   : > { %4465 = vmatpush3.msra.mxu0 %v2421_v9 }
 0xef1   : > { %4466 = vmatprep.subr.mxu0 %v2420_v10 }
 0xef2   : > { %4467 = vmatpush3.msra.mxu0 %v2420_v10 }
 0xef3   : > { %4468 = vmatprep.subr.mxu0 %v2419_v11 }
 0xef4   : > { %4469 = vmatpush3.msra.mxu0 %v2419_v11 }
 0xef5   : > { %4470 = vmatprep.subr.mxu0 %v2418_v14 }
 0xef6   : > { %4471 = vmatpush3.msra.mxu0 %v2418_v14  ;;  %v4055_v14 = vld [vmem:[%s5689_s10 + $0x1] ss:$0 sm:$0xff] }
 0xef7   : > { %4472 = vmatprep.subr.mxu0 %v2417_v15 }
 0xef8   : > { %4473 = vmatpush3.msra.mxu0 %v2417_v15 }
 0xf99   : > { %v4430_v29 = vpop.f32.mrf.mxu0 }
 0xf9a   : > { %v2258_v30 = vadd.f32 %v4430_v29, %v4039_v52 }
 0xf9b   : > { %v2252_v51 = vpop.f32.mrf.mxu0 }
 0xf9c   : > { %v2253_v31 = vadd.f32 %v4039_v52, %v2252_v51  ;;  %v2262_v32 = vadd.f32 %v2258_v30, %v5115_v13 }
 0xf9e   : > { %v2268_v33 = vsel %vm662_vm1, %v2262_v32, 0.0  ;;  %v2261_v34 = vadd.f32 %v2253_v31, %v5113_v12  ;;  %v2310_v12 = vld [vmem:[%s5694_s15 + $0x18] sm:$0xff] }
 0xf9f   : > { %2269 = vadd.xlane.f32.xlu1 %v2268_v33  ;;  %4431 = vmatprep.subr.mxu1 %v2310_v12 }
 0xfa0   : > { %v2265_v22 = vsel %vm658_vm0, %v2261_v34, 0.0  ;;  %4432 = vmatpush3.msra.mxu1 %v2310_v12 }
 0xfa1   : > { %2266 = vadd.xlane.f32.xlu0 %v2265_v22  ;;  %4433 = vmatprep.subr.mxu1 %v2309_v43 }
 0xfa2   : > { %4434 = vmatpush3.msra.mxu1 %v2309_v43 }
 0xfa3   : > { %4435 = vmatprep.subr.mxu1 %v2308_v44 }
 0xfa4   : > { %4436 = vmatpush3.msra.mxu1 %v2308_v44 }
 0xfa5   : > { %4437 = vmatprep.subr.mxu1 %v2307_v46 }
 0xfa6   : > { %4438 = vmatpush3.msra.mxu1 %v2307_v46 }
0x1028   : > { %v2270_v35 = vpop.xlane.xlu1 %2269 }
0x1029   : > { %v2272_v36 = vmul.f32 0.03125, %v2270_v35 }
0x102a   : > { %v2267_v37 = vpop.xlane.xlu0 %2266 }
0x102b   : > { %v2271_v38 = vmul.f32 0.03125, %v2267_v37  ;;  %v2274_v39 = vsub.f32 %v2262_v32, %v2272_v36 }
0x102d   : > { %v2273_v40 = vsub.f32 %v2261_v34, %v2271_v38  ;;  %v2276_v19 = vmul.f32 %v2274_v39, %v2274_v39 }
0x102f   : > { %v2275_v41 = vmul.f32 %v2273_v40, %v2273_v40  ;;  %v2280_v13 = vsel %vm662_vm1, %v2276_v19, 0.0 }
0x1031   : > { %v2277_v42 = vsel %vm658_vm0, %v2275_v41, 0.0 }
0x1032   : > { %2278 = vadd.xlane.f32.xlu0 %v2277_v42 }
0x1036   : > { %2281 = vadd.xlane.f32.xlu0 %v2280_v13 }
0x10bb   : > { %v2279_v47 = vpop.xlane.xlu0 %2278 }
0x10bc   : > { %v2283_v49 = vmul.f32 0.03125, %v2279_v47 }
0x10be   : > { %v2285_v50 = vadd.f32 1e-05, %v2283_v49 }
0x10bf   : > { %v2282_v53 = vpop.xlane.xlu0 %2281 }
0x10c0   : > { %4698 = vrsqrt.f32 %v2285_v50  ;;  %v2284_v54 = vmul.f32 0.03125, %v2282_v53 }
0x10c2   : > { %v2286_v55 = vadd.f32 1e-05, %v2284_v54 }
0x10c4   : > { %4700 = vrsqrt.f32 %v2286_v55 }
0x10cd   : > { %v4699_v56 = vpop.eup %4698 }
0x10ce   : > { %v2289_v58 = vmul.f32 %v4699_v56, %v2273_v40  ;;  %v4047_v40 = vld [vmem:[%s5697_s18] ss:$0 sm:$0xff] }
0x10d0   : > { %v2297_v48 = vmul.f32 %v4042_v57, %v2289_v58 }
0x10d1   : > { %v4701_v59 = vpop.eup %4700 }
0x10d2   : > { %v2290_v18 = vmul.f32 %v4701_v59, %v2274_v39  ;;  %v5301_v60 = vadd.f32 %v4043_v45, %v2297_v48  ;;  %v4053_v48 = vld [vmem:[%s5688_s9 + $0x38] sm:$0xff]  ;;  %v4052_v59 = vld [vmem:[%s5688_s9 + $0x30] sm:$0xff] }
0x10d3   : > { %4477 = vmatprep.subr.mxu1 %v4053_v48 }
0x10d4   : > { %v2298_v61 = vmul.f32 %v4042_v57, %v2290_v18  ;;  %4439 = vmatprep.mubr.msk.f32.mxu1 %vm658_vm0, %v5301_v60  ;;  %v4051_v18 = vld [vmem:[%s5688_s9 + $0x28] sm:$0xff] }
0x10d6   : > { %v5305_v62 = vadd.f32 %v4043_v45, %v2298_v61 }
0x10d8   : > { %4440 = vmatmul.mubr.msk.f32.vlgmr.msra.gmra.mxu1 %vm658_vm0, %v5305_v62 }
0x10d9   : > { %4478 = vmatpush3.msra.mxu1 %v4053_v48 }
0x10da   : > { %4479 = vmatprep.subr.mxu1 %v4052_v59 }
0x10db   : > { %4480 = vmatpush3.msra.mxu1 %v4052_v59 }
0x10dc   : > { %4481 = vmatprep.subr.mxu1 %v4051_v18 }
0x10dd   : > { %4482 = vmatpush3.msra.mxu1 %v4051_v18 }
0x1198   : > { %v4441_v20 = vpop.f32.mrf.mxu1 }
0x1199   : > { %v2396_v21 = vadd.f32 %v4441_v20, %v4044_v17 }
0x119a   : > { %v2390_v23 = vpop.f32.mrf.mxu1 }
0x119b   : > { %v2400_v24 = vmul.f32 %v2396_v21, %v2396_v21  ;;  %v2391_v25 = vadd.f32 %v4044_v17, %v2390_v23 }
0x119d   : > { %v2402_v26 = vmul.f32 %v2400_v24, %v2396_v21  ;;  %v2399_v27 = vmul.f32 %v2391_v25, %v2391_v25 }
0x119f   : > { %v2404_v28 = vmul.f32 0.044715, %v2402_v26  ;;  %v2401_v52 = vmul.f32 %v2399_v27, %v2391_v25 }
0x11a1   : > { %v2406_v29 = vadd.f32 %v2404_v28, %v2396_v21  ;;  %v2403_v30 = vmul.f32 0.044715, %v2401_v52 }
0x11a3   : > { %v2408_v51 = vmul.f32 0.7978846, %v2406_v29  ;;  %v2405_v31 = vadd.f32 %v2403_v30, %v2391_v25 }
0x11a5   : > { %4702 = vtanh.f32 %v2408_v51  ;;  %v2407_v32 = vmul.f32 0.7978846, %v2405_v31 }
0x11a7   : > { %4704 = vtanh.f32 %v2407_v32 }
0x11b2   : > { %v4703_v33 = vpop.eup %4702 }
0x11b3   : > { %v2412_v34 = vadd.f32 1.0, %v4703_v33 }
0x11b4   : > { %v4705_v22 = vpop.eup %4704 }
0x11b5   : > { %v2411_v35 = vadd.f32 1.0, %v4705_v22  ;;  %v2414_v36 = vmul.f32 0.5, %v2412_v34 }
0x11b7   : > { %v2413_v37 = vmul.f32 0.5, %v2411_v35  ;;  %v2416_v39 = vmul.f32 %v2414_v36, %v2396_v21 }
0x11b9   : > { %v2415_v38 = vmul.f32 %v2413_v37, %v2391_v25 }
0x11bb   : > { %4474 = vmatprep.mubr.f32.mxu0 %v2415_v38 }
0x11bc   : > { %4475 = vmatmul.mubr.f32.vlgmr.msra.gmra.mxu0 %v2416_v39 }
0x127c   : > { %v4476_v41 = vpop.f32.mrf.mxu0 }
0x127d   : > { %v2512_v42 = vadd.f32 %v4476_v41, %v4047_v40 }
0x127e   : > { %v2506_v19 = vpop.f32.mrf.mxu0 }
0x127f   : > { %v2507_v13 = vadd.f32 %v4047_v40, %v2506_v19  ;;  %v2516_v12 = vadd.f32 %v2512_v42, %v5305_v62 }
0x1281   : > { %v2522_v43 = vsel %vm662_vm1, %v2516_v12, 0.0  ;;  %v2515_v44 = vadd.f32 %v2507_v13, %v5301_v60  ;;  %v4050_v60 = vld [vmem:[%s5688_s9 + $0x20] sm:$0xff] }
0x1282   : > { %2523 = vadd.xlane.f32.xlu1 %v2522_v43  ;;  %4483 = vmatprep.subr.mxu1 %v4050_v60 }
0x1283   : > { %v2519_v46 = vsel %vm658_vm0, %v2515_v44, 0.0  ;;  %4484 = vmatpush3.msra.mxu1 %v4050_v60 }
0x1284   : > { %2520 = vadd.xlane.f32.xlu0 %v2519_v46 }
0x130b   : > { %v2524_v47 = vpop.xlane.xlu1 %2523 }
0x130c   : > { %v2526_v49 = vmul.f32 0.03125, %v2524_v47 }
0x130d   : > { %v2521_v50 = vpop.xlane.xlu0 %2520 }
0x130e   : > { %v2528_v53 = vsub.f32 %v2516_v12, %v2526_v49  ;;  %v2525_v54 = vmul.f32 0.03125, %v2521_v50 }
0x1310   : > { %v2527_v55 = vsub.f32 %v2515_v44, %v2525_v54  ;;  %v2530_v56 = vmul.f32 %v2528_v53, %v2528_v53 }
0x1312   : > { %v2534_v57 = vsel %vm662_vm1, %v2530_v56, 0.0  ;;  %v2529_v58 = vmul.f32 %v2527_v55, %v2527_v55 }
0x1313   : > { %2535 = vadd.xlane.f32.xlu1 %v2534_v57 }
0x1314   : > { %v2531_v45 = vsel %vm658_vm0, %v2529_v58, 0.0 }
0x1315   : > { %2532 = vadd.xlane.f32.xlu0 %v2531_v45 }
0x139c   : > { %v2536_v61 = vpop.xlane.xlu1 %2535 }
0x139d   : > { %v2538_v62 = vmul.f32 0.03125, %v2536_v61 }
0x139e   : > { %v2533_v63 = vpop.xlane.xlu0 %2532 }
0x139f   : > { %v2540_v0 = vadd.f32 1e-05, %v2538_v62  ;;  %v2537_v1 = vmul.f32 0.03125, %v2533_v63 }
0x13a1   : > { %4706 = vrsqrt.f32 %v2540_v0  ;;  %v2539_v2 = vadd.f32 1e-05, %v2537_v1 }
0x13a3   : > { %4708 = vrsqrt.f32 %v2539_v2 }
0x13ae   : > { %v4707_v3 = vpop.eup %4706 }
0x13af   : > { %v2544_v5 = vmul.f32 %v4707_v3, %v2528_v53 }
0x13b0   : > { %v4709_v16 = vpop.eup %4708 }
0x13b1   : > { %v2543_v6 = vmul.f32 %v4709_v16, %v2527_v55  ;;  %v2552_v7 = vmul.f32 %v4048_v4, %v2544_v5 }
0x13b3   : > { %v2551_v9 = vmul.f32 %v4048_v4, %v2543_v6  ;;  %v5389_v11 = vadd.f32 %v4049_v8, %v2552_v7 }
0x13b5   : > { %v5387_v10 = vadd.f32 %v4049_v8, %v2551_v9 }
0x13b7   : > { %4485 = vmatprep.mubr.msk.f32.mxu1 %vm658_vm0, %v5387_v10 }
0x13b8   : > { %4486 = vmatmul.mubr.msk.f32.vlgmr.msra.gmra.mxu1 %vm658_vm0, %v5389_v11 }
0x1478   : > { %v4487_v15 = vpop.f32.mrf.mxu1 }
0x1479   : > { %v5398_v17 = vadd.f32 %v4487_v15, %v4055_v14 }
0x147a   : > { %v2646_v20 = vpop.f32.mrf.mxu1 }
0x147b   : > { %v5400_v21 = vadd.f32 %v4055_v14, %v2646_v20  ;;  %2661 = vrot.lane.b32.xlu0 %v5398_v17, %s4816_s2  ;;  %v5416_v26 = vmul.f32 0.35355338, %v5398_v17 }
0x147d   : > { %2659 = vrot.lane.b32.xlu1 %v5400_v21, %s4816_s2  ;;  %v5407_v23 = vmul.f32 0.35355338, %v5400_v21  ;;  %s5756_s2 = smov 88  }
0x147f   : > { %4492 = vmatprep.mubr.msk.f32.mxu1 %vm1336_vm7, %v5407_v23 }
0x14ed   : > { %v2662_v24 = vpop.permute.xlu0 %2661 }
0x14ee   : > { %4488 = vmatprep.subr.msk.mxu1 %vm1336_vm7, %v2662_v24 }
0x14ef   : > { %4489 = vmatpush3.xpose.msk.msra.mxu1 %vm1336_vm7, %v2662_v24  ;;  %v2660_v25 = vpop.permute.xlu1 %2659 }
0x14f0   : > { %4490 = vmatprep.subr.msk.mxu1 %vm1336_vm7, %v2660_v25 }
0x14f3   : > { %4491 = vmatpush3.xpose.msk.msra.mxu1 %vm1336_vm7, %v2660_v25 }
0x14f6   : > { %4493 = vmatmul.mubr.msk.f32.vlgmr.msra.gmra.mxu1 %vm1336_vm7, %v5416_v26 }
0x15b6   : > { %v4494_v27 = vpop.f32.mrf.mxu1 }
0x15b7   : > { %v2751_v28 = vsel %vm1426_vm8, %v4494_v27, -inf }
0x15b8   : > { %2752 = vmax.xlane.f32.xlu0 %v2751_v28  ;;  %v2739_v52 = vpop.f32.mrf.mxu1 }
0x15b9   : > { %v2748_v29 = vsel %vm1422_vm9, %v2739_v52, -inf }
0x15ba   : > { %2749 = vmax.xlane.f32.xlu1 %v2748_v29 }
0x15cb   : > { %2770 = vrot.lane.b32.xlu1 %v5400_v21, %s4817_s22 }
0x15ce   : > { %2772 = vrot.lane.b32.xlu0 %v5398_v17, %s4817_s22  ;;  %s5757_s22 = smov 120  }
0x15cf   : > { %2864 = vrot.lane.b32.xlu1 %v5398_v17, %s5756_s2 }
0x15d3   : > { %2862 = vrot.lane.b32.xlu1 %v5400_v21, %s5756_s2  ;;  %s5766_s2 = smov 16  }
0x1641   : > { %v2753_v30 = vpop.xlane.xlu0 %2752 }
0x1642   : > { %v2755_v51 = vsub.f32 %v4494_v27, %v2753_v30 }
0x1643   : > { %v2750_v31 = vpop.xlane.xlu1 %2749 }
0x1644   : > { %v2758_v32 = vmul.f32 1.442695, %v2755_v51  ;;  %v2754_v33 = vsub.f32 %v2739_v52, %v2750_v31 }
0x1645   : > { %v2773_v34 = vpop.permute.xlu0 %2772 }
0x1646   : > { %4710 = vpow2.f32 %v2758_v32  ;;  %v2756_v22 = vmul.f32 1.442695, %v2754_v33  ;;  %4495 = vmatprep.subr.msk.mxu1 %vm816_vm4, %v2773_v34 }
0x1647   : > { %4496 = vmatpush3.msk.msra.mxu1 %vm816_vm4, %v2773_v34  ;;  %v2771_v35 = vpop.permute.xlu1 %2770 }
0x1648   : > { %4712 = vpow2.f32 %v2756_v22  ;;  %4497 = vmatprep.subr.mxu1 %v2771_v35 }
0x1649   : > { %4498 = vmatpush3.msra.mxu1 %v2771_v35 }
0x164b   : > { %v2865_v36 = vpop.permute.xlu1 %2864 }
0x164c   : > { %4502 = vmatprep.subr.msk.mxu1 %vm1336_vm7, %v2865_v36 }
0x164f   : > { %v2863_v41 = vpop.permute.xlu1 %2862 }
0x1653   : > { %v4711_v37 = vpop.eup %4710 }
0x1654   : > { %v2763_v38 = vsel %vm1426_vm8, %v4711_v37, 0.0 }
0x1655   : > { %v4713_v39 = vpop.eup %4712  ;;  %2764 = vadd.xlane.f32.xlu1 %v2763_v38 }
0x1656   : > { %v2760_v40 = vsel %vm1422_vm9, %v4713_v39, 0.0 }
0x1657   : > { %2761 = vadd.xlane.f32.xlu0 %v2760_v40 }
0x1666   : > { %2858 = vrot.lane.b32.xlu1 %v5407_v23, %s5757_s22 }
0x166a   : > { %3063 = vrot.lane.b32.xlu1 %v5400_v21, %s5758_s23 }
0x166d   : > { %3065 = vrot.lane.b32.xlu0 %v5398_v17, %s5758_s23 }
0x166e   : > { %3061 = vrot.lane.b32.xlu1 %v5416_v26, %s5759_s1 }
0x1671   : > { %2860 = vrot.lane.b32.xlu0 %v5416_v26, %s5757_s22 }
0x1675   : > { %3059 = vrot.lane.b32.xlu0 %v5407_v23, %s5759_s1  ;;  %s4830_s1 = smov [#allocation2]  }
0x1676   : > { %s4758_s6 = sshll.u32 %s4830_s1, 4  ;;  %s4759_s6 = int_to_ptr.vmem [resolvable:$false] %s4758_s6 }
0x16de   : > { %v2765_v42 = vpop.xlane.xlu1 %2764 }
0x16df   : > { %4714 = vrcp.f32 %v2765_v42 }
0x16e0   : > { %v2762_v19 = vpop.xlane.xlu0 %2761 }
0x16e1   : > { %4716 = vrcp.f32 %v2762_v19 }
0x16e2   : > { %v2859_v13 = vpop.permute.xlu1 %2858 }
0x16e4   : > { %v3066_v12 = vpop.permute.xlu0 %3065 }
0x16e5   : > { %4516 = vmatprep.subr.msk.mxu0 %vm1336_vm7, %v3066_v12 }
0x16e6   : > { %4517 = vmatpush3.xpose.msk.msra.mxu0 %vm1336_vm7, %v3066_v12  ;;  %v3064_v43 = vpop.permute.xlu1 %3063 }
0x16e7   : > { %4518 = vmatprep.subr.msk.mxu0 %vm1336_vm7, %v3064_v43 }
0x16e8   : > { %v2861_v44 = vpop.permute.xlu0 %2860 }
0x16ea   : > { %4519 = vmatpush3.xpose.msk.msra.mxu0 %vm1336_vm7, %v3064_v43  ;;  %v3062_v49 = vpop.permute.xlu1 %3061 }
0x16ec   : > { %v3060_v46 = vpop.permute.xlu0 %3059  ;;  %v4715_v47 = vpop.eup %4714 }
0x16ed   : > { %4520 = vmatprep.mubr.msk.f32.mxu0 %vm1336_vm7, %v3060_v46  ;;  %v2769_v54 = vmul.f32 %v4715_v47, %v4711_v37 }
0x16ee   : > { %v4717_v50 = vpop.eup %4716  ;;  %4521 = vmatmul.mubr.msk.f32.vlgmr.msra.gmra.mxu0 %vm1336_vm7, %v3062_v49 }
0x16ef   : > { %v2768_v53 = vmul.f32 %v4717_v50, %v4713_v39 }
0x16f1   : > { %4499 = vmatprep.mubr.msk.f32.mxu1 %vm1422_vm9, %v2768_v53 }
0x16f2   : > { %4500 = vmatmul.mubr.msk.f32.vlgmr.msra.gmra.mxu1 %vm1422_vm9, %v2769_v54 }
0x16f3   : > { %4503 = vmatpush3.xpose.msk.msra.mxu1 %vm1336_vm7, %v2865_v36  ;;  %4506 = vmatprep.mubr.msk.f32.mxu1 %vm1336_vm7, %v2859_v13 }
0x16f4   : > { %4504 = vmatprep.subr.msk.mxu1 %vm1336_vm7, %v2863_v41 }
0x16f7   : > { %4505 = vmatpush3.xpose.msk.msra.mxu1 %vm1336_vm7, %v2863_v41 }
0x16fa   : > { %4507 = vmatmul.mubr.msk.f32.vlgmr.msra.gmra.mxu1 %vm1336_vm7, %v2861_v44 }
0x17ae   : > { %v4522_v57 = vpop.f32.mrf.mxu0 }
0x17af   : > { %v3153_v61 = vsel %vm1426_vm8, %v4522_v57, -inf }
0x17b0   : > { %v3141_v18 = vpop.f32.mrf.mxu0 }
0x17b1   : > { %v3150_v60 = vsel %vm1422_vm9, %v3141_v18, -inf }
0x17b2   : > { %v5460_v55 = vpop.f32.mrf.mxu1 }
0x17b4   : > { %v5462_v56 = vpop.f32.mrf.mxu1 }
0x17ba   : > { %v4508_v58 = vpop.f32.mrf.mxu1 }
0x17bb   : > { %v2952_v45 = vsel %vm1426_vm8, %v4508_v58, -inf }
0x17bc   : > { %2953 = vmax.xlane.f32.xlu1 %v2952_v45  ;;  %v2940_v48 = vpop.f32.mrf.mxu1 }
0x17bd   : > { %v2949_v59 = vsel %vm1422_vm9, %v2940_v48, -inf }
0x17be   : > { %2950 = vmax.xlane.f32.xlu0 %v2949_v59 }
0x17c2   : > { %3151 = vmax.xlane.f32.xlu0 %v3150_v60 }
0x17c6   : > { %3154 = vmax.xlane.f32.xlu0 %v3153_v61 }
0x1845   : > { %v2954_v0 = vpop.xlane.xlu1 %2953 }
0x1846   : > { %v2956_v3 = vsub.f32 %v4508_v58, %v2954_v0 }
0x1847   : > { %v2951_v62 = vpop.xlane.xlu0 %2950 }
0x1848   : > { %v2955_v63 = vsub.f32 %v2940_v48, %v2951_v62  ;;  %v2959_v7 = vmul.f32 1.442695, %v2956_v3 }
0x184a   : > { %v2957_v4 = vmul.f32 1.442695, %v2955_v63 }
0x184b   : > { %v3152_v1 = vpop.xlane.xlu0 %3151 }
0x184c   : > { %v3156_v2 = vsub.f32 %v3141_v18, %v3152_v1 }
0x184e   : > { %v3158_v5 = vmul.f32 1.442695, %v3156_v2 }
0x184f   : > { %v3155_v16 = vpop.xlane.xlu0 %3154 }
0x1850   : > { %4718 = vpow2.f32 %v3158_v5  ;;  %v3157_v6 = vsub.f32 %v4522_v57, %v3155_v16  ;;  %v4088_v5 = vld [vmem:[%s5690_s11 + $0x30] sm:$0xff]  ;;  %v4087_v16 = vld [vmem:[%s5690_s11 + $0x28] sm:$0xff] }
0x1851   : > { %4720 = vpow2.f32 %v2957_v4 }
0x1852   : > { %v3160_v8 = vmul.f32 1.442695, %v3157_v6  ;;  %v4086_v6 = vld [vmem:[%s5690_s11 + $0x20] sm:$0xff] }
0x1854   : > { %4722 = vpow2.f32 %v3160_v8 }
0x1855   : > { %4724 = vpow2.f32 %v2959_v7 }
0x185d   : > { %v4719_v9 = vpop.eup %4718 }
0x185e   : > { %v3162_v14 = vsel %vm1422_vm9, %v4719_v9, 0.0  ;;  %v4721_v15 = vpop.eup %4720 }
0x185f   : > { %3163 = vadd.xlane.f32.xlu0 %v3162_v14  ;;  %v2961_v24 = vsel %vm1422_vm9, %v4721_v15, 0.0 }
0x1861   : > { %v4723_v20 = vpop.eup %4722 }
0x1862   : > { %v3165_v25 = vsel %vm1426_vm8, %v4723_v20, 0.0  ;;  %v4725_v27 = vpop.eup %4724 }
0x1863   : > { %2962 = vadd.xlane.f32.xlu0 %v2961_v24  ;;  %3166 = vadd.xlane.f32.xlu1 %v3165_v25  ;;  %v2964_v28 = vsel %vm1426_vm8, %v4725_v27, 0.0 }
0x1867   : > { %2965 = vadd.xlane.f32.xlu1 %v2964_v28 }
0x1878   : > { %2971 = vrot.lane.b32.xlu1 %v5400_v21, %s5760_s28 }
0x1879   : > { %2973 = vrot.lane.b32.xlu0 %v5398_v17, %s5760_s28  ;;  %s647_s28 = sand.u32 1, %s4806_s25  }
0x187a   : > { %s3907_s22 = scalar_lea.sflag [#allocation3], %s647_s28 }
0x187c   : > { %3174 = vrot.lane.b32.xlu1 %v5398_v17, %s5761_s0 }
0x187d   : > { %3266 = vrot.lane.b32.xlu0 %v5398_v17, %s5762_s26 }
0x1880   : > { %3172 = vrot.lane.b32.xlu1 %v5400_v21, %s5761_s0  ;;  %s4128_s0 = sshll.u32 %s4962_s3, 4  ;;  %s4760_s3 = scalar_lea.vmem %s4759_s6, 32 }
0x1881   : > { %3260 = vrot.lane.b32.xlu0 %v5407_v23, %s5763_s4 }
0x1884   : > { %3264 = vrot.lane.b32.xlu1 %v5400_v21, %s5762_s26  ;;  %s648_s26 = scalar_lea.vmem [#allocation2], %s647_s28 }
0x1888   : > { %3262 = vrot.lane.b32.xlu1 %v5416_v26, %s5763_s4  ;;  %s3919_s4 = sshll.u32 %s648_s26, 4  ;;  %s3920_s4 = int_to_ptr.vmem [resolvable:$true] %s3919_s4 }
0x1889   : > { %s4754_s23 = scalar_lea.vmem %s3920_s4, 16  ;;  %p4761_p0 = scmp.lt.s32.totalorder %s3920_s4, %s4759_s6 }
0x188a   : > { %p4755_p11 = scmp.ne.s32.totalorder %s3920_s4, %s4754_s23  ;;  %p4762_p1 = scmp.lt.s32.totalorder %s4760_s3, %s4754_s23 }
0x188c   : > { %p4756_p12 = pnand %p4755_p11, %p4979_p5  ;;  %p4763_p2 = por %p4762_p1, %p4761_p0 }
0x188e   : > { %p4757_p13 = pneg %p4756_p12 }
0x1890   : > { %p4764_p3 = pnand %p4763_p2, %p4757_p13 }
0x18e8   : > { %v3164_v52 = vpop.xlane.xlu0 %3163 }
0x18ec   : > { %v2963_v29 = vpop.xlane.xlu0 %2962  ;;  %v3167_v30 = vpop.xlane.xlu1 %3166 }
0x18ed   : > { %4726 = vrcp.f32 %v2963_v29 }
0x18ee   : > { %4728 = vrcp.f32 %v3164_v52 }
0x18f0   : > { %v2974_v51 = vpop.permute.xlu0 %2973  ;;  %v2966_v31 = vpop.xlane.xlu1 %2965 }
0x18f1   : > { %4730 = vrcp.f32 %v2966_v31  ;;  %4509 = vmatprep.subr.msk.mxu1 %vm816_vm4, %v2974_v51 }
0x18f2   : > { %4510 = vmatpush3.msk.msra.mxu1 %vm816_vm4, %v2974_v51  ;;  %4732 = vrcp.f32 %v3167_v30 }
0x18f4   : > { %v2972_v23 = vpop.permute.xlu1 %2971  ;;  %v3267_v35 = vpop.permute.xlu0 %3266 }
0x18f5   : > { %4511 = vmatprep.subr.mxu1 %v2972_v23 }
0x18f6   : > { %4512 = vmatpush3.msra.mxu1 %v2972_v23 }
0x18f8   : > { %v3175_v32 = vpop.permute.xlu1 %3174  ;;  %v3261_v41 = vpop.permute.xlu0 %3260 }
0x18f9   : > { %4523 = vmatprep.subr.msk.mxu1 %vm816_vm4, %v3175_v32 }
0x18fa   : > { %v4727_v26 = vpop.eup %4726 }
0x18fb   : > { %v2969_v33 = vmul.f32 %v4727_v26, %v4721_v15  ;;  %v4729_v34 = vpop.eup %4728 }
0x18fc   : > { %v3173_v38 = vpop.permute.xlu1 %3172  ;;  %v3170_v39 = vmul.f32 %v4729_v34, %v4719_v9 }
0x18fd   : > { %4513 = vmatprep.mubr.msk.f32.mxu1 %vm1422_vm9, %v2969_v33 }
0x18fe   : > { %v4731_v22 = vpop.eup %4730 }
0x18ff   : > { %v2970_v36 = vmul.f32 %v4731_v22, %v4725_v27  ;;  %v4733_v37 = vpop.eup %4732 }
0x1900   : > { %v3171_v40 = vmul.f32 %v4733_v37, %v4723_v20  ;;  %v3265_v42 = vpop.permute.xlu1 %3264 }
0x1901   : > { %4514 = vmatmul.mubr.msk.f32.vlgmr.msra.gmra.mxu1 %vm1422_vm9, %v2970_v36 }
0x1902   : > { %4524 = vmatpush3.msk.msra.mxu1 %vm816_vm4, %v3175_v32  ;;  %4527 = vmatprep.mubr.msk.f32.mxu1 %vm1422_vm9, %v3170_v39 }
0x1903   : > { %4525 = vmatprep.subr.mxu1 %v3173_v38 }
0x1904   : > { %4526 = vmatpush3.msra.mxu1 %v3173_v38  ;;  %v3263_v19 = vpop.permute.xlu1 %3262 }
0x1905   : > { %4530 = vmatprep.subr.msk.mxu1 %vm1336_vm7, %v3267_v35  ;;  %4528 = vmatmul.mubr.msk.f32.vlgmr.msra.gmra.mxu1 %vm1422_vm9, %v3171_v40 }
0x1906   : > { %4531 = vmatpush3.xpose.msk.msra.mxu1 %vm1336_vm7, %v3267_v35  ;;  %4534 = vmatprep.mubr.msk.f32.mxu1 %vm1336_vm7, %v3261_v41 }
0x1907   : > { %4532 = vmatprep.subr.msk.mxu1 %vm1336_vm7, %v3265_v42 }
0x190a   : > { %4533 = vmatpush3.xpose.msk.msra.mxu1 %vm1336_vm7, %v3265_v42 }
0x190d   : > { %4535 = vmatmul.mubr.msk.f32.vlgmr.msra.gmra.mxu1 %vm1336_vm7, %v3263_v19 }
0x19c1   : > { %v4515_v13 = vpop.f32.mrf.mxu1 }
0x19c3   : > { %v3050_v12 = vpop.f32.mrf.mxu1 }
0x19c5   : > { %v4529_v43 = vpop.f32.mrf.mxu1 }
0x19c7   : > { %v3251_v44 = vpop.f32.mrf.mxu1 }
0x19cd   : > { %v4536_v46 = vpop.f32.mrf.mxu1 }
0x19ce   : > { %v3354_v47 = vsel %vm1426_vm8, %v4536_v46, -inf }
0x19cf   : > { %3355 = vmax.xlane.f32.xlu1 %v3354_v47  ;;  %v3342_v49 = vpop.f32.mrf.mxu1 }
0x19d0   : > { %v3351_v50 = vsel %vm1422_vm9, %v3342_v49, -inf }
0x19d1   : > { %3352 = vmax.xlane.f32.xlu0 %v3351_v50 }
0x19e0   : > { %3373 = vrot.lane.b32.xlu1 %v5400_v21, %s5764_s29 }
0x19e4   : > { %3463 = vrot.lane.b32.xlu1 %v3050_v12, %s5765_s30  ;;  %v4099_v12 = vld [vmem:[%s5694_s15 + $0x28] sm:$0xff] }
0x19e8   : > { %3465 = vrot.lane.b32.xlu1 %v4515_v13, %s5765_s30  ;;  %s5767_s30 = smov 24   ;;  %v4100_v13 = vld [vmem:[%s5694_s15 + $0x30] sm:$0xff] }
0x19ec   : > { %3473 = vrot.lane.b32.xlu1 %v4529_v43, %s5766_s2  ;;  %v4098_v43 = vld [vmem:[%s5694_s15 + $0x20] sm:$0xff] }
0x1a58   : > { %v3356_v53 = vpop.xlane.xlu1 %3355 }
0x1a59   : > { %v3358_v54 = vsub.f32 %v4536_v46, %v3356_v53 }
0x1a5a   : > { %v3353_v57 = vpop.xlane.xlu0 %3352 }
0x1a5b   : > { %v3361_v58 = vmul.f32 1.442695, %v3358_v54  ;;  %v3357_v45 = vsub.f32 %v3342_v49, %v3353_v57  ;;  %v4096_v57 = vld [vmem:[%s5692_s13 + $0x1] ss:$0 sm:$0xff] }
0x1a5c   : > { %v3374_v0 = vpop.permute.xlu1 %3373 }
0x1a5d   : > { %4734 = vpow2.f32 %v3361_v58  ;;  %v3359_v48 = vmul.f32 1.442695, %v3357_v45  ;;  %v4097_v45 = vld [vmem:[%s5693_s14 + $0x1] ss:$0 sm:$0xff] }
0x1a5f   : > { %4736 = vpow2.f32 %v3359_v48 }
0x1a60   : > { %v3464_v9 = vpop.permute.xlu1 %3463 }
0x1a61   : > { %v3485_v24 = vsel %vm1336_vm7, %v5462_v56, %v3464_v9  ;;  %v4091_v56 = vld [vmem:[%s5691_s12 + $0x1] ss:$0 sm:$0xff]  ;;  %v4108_v9 = vld [vmem:[%s5696_s17 + $0x90] sm:$0xff] }
0x1a64   : > { %v3466_v14 = vpop.permute.xlu1 %3465 }
0x1a65   : > { %v3486_v27 = vsel %vm1336_vm7, %v5460_v55, %v3466_v14  ;;  %v4107_v14 = vld [vmem:[%s5696_s17 + $0x88] sm:$0xff] }
0x1a68   : > { %v3474_v15 = vpop.permute.xlu1 %3473 }
0x1a69   : > { %v3488_v29 = vsel %vm2163_vm10, %v3486_v27, %v3474_v15  ;;  %v4106_v15 = vld [vmem:[%s5696_s17 + $0x80] sm:$0xff] }
0x1a6a   : > { %v4735_v59 = vpop.eup %4734 }
0x1a6b   : > { %v3366_v18 = vsel %vm1426_vm8, %v4735_v59, 0.0 }
0x1a6c   : > { %v4737_v60 = vpop.eup %4736  ;;  %3367 = vadd.xlane.f32.xlu0 %v3366_v18 }
0x1a6d   : > { %v3363_v21 = vsel %vm1422_vm9, %v4737_v60, 0.0 }
0x1a70   : > { %3364 = vadd.xlane.f32.xlu0 %v3363_v21 }
0x1a86   : > { %3375 = vrot.lane.b32.xlu0 %v5398_v17, %s5764_s29  ;;  %v4089_v17 = vld [vmem:[%s5690_s11 + $0x38] sm:$0xff] }
0x1a8a   : > { %3471 = vrot.lane.b32.xlu0 %v3251_v44, %s5766_s2  ;;  %s3917_s2 = scalar_lea.hbm %s5700_s21, %s4128_s0 }
0x1af5   : > { %v3368_v61 = vpop.xlane.xlu0 %3367 }
0x1af6   : > { %4738 = vrcp.f32 %v3368_v61 }
0x1af9   : > { %v3365_v62 = vpop.xlane.xlu0 %3364 }
0x1afa   : > { %4740 = vrcp.f32 %v3365_v62  ;;  %v4121_v62 = vld [vmem:[%s5696_s17 + $0xf8] sm:$0xff] }
0x1afd   : > { %v3376_v63 = vpop.permute.xlu0 %3375 }
0x1afe   : > { %4537 = vmatprep.subr.msk.mxu0 %vm816_vm4, %v3376_v63 }
0x1aff   : > { %4538 = vmatpush3.msk.msra.mxu0 %vm816_vm4, %v3376_v63  ;;  %v4120_v63 = vld [vmem:[%s5696_s17 + $0xf0] sm:$0xff] }
0x1b00   : > { %4539 = vmatprep.subr.mxu0 %v3374_v0 }
0x1b01   : > { %4540 = vmatpush3.msra.mxu0 %v3374_v0  ;;  %v3472_v20 = vpop.permute.xlu0 %3471  ;;  %v4119_v0 = vld [vmem:[%s5696_s17 + $0xe8] sm:$0xff] }
0x1b02   : > { %4544 = vmatprep.subr.mxu0 %v4089_v17  ;;  %v3487_v28 = vsel %vm2163_vm10, %v3485_v24, %v3472_v20  ;;  %v4103_v20 = vld [vmem:[%s5695_s16 + $0x1] ss:$0 sm:$0xff] }
0x1b03   : > { %v4739_v1 = vpop.eup %4738 }
0x1b04   : > { %v3372_v4 = vmul.f32 %v4739_v1, %v4735_v59  ;;  %v4118_v1 = vld [vmem:[%s5696_s17 + $0xe0] sm:$0xff] }
0x1b07   : > { %v4741_v2 = vpop.eup %4740 }
0x1b08   : > { %v3371_v3 = vmul.f32 %v4741_v2, %v4737_v60  ;;  %v4117_v2 = vld [vmem:[%s5696_s17 + $0xd8] sm:$0xff] }
0x1b0a   : > { %4541 = vmatprep.mubr.msk.f32.mxu0 %vm1422_vm9, %v3371_v3  ;;  %v4116_v3 = vld [vmem:[%s5696_s17 + $0xd0] sm:$0xff] }
0x1b0b   : > { %4542 = vmatmul.mubr.msk.f32.vlgmr.msra.gmra.mxu0 %vm1422_vm9, %v3372_v4  ;;  %v4115_v4 = vld [vmem:[%s5696_s17 + $0xc8] sm:$0xff] }
0x1b0c   : > { %4545 = vmatpush3.msra.mxu0 %v4089_v17  ;;  %v4114_v17 = vld [vmem:[%s5696_s17 + $0xc0] sm:$0xff] }
0x1b0d   : > { %4546 = vmatprep.subr.mxu0 %v4088_v5 }
0x1b0e   : > { %4547 = vmatpush3.msra.mxu0 %v4088_v5  ;;  %v4113_v5 = vld [vmem:[%s5696_s17 + $0xb8] sm:$0xff] }
0x1b0f   : > { %4548 = vmatprep.subr.mxu0 %v4087_v16 }
0x1b10   : > { %4549 = vmatpush3.msra.mxu0 %v4087_v16  ;;  %v4112_v16 = vld [vmem:[%s5696_s17 + $0xb0] sm:$0xff] }
0x1b11   : > { %4550 = vmatprep.subr.mxu0 %v4086_v6 }
0x1b12   : > { %4551 = vmatpush3.msra.mxu0 %v4086_v6  ;;  %v4111_v6 = vld [vmem:[%s5696_s17 + $0xa8] sm:$0xff] }
0x1b13   : > { %4566 = vmatprep.subr.mxu0 %v4121_v62 }
0x1bcb   : > { %v4543_v7 = vpop.f32.mrf.mxu0 }
0x1bcc   : > { %3481 = vrot.lane.b32.xlu1 %v4543_v7, %s5767_s30  ;;  %v4110_v7 = vld [vmem:[%s5696_s17 + $0xa0] sm:$0xff] }
0x1bcd   : > { %v3452_v8 = vpop.f32.mrf.mxu0 }
0x1bce   : > { %3479 = vrot.lane.b32.xlu0 %v3452_v8, %s5767_s30  ;;  %v4109_v8 = vld [vmem:[%s5696_s17 + $0x98] sm:$0xff] }
0x1c3e   : > { %v3482_v25 = vpop.permute.xlu1 %3481 }
0x1c3f   : > { %v3490_v51 = vsel %vm2166_vm11, %v3488_v29, %v3482_v25 }
0x1c40   : > { %v3480_v52 = vpop.permute.xlu0 %3479 }
0x1c41   : > { %v3489_v30 = vsel %vm2166_vm11, %v3487_v28, %v3480_v52 }
0x1c42   : > { %4552 = vmatprep.mubr.msk.f32.mxu0 %vm658_vm0, %v3489_v30 }
0x1c43   : > { %4553 = vmatmul.mubr.msk.f32.vlgmr.msra.gmra.mxu0 %vm658_vm0, %v3490_v51 }
0x1c44   : > { %4567 = vmatpush3.msra.mxu0 %v4121_v62 }
0x1c45   : > { %4568 = vmatprep.subr.mxu0 %v4120_v63 }
0x1c46   : > { %4569 = vmatpush3.msra.mxu0 %v4120_v63  ;;  %v4126_v63 = vld [vmem:[%s5698_s19 + $0x1] ss:$0 sm:$0xff] }
0x1c47   : > { %4570 = vmatprep.subr.mxu0 %v4119_v0 }
0x1c48   : > { %4571 = vmatpush3.msra.mxu0 %v4119_v0 }
0x1c49   : > { %4572 = vmatprep.subr.mxu0 %v4118_v1 }
0x1c4a   : > { %4573 = vmatpush3.msra.mxu0 %v4118_v1 }
0x1c4b   : > { %4574 = vmatprep.subr.mxu0 %v4117_v2 }
0x1c4c   : > { %4575 = vmatpush3.msra.mxu0 %v4117_v2  ;;  %v4127_v2 = vld [vmem:[%s5699_s20 + $0x1] ss:$0 sm:$0xff] }
0x1c4d   : > { %4576 = vmatprep.subr.mxu0 %v4116_v3 }
0x1c4e   : > { %4577 = vmatpush3.msra.mxu0 %v4116_v3 }
0x1c4f   : > { %4578 = vmatprep.subr.mxu0 %v4115_v4 }
0x1c50   : > { %4579 = vmatpush3.msra.mxu0 %v4115_v4 }
0x1c51   : > { %4580 = vmatprep.subr.mxu0 %v4114_v17 }
0x1c52   : > { %4581 = vmatpush3.msra.mxu0 %v4114_v17 }
0x1c53   : > { %4582 = vmatprep.subr.mxu0 %v4113_v5 }
0x1c54   : > { %4583 = vmatpush3.msra.mxu0 %v4113_v5 }
0x1c55   : > { %4584 = vmatprep.subr.mxu0 %v4112_v16 }
0x1c56   : > { %4585 = vmatpush3.msra.mxu0 %v4112_v16 }
0x1c57   : > { %4586 = vmatprep.subr.mxu0 %v4111_v6 }
0x1c58   : > { %4587 = vmatpush3.msra.mxu0 %v4111_v6 }
0x1c59   : > { %4588 = vmatprep.subr.mxu0 %v4110_v7 }
0x1c5a   : > { %4589 = vmatpush3.msra.mxu0 %v4110_v7 }
0x1c5b   : > { %4590 = vmatprep.subr.mxu0 %v4109_v8 }
0x1c5c   : > { %4591 = vmatpush3.msra.mxu0 %v4109_v8 }
0x1c5d   : > { %4592 = vmatprep.subr.mxu0 %v4108_v9 }
0x1c5e   : > { %4593 = vmatpush3.msra.mxu0 %v4108_v9 }
0x1c5f   : > { %4594 = vmatprep.subr.mxu0 %v4107_v14 }
0x1c60   : > { %4595 = vmatpush3.msra.mxu0 %v4107_v14 }
0x1c61   : > { %4596 = vmatprep.subr.mxu0 %v4106_v15 }
0x1c62   : > { %4597 = vmatpush3.msra.mxu0 %v4106_v15 }
0x1d03   : > { %v4554_v31 = vpop.f32.mrf.mxu0 }
0x1d04   : > { %v3582_v23 = vadd.f32 %v4554_v31, %v4091_v56 }
0x1d05   : > { %v3576_v55 = vpop.f32.mrf.mxu0 }
0x1d06   : > { %v3586_v32 = vadd.f32 %v3582_v23, %v5389_v11  ;;  %v3577_v26 = vadd.f32 %v4091_v56, %v3576_v55 }
0x1d08   : > { %v3585_v33 = vadd.f32 %v3577_v26, %v5387_v10  ;;  %v3594_v34 = vsel %vm662_vm1, %v3586_v32, 0.0  ;;  %v4101_v10 = vld [vmem:[%s5694_s15 + $0x38] sm:$0xff] }
0x1d09   : > { %3595 = vadd.xlane.f32.xlu1 %v3594_v34  ;;  %4555 = vmatprep.subr.mxu1 %v4101_v10 }
0x1d0a   : > { %v3591_v22 = vsel %vm658_vm0, %v3585_v33, 0.0  ;;  %4556 = vmatpush3.msra.mxu1 %v4101_v10 }
0x1d0b   : > { %3592 = vadd.xlane.f32.xlu0 %v3591_v22  ;;  %4557 = vmatprep.subr.mxu1 %v4100_v13 }
0x1d0c   : > { %4558 = vmatpush3.msra.mxu1 %v4100_v13 }
0x1d0d   : > { %4559 = vmatprep.subr.mxu1 %v4099_v12 }
0x1d0e   : > { %4560 = vmatpush3.msra.mxu1 %v4099_v12 }
0x1d0f   : > { %4561 = vmatprep.subr.mxu1 %v4098_v43 }
0x1d10   : > { %4562 = vmatpush3.msra.mxu1 %v4098_v43 }
0x1d92   : > { %v3596_v35 = vpop.xlane.xlu1 %3595 }
0x1d93   : > { %v3598_v36 = vmul.f32 0.03125, %v3596_v35 }
0x1d94   : > { %v3593_v37 = vpop.xlane.xlu0 %3592 }
0x1d95   : > { %v3597_v38 = vmul.f32 0.03125, %v3593_v37  ;;  %v3600_v39 = vsub.f32 %v3586_v32, %v3598_v36 }
0x1d97   : > { %v3599_v40 = vsub.f32 %v3585_v33, %v3597_v38  ;;  %v3602_v19 = vmul.f32 %v3600_v39, %v3600_v39 }
0x1d99   : > { %v3601_v41 = vmul.f32 %v3599_v40, %v3599_v40  ;;  %v3606_v11 = vsel %vm662_vm1, %v3602_v19, 0.0 }
0x1d9b   : > { %v3603_v42 = vsel %vm658_vm0, %v3601_v41, 0.0 }
0x1d9c   : > { %3604 = vadd.xlane.f32.xlu0 %v3603_v42 }
0x1da0   : > { %3607 = vadd.xlane.f32.xlu0 %v3606_v11 }
0x1e25   : > { %v3605_v44 = vpop.xlane.xlu0 %3604 }
0x1e26   : > { %v3609_v46 = vmul.f32 0.03125, %v3605_v44 }
0x1e28   : > { %v3611_v47 = vadd.f32 1e-05, %v3609_v46 }
0x1e29   : > { %v3608_v49 = vpop.xlane.xlu0 %3607 }
0x1e2a   : > { %4742 = vrsqrt.f32 %v3611_v47  ;;  %v3610_v50 = vmul.f32 0.03125, %v3608_v49 }
0x1e2c   : > { %v3612_v53 = vadd.f32 1e-05, %v3610_v50 }
0x1e2e   : > { %4744 = vrsqrt.f32 %v3612_v53 }
0x1e37   : > { %v4743_v54 = vpop.eup %4742 }
0x1e38   : > { %v3615_v58 = vmul.f32 %v4743_v54, %v3599_v40  ;;  %v4123_v40 = vld [vmem:[%s5697_s18 + $0x1] ss:$0 sm:$0xff] }
0x1e3a   : > { %v3623_v48 = vmul.f32 %v4096_v57, %v3615_v58 }
0x1e3b   : > { %v4745_v59 = vpop.eup %4744 }
0x1e3c   : > { %v3616_v18 = vmul.f32 %v4745_v59, %v3600_v39  ;;  %v5569_v60 = vadd.f32 %v4097_v45, %v3623_v48 }
0x1e3e   : > { %v3624_v21 = vmul.f32 %v4096_v57, %v3616_v18  ;;  %4563 = vmatprep.mubr.msk.f32.mxu1 %vm658_vm0, %v5569_v60 }
0x1e40   : > { %v5573_v61 = vadd.f32 %v4097_v45, %v3624_v21 }
0x1e42   : > { %4564 = vmatmul.mubr.msk.f32.vlgmr.msra.gmra.mxu1 %vm658_vm0, %v5573_v61 }
0x1f02   : > { %v4565_v24 = vpop.f32.mrf.mxu1 }
0x1f03   : > { %v3724_v25 = vadd.f32 %v4565_v24, %v4103_v20 }
0x1f04   : > { %v3718_v27 = vpop.f32.mrf.mxu1 }
0x1f05   : > { %v3728_v28 = vmul.f32 %v3724_v25, %v3724_v25  ;;  %v3719_v52 = vadd.f32 %v4103_v20, %v3718_v27 }
0x1f07   : > { %v3730_v29 = vmul.f32 %v3728_v28, %v3724_v25  ;;  %v3727_v30 = vmul.f32 %v3719_v52, %v3719_v52 }
0x1f09   : > { %v3732_v51 = vmul.f32 0.044715, %v3730_v29  ;;  %v3729_v56 = vmul.f32 %v3727_v30, %v3719_v52 }
0x1f0b   : > { %v3734_v31 = vadd.f32 %v3732_v51, %v3724_v25  ;;  %v3731_v23 = vmul.f32 0.044715, %v3729_v56 }
0x1f0d   : > { %v3736_v55 = vmul.f32 0.7978846, %v3734_v31  ;;  %v3733_v32 = vadd.f32 %v3731_v23, %v3719_v52 }
0x1f0f   : > { %4746 = vtanh.f32 %v3736_v55  ;;  %v3735_v26 = vmul.f32 0.7978846, %v3733_v32 }
0x1f11   : > { %4748 = vtanh.f32 %v3735_v26 }
0x1f1c   : > { %v4747_v33 = vpop.eup %4746 }
0x1f1d   : > { %v3740_v34 = vadd.f32 1.0, %v4747_v33 }
0x1f1e   : > { %v4749_v22 = vpop.eup %4748 }
0x1f1f   : > { %v3739_v35 = vadd.f32 1.0, %v4749_v22  ;;  %v3742_v36 = vmul.f32 0.5, %v3740_v34 }
0x1f21   : > { %v3741_v37 = vmul.f32 0.5, %v3739_v35  ;;  %v3744_v39 = vmul.f32 %v3742_v36, %v3724_v25 }
0x1f23   : > { %v3743_v38 = vmul.f32 %v3741_v37, %v3719_v52 }
0x1f25   : > { %4598 = vmatprep.mubr.f32.mxu0 %v3743_v38 }
0x1f26   : > { %4599 = vmatmul.mubr.f32.vlgmr.msra.gmra.mxu0 %v3744_v39 }
0x1fe6   : > { %v4600_v41 = vpop.f32.mrf.mxu0 }
0x1fe7   : > { %v3842_v42 = vadd.f32 %v4600_v41, %v4123_v40 }
0x1fe8   : > { %v3836_v19 = vpop.f32.mrf.mxu0 }
0x1fe9   : > { %v3846_v11 = vadd.f32 %v3842_v42, %v5573_v61  ;;  %v3837_v10 = vadd.f32 %v4123_v40, %v3836_v19 }
0x1feb   : > { %v3845_v13 = vadd.f32 %v3837_v10, %v5569_v60  ;;  %v3854_v12 = vsel %vm662_vm1, %v3846_v11, 0.0 }
0x1fec   : > { %3855 = vadd.xlane.f32.xlu1 %v3854_v12 }
0x1fed   : > { %v3851_v43 = vsel %vm658_vm0, %v3845_v13, 0.0 }
0x1fee   : > { %3852 = vadd.xlane.f32.xlu0 %v3851_v43 }
0x2075   : > { %v3856_v44 = vpop.xlane.xlu1 %3855 }
0x2076   : > { %v3858_v46 = vmul.f32 0.03125, %v3856_v44 }
0x2077   : > { %v3853_v47 = vpop.xlane.xlu0 %3852 }
0x2078   : > { %v3860_v49 = vsub.f32 %v3846_v11, %v3858_v46  ;;  %v3857_v50 = vmul.f32 0.03125, %v3853_v47 }
0x207a   : > { %v3859_v53 = vsub.f32 %v3845_v13, %v3857_v50  ;;  %v3862_v54 = vmul.f32 %v3860_v49, %v3860_v49 }
0x207c   : > { %v3866_v57 = vsel %vm662_vm1, %v3862_v54, 0.0  ;;  %v3861_v58 = vmul.f32 %v3859_v53, %v3859_v53 }
0x207d   : > { %3867 = vadd.xlane.f32.xlu1 %v3866_v57 }
0x207e   : > { %v3863_v45 = vsel %vm658_vm0, %v3861_v58, 0.0 }
0x207f   : > { %3864 = vadd.xlane.f32.xlu0 %v3863_v45 }
0x2106   : > { %v3868_v48 = vpop.xlane.xlu1 %3867 }
0x2107   : > { %v3870_v59 = vmul.f32 0.03125, %v3868_v48 }
0x2108   : > { %v3865_v18 = vpop.xlane.xlu0 %3864 }
0x2109   : > { %v3872_v60 = vadd.f32 1e-05, %v3870_v59  ;;  %v3869_v21 = vmul.f32 0.03125, %v3865_v18 }
0x210b   : > { %4750 = vrsqrt.f32 %v3872_v60  ;;  %v3871_v61 = vadd.f32 1e-05, %v3869_v21 }
0x210d   : > { %4752 = vrsqrt.f32 %v3871_v61 }
0x2118   : > { %v4751_v62 = vpop.eup %4750 }
0x2119   : > { %v3876_v0 = vmul.f32 %v4751_v62, %v3860_v49 }
0x211a   : > { %v4753_v1 = vpop.eup %4752 }
0x211b   : > { %v3884_v3 = vmul.f32 %v4126_v63, %v3876_v0  ;;  %v3875_v4 = vmul.f32 %v4753_v1, %v3859_v53 }
0x211d   : > { %v3883_v17 = vmul.f32 %v4126_v63, %v3875_v4  ;;  %v3892_v5 = vadd.f32 %v4127_v2, %v3884_v3 }
0x211f   : > { %v3891_v16 = vadd.f32 %v4127_v2, %v3883_v17  ;;  %v3894_v7 = vsel %vm662_vm1, %v3892_v5, 0.0 }
0x2121   : > { %v3893_v6 = vsel %vm658_vm0, %v3891_v16, 0.0 }
0x2122   : > { %v3895_v8 = vadd.f32 %v3894_v7, %v3893_v6 }
0x2124   : > { %v3896_v9 = vrot.slane %v3895_v8, 4 }
0x2126   : > { %v3897_v14 = vadd.f32 %v3896_v9, %v3895_v8 }
0x2128   : > { %v3898_v15 = vrot.slane %v3897_v14, 2 }
0x212a   : > { %v3899_v20 = vadd.f32 %v3898_v15, %v3897_v14 }
0x212c   : > { %v3900_v24 = vrot.slane %v3899_v20, 1 }
0x212e   : > { %v3901_v25 = vadd.f32 %v3900_v24, %v3899_v20 }
0x2130   : > { %v3903_v27 = vmul.f32 0.06666667, %v3901_v25 }
0x2132   : > { %3905 = vst.msk [vmem:[%s648_s26] sm:$0x1] %vm3904_vm12, %v3903_v27 }
0x2133   : > { %4767 = shalt.err (!%p4764_p3)
}
0x2134   : > { %s4768_s7 = scalar_lea.hbm %s3917_s2, 16  ;;  %s4772_s26 = scalar_lea.hbm %s5700_s21, 32 }
0x2135   : > { %p4769_p4 = scmp.ne.s32.totalorder %s3917_s2, %s4768_s7  ;;  %p4773_p9 = scmp.lt.s32.totalorder %s3917_s2, %s5700_s21 }
0x2136   : > { %p4774_p10 = scmp.lt.s32.totalorder %s4772_s26, %s4768_s7 }
0x2137   : > { %p4770_p7 = pnand %p4769_p4, %p4979_p5 }
0x2138   : > { %p4775_p11 = por %p4774_p10, %p4773_p9 }
0x2139   : > { %p4771_p8 = pneg %p4770_p7 }
0x213b   : > { %p4776_p12 = pnand %p4775_p11, %p4771_p8 }
0x213d   : > { %4779 = shalt.err (!%p4776_p12)
}
0x213e   : > { %4601 = dma.vmem_to_hbm [thread:$0]  (%p4979_p5), %s3920_s4, 16, %s3917_s2, %s3907_s22  }
0x213f PF: > { %s5768_s6 = sld [smem:[#allocation5_spill]]  ;;  %p4607_p13 = scmp.ge.s32.totalorder %s4814_s27, 2 }
0x2141   : > { %p4604_p0 = pnand %p4607_p13, %p4983_p6 }
0x2143   : > { %p4605_p1 = pneg %p4604_p0 }
0x2145   : > { %s3931_s1 = sand.u32 1, %s5768_s6  }
0x2146   : > { %s3932_s3 = scalar_lea.sflag [#allocation3], %s3931_s1 }
0x2147   : > { %4797 = dma.done.wait (%p4605_p1), %s3932_s3, 16  }
0x2148   : > { %4799 = vsyncadd (%p4605_p1), %s3932_s3, 4294967280  ;;  %s5770_s27 = sld [smem:[#allocation7_spill]]  ;;  %s5773_s2 = smov %s4806_s25 }
0x2149   : > { %s5771_s7 = sld [smem:[#allocation6_spill]] }
0x214a   : > { %s5772_s26 = sld [smem:[#allocation8_spill]] }
0x214e   : > { %p31_p2 = scmp.ge.s32.totalorder %s5770_s27, 4  }
0x214f   : > { %s5774_s25 = smov %s5771_s7 }
0x2150   :  { %33 = sbr.rel (!%p31_p2) target bundleno = 12 (0xc), region = 154 }
0x2155   :  { %3936 = vsyncpa [#allocation3], 1 }
0x2156   :  { %3938 = vsyncpa [#allocation3 + $0x1], 1 }

</bundles_post_ra>
